<compile_context>
chip_gen: v6e
topology: v6e:2x2x1
jax: 0.10.0
libtpu: 0.0.40
codegen_flags: <defaults>
</compile_context>

<pallas_src>
import functools
import math

import jax
import jax.numpy as jnp
from jax.experimental import pallas as pl
from jax.experimental.pallas import tpu as pltpu

DTYPE = jnp.float32
MXU_DTYPE = jnp.bfloat16   # set to jnp.float32 for exact-f32 matmuls
LN_EPS = 1e-5

# Preferred matmul tile sizes.  Re-derive per generation:
#   v6e: 256-512 (2x256^2 MXU, 128 MiB VMEM), v5e: 128-256 (4x128^2 MXU),
#   v7x: ~256 and keep VMEM headroom (64 MiB physical).
TM, TN, TK = 256, 256, 256


def _pick_tile(dim, pref, align):
    """Largest multiple of `align` <= pref that divides dim; else whole dim."""
    t = (min(pref, dim) // align) * align
    while t >= align:
        if dim % t == 0:
            return t
        t -= align
    return dim


# ----------------------------- tiled linear --------------------------------

def _matmul_kernel(x_ref, w_ref, b_ref, o_ref, acc_ref, *, activation):
    @pl.when(pl.program_id(2) == 0)
    def _():
        acc_ref[...] = jnp.zeros_like(acc_ref)

    acc_ref[...] += jnp.dot(x_ref[...].astype(MXU_DTYPE),
                            w_ref[...].astype(MXU_DTYPE),
                            preferred_element_type=jnp.float32)

    @pl.when(pl.program_id(2) == pl.num_programs(2) - 1)
    def _():
        y = acc_ref[...] + b_ref[...].astype(jnp.float32)
        if activation == "relu":
            y = jnp.maximum(y, 0.0)
        o_ref[...] = y.astype(o_ref.dtype)


def linear(x2d, w, b, activation=None):
    """y = act(x @ w + b); x2d: (M, K), w: (K, N), b: (N,)."""
    M, K = x2d.shape
    N = w.shape[1]
    tm = _pick_tile(M, TM, 8)
    tn = _pick_tile(N, TN, 128)
    tk = _pick_tile(K, TK, 128)
    return pl.pallas_call(
        functools.partial(_matmul_kernel, activation=activation),
        grid=(M // tm, N // tn, K // tk),
        out_shape=jax.ShapeDtypeStruct((M, N), x2d.dtype),
        in_specs=[pl.BlockSpec((tm, tk), lambda i, j, k: (i, k)),
                  pl.BlockSpec((tk, tn), lambda i, j, k: (k, j)),
                  pl.BlockSpec((1, tn), lambda i, j, k: (0, j))],
        out_specs=pl.BlockSpec((tm, tn), lambda i, j, k: (i, j)),
        scratch_shapes=[pltpu.VMEM((tm, tn), jnp.float32)],
        compiler_params=pltpu.CompilerParams(
            dimension_semantics=("parallel", "parallel", "arbitrary")),
    )(x2d, w, b.reshape(1, N))


# ----------------- fused: matmul + bias + residual + LayerNorm -------------

def _matmul_add_ln_kernel(x_ref, w_ref, b_ref, r_ref, g_ref, bt_ref,
                          o_ref, acc_ref, *, eps):
    @pl.when(pl.program_id(1) == 0)
    def _():
        acc_ref[...] = jnp.zeros_like(acc_ref)

    acc_ref[...] += jnp.dot(x_ref[...].astype(MXU_DTYPE),
                            w_ref[...].astype(MXU_DTYPE),
                            preferred_element_type=jnp.float32)

    @pl.when(pl.program_id(1) == pl.num_programs(1) - 1)
    def _():
        y = acc_ref[...] + b_ref[...] + r_ref[...].astype(jnp.float32)
        mu = jnp.mean(y, axis=-1, keepdims=True)
        var = jnp.mean(jnp.square(y - mu), axis=-1, keepdims=True)
        yn = (y - mu) * jax.lax.rsqrt(var + eps)
        o_ref[...] = (yn * g_ref[...] + bt_ref[...]).astype(o_ref.dtype)


def linear_add_ln(x2d, w, b, residual2d, gamma, beta):
    """LayerNorm(residual + x @ w + b); full output row (N) kept per block."""
    M, K = x2d.shape
    N = w.shape[1]
    tm = _pick_tile(M, TM, 8)
    tk = _pick_tile(K, TK, 128)
    return pl.pallas_call(
        functools.partial(_matmul_add_ln_kernel, eps=LN_EPS),
        grid=(M // tm, K // tk),
        out_shape=jax.ShapeDtypeStruct((M, N), x2d.dtype),
        in_specs=[pl.BlockSpec((tm, tk), lambda i, k: (i, k)),
                  pl.BlockSpec((tk, N), lambda i, k: (k, 0)),
                  pl.BlockSpec((1, N), lambda i, k: (0, 0)),
                  pl.BlockSpec((tm, N), lambda i, k: (i, 0)),
                  pl.BlockSpec((1, N), lambda i, k: (0, 0)),
                  pl.BlockSpec((1, N), lambda i, k: (0, 0))],
        out_specs=pl.BlockSpec((tm, N), lambda i, k: (i, 0)),
        scratch_shapes=[pltpu.VMEM((tm, N), jnp.float32)],
        compiler_params=pltpu.CompilerParams(
            dimension_semantics=("parallel", "arbitrary")),
    )(x2d, w, b.reshape(1, N), residual2d, gamma.reshape(1, N),
      beta.reshape(1, N))


# -------------------------- LayerNorm (row tiled) ---------------------------

def _ln_kernel(x_ref, g_ref, b_ref, o_ref, *, eps):
    x = x_ref[...].astype(jnp.float32)
    mu = jnp.mean(x, axis=-1, keepdims=True)
    var = jnp.mean(jnp.square(x - mu), axis=-1, keepdims=True)
    y = (x - mu) * jax.lax.rsqrt(var + eps)
    o_ref[...] = (y * g_ref[...] + b_ref[...]).astype(o_ref.dtype)


def layer_norm(x, gamma, beta):
    shp = x.shape
    D = shp[-1]
    x2 = x.reshape(-1, D)
    M = x2.shape[0]
    tm = _pick_tile(M, 512, 8)
    out = pl.pallas_call(
        functools.partial(_ln_kernel, eps=LN_EPS),
        grid=(M // tm,),
        out_shape=jax.ShapeDtypeStruct((M, D), x.dtype),
        in_specs=[pl.BlockSpec((tm, D), lambda i: (i, 0)),
                  pl.BlockSpec((1, D), lambda i: (0, 0)),
                  pl.BlockSpec((1, D), lambda i: (0, 0))],
        out_specs=pl.BlockSpec((tm, D), lambda i: (i, 0)),
        compiler_params=pltpu.CompilerParams(dimension_semantics=("parallel",)),
    )(x2, gamma.reshape(1, D), beta.reshape(1, D))
    return out.reshape(shp)


# ------------------------------ attention -----------------------------------

def _mha_kernel(q_ref, k_ref, v_ref, *rest, nhead, scale, has_mask):
    # One batch per grid step; all heads processed on lane-dense (S, D) tiles.
    if has_mask:
        m_ref, o_ref = rest
        mask = m_ref[0].astype(jnp.float32)          # (Sq, Sk), shared by heads
    else:
        (o_ref,) = rest
        mask = None

    q = q_ref[0]                                      # (Sq, D)
    k = k_ref[0]                                      # (Sk, D)
    v = v_ref[0]                                      # (Sk, D)
    ov = o_ref.at[0]                                  # (Sq, D) ref-view
    D = q.shape[-1]
    Dh = D // nhead

    # TODO(synk): for long sequences, tile over Sk with an online-softmax
    # (flash) accumulator instead of the full (Sq, Sk) score matrix.
    for h in range(nhead):
        lo = h * Dh
        qh = q[:, lo:lo + Dh].astype(MXU_DTYPE)
        kh = k[:, lo:lo + Dh].astype(MXU_DTYPE)
        vh = v[:, lo:lo + Dh].astype(MXU_DTYPE)
        # contract the shared minor axis directly (no explicit k.T transpose)
        s = jax.lax.dot_general(qh, kh, (((1,), (1,)), ((), ())),
                                preferred_element_type=jnp.float32) * scale
        if mask is not None:
            s = s + mask
        s = s - jnp.max(s, axis=-1, keepdims=True)
        p = jnp.exp(s)
        p = p * pl.reciprocal(jnp.sum(p, axis=-1, keepdims=True), approx=True)
        ctx = jnp.dot(p.astype(MXU_DTYPE), vh,
                      preferred_element_type=jnp.float32)
        ov[:, lo:lo + Dh] = ctx.astype(o_ref.dtype)


def attention(q_src, k_src, v_src, mask, nhead, d_model):
    """q_src/k_src/v_src: (array, lane_block) pairs; arrays are (B, S, m*D)
    packed along the last dim (e.g. fused QKV); lane_block picks the D-slice.
    Attention probabilities are NOT materialized (decoder discards them)."""
    (qa, qi), (ka, ki), (va, vi) = q_src, k_src, v_src
    B, Sq = qa.shape[0], qa.shape[1]
    Sk = ka.shape[1]
    D = d_model
    scale = 1.0 / math.sqrt(D // nhead)
    has_mask = mask is not None

    in_specs = [pl.BlockSpec((1, Sq, D), lambda b, _i=qi: (b, 0, _i)),
                pl.BlockSpec((1, Sk, D), lambda b, _i=ki: (b, 0, _i)),
                pl.BlockSpec((1, Sk, D), lambda b, _i=vi: (b, 0, _i))]
    args = [qa, ka, va]
    if has_mask:
        m = mask.astype(jnp.float32)
        if m.ndim == 2:
            m = m[None]
        if m.shape[0] == B:
            in_specs.append(pl.BlockSpec((1, Sq, Sk), lambda b: (b, 0, 0)))
        else:  # broadcast mask: DMA'd once, reused for all batches & heads
            in_specs.append(pl.BlockSpec((1, Sq, Sk), lambda b: (0, 0, 0)))
        args.append(m)

    return pl.pallas_call(
        functools.partial(_mha_kernel, nhead=nhead, scale=scale,
                          has_mask=has_mask),
        grid=(B,),
        out_shape=jax.ShapeDtypeStruct((B, Sq, D), qa.dtype),
        in_specs=in_specs,
        out_specs=pl.BlockSpec((1, Sq, D), lambda b: (b, 0, 0)),
        compiler_params=pltpu.CompilerParams(dimension_semantics=("parallel",)),
    )(*args)


# ------------------------- decoder layer / stack ----------------------------

def decoder_layer(tgt, memory, p, self_attn_mask, enc_attn_mask, nhead):
    B, S, D = tgt.shape
    Sm = memory.shape[1]
    t2 = tgt.reshape(B * S, D)

    # --- self attention: fused QKV projection, in-kernel head handling ---
    qkv = linear(t2, p["sa_w_qkv"], p["sa_b_qkv"]).reshape(B, S, 3 * D)
    ctx = attention((qkv, 0), (qkv, 1), (qkv, 2), self_attn_mask, nhead, D)
    # output projection + residual + LN1 fused into one kernel
    x2 = linear_add_ln(ctx.reshape(B * S, D), p["sa_wo"], p["sa_bo"],
                       t2, p["ln1_g"], p["ln1_b"])
    x = x2.reshape(B, S, D)

    # --- cross attention: fused KV projection of memory ---
    q = linear(x2, p["ca_wq"], p["ca_bq"]).reshape(B, S, D)
    kv = linear(memory.reshape(B * Sm, D),
                p["ca_w_kv"], p["ca_b_kv"]).reshape(B, Sm, 2 * D)
    ctx = attention((q, 0), (kv, 0), (kv, 1), enc_attn_mask, nhead, D)
    y2 = linear_add_ln(ctx.reshape(B * S, D), p["ca_wo"], p["ca_bo"],
                       x2, p["ln2_g"], p["ln2_b"])

    # --- feed forward: relu fused in matmul-1; add+LN3 fused in matmul-2 ---
    h = linear(y2, p["w1"], p["b1"], activation="relu")
    out2 = linear_add_ln(h, p["w2"], p["b2"], y2, p["ln3_g"], p["ln3_b"])
    return out2.reshape(B, S, D)


def transformer_decoder(tgt, memory, layer_params, final_norm, nhead,
                        dec_self_attn_mask=None, dec_enc_attn_pad_mask=None):
    output = tgt
    for p in layer_params:
        output = decoder_layer(output, memory, p, dec_self_attn_mask,
                               dec_enc_attn_pad_mask, nhead)
    if final_norm is not None:
        g, b = final_norm
        output = layer_norm(output, g, b)       # LN-only path (no zeros add)
    return output


# ------------------------------ param init ----------------------------------

def init_layer_params(key, d_model, dim_ff):
    ks = jax.random.split(key, 7)

    def w(k, shape):
        return (0.02 * jax.random.normal(k, shape)).astype(DTYPE)

    return {
        "sa_w_qkv": w(ks[0], (d_model, 3 * d_model)),
        "sa_b_qkv": jnp.zeros((3 * d_model,), DTYPE),
        "sa_wo": w(ks[1], (d_model, d_model)),
        "sa_bo": jnp.zeros((d_model,), DTYPE),
        "ca_wq": w(ks[2], (d_model, d_model)),
        "ca_bq": jnp.zeros((d_model,), DTYPE),
        "ca_w_kv": w(ks[3], (d_model, 2 * d_model)),
        "ca_b_kv": jnp.zeros((2 * d_model,), DTYPE),
        "ca_wo": w(ks[4], (d_model, d_model)),
        "ca_bo": jnp.zeros((d_model,), DTYPE),
        "w1": w(ks[5], (d_model, dim_ff)),
        "b1": jnp.zeros((dim_ff,), DTYPE),
        "w2": w(ks[6], (dim_ff, d_model)),
        "b2": jnp.zeros((d_model,), DTYPE),
        "ln1_g": jnp.ones((d_model,), DTYPE), "ln1_b": jnp.zeros((d_model,), DTYPE),
        "ln2_g": jnp.ones((d_model,), DTYPE), "ln2_b": jnp.zeros((d_model,), DTYPE),
        "ln3_g": jnp.ones((d_model,), DTYPE), "ln3_b": jnp.zeros((d_model,), DTYPE),
    }


# ---------------------------------- main -------------------------------------

if __name__ == "__main__":
    B, S_TGT, S_MEM = 2, 8, 8
    D_MODEL, NHEAD, DIM_FF = 128, 4, 256
    NUM_LAYERS = 2

    root = jax.random.PRNGKey(0)
    k_tgt, k_mem, k_params = jax.random.split(root, 3)

    tgt = jax.random.normal(k_tgt, (B, S_TGT, D_MODEL), DTYPE)
    memory = jax.random.normal(k_mem, (B, S_MEM, D_MODEL), DTYPE)

    layer_keys = jax.random.split(k_params, NUM_LAYERS)
    layer_params = [init_layer_params(k, D_MODEL, DIM_FF) for k in layer_keys]
    final_norm = (jnp.ones((D_MODEL,), DTYPE), jnp.zeros((D_MODEL,), DTYPE))

    # causal (look-ahead) additive mask for decoder self-attention:
    # compact (1, Sq, Sq) — DMA'd once, reused across batches/heads in-kernel.
    row = jnp.arange(S_TGT)[:, None]
    col = jnp.arange(S_TGT)[None, :]
    dec_self_attn_mask = jnp.where(col > row, -1e9, 0.0)[None, :, :]
    dec_enc_attn_pad_mask = None   # no padding in this synthetic example

    @jax.jit
    def run(tgt_, memory_, params_, fnorm_, self_mask_):
        return transformer_decoder(tgt_, memory_, params_, fnorm_, NHEAD,
                                   dec_self_attn_mask=self_mask_,
                                   dec_enc_attn_pad_mask=None)

    out = run(tgt, memory, layer_params, final_norm, dec_self_attn_mask)
    out = jax.block_until_ready(out)
    assert out.shape == (B, S_TGT, D_MODEL)
    assert bool(jnp.all(jnp.isfinite(out)))
    print("KERNEL_OK")
</pallas_src>

<mosaic_0001>
module attributes {stable_mosaic.version = 11 : i64} {
  func.func @_matmul_kernel(%arg0: i32, %arg1: i32, %arg2: i32, %arg3: memref<16x128xf32, #tpu.memory_space<vmem>>, %arg4: memref<128x128xf32, #tpu.memory_space<vmem>>, %arg5: memref<1x128xf32, #tpu.memory_space<vmem>>, %arg6: memref<16x128xf32, #tpu.memory_space<vmem>>, %arg7: memref<16x128xf32, #tpu.memory_space<vmem>>) attributes {dimension_semantics = [#tpu.dimension_semantics<parallel>, #tpu.dimension_semantics<parallel>, #tpu.dimension_semantics<arbitrary>], iteration_bounds = array<i64: 1, 3, 1>, scalar_prefetch = 0 : i64, scratch_operands = 1 : i64, tpu.core_type = #tpu.core_type<tc>, window_params = [{transform_indices = @transform_0, window_bounds = array<i64: 16, 128>}, {transform_indices = @transform_1, window_bounds = array<i64: 128, 128>}, {transform_indices = @transform_2, window_bounds = array<i64: 1, 128>}, {transform_indices = @transform_3, window_bounds = array<i64: 16, 128>}]} {
    %c0_i32 = arith.constant 0 : i32
    %0 = arith.cmpi eq, %arg2, %c0_i32 : i32
    %1 = arith.extui %0 : i1 to i32
    %c0_i32_0 = arith.constant 0 : i32
    %2 = arith.cmpi ne, %1, %c0_i32_0 : i32
    scf.if %2 {
      %cst_10 = arith.constant 0.000000e+00 : f32
      %14 = vector.broadcast %cst_10 : f32 to vector<16x128xf32>
      %c0_11 = arith.constant 0 : index
      %c0_12 = arith.constant 0 : index
      %15 = vector.load %arg7[%c0_11, %c0_12] : memref<16x128xf32, #tpu.memory_space<vmem>>, vector<16x128xf32>
      tpu.vector_store %arg7[%c0_11, %c0_12], %14 {strides = array<i32>} : memref<16x128xf32, #tpu.memory_space<vmem>>, vector<16x128xf32>,
    } else {
    }
    %c0 = arith.constant 0 : index
    %c0_1 = arith.constant 0 : index
    %3 = vector.load %arg7[%c0, %c0_1] : memref<16x128xf32, #tpu.memory_space<vmem>>, vector<16x128xf32>
    %c0_2 = arith.constant 0 : index
    %c0_3 = arith.constant 0 : index
    %4 = vector.load %arg3[%c0_2, %c0_3] : memref<16x128xf32, #tpu.memory_space<vmem>>, vector<16x128xf32>
    %5 = arith.truncf %4 : vector<16x128xf32> to vector<16x128xbf16>
    %c0_4 = arith.constant 0 : index
    %c0_5 = arith.constant 0 : index
    %6 = vector.load %arg4[%c0_4, %c0_5] : memref<128x128xf32, #tpu.memory_space<vmem>>, vector<128x128xf32>
    %7 = arith.truncf %6 : vector<128x128xf32> to vector<128x128xbf16>
    %cst = arith.constant dense<0.000000e+00> : vector<16x128xf32>
    %8 = tpu.matmul %5, %7, %cst {dimension_numbers = #tpu.dot_dimension_numbers<[1], [0], [0], [1], [0, 0, 1, 1], [], []>} : vector<16x128xbf16>, vector<128x128xbf16>, vector<16x128xf32> -> vector<16x128xf32>
    %9 = arith.addf %3, %8 : vector<16x128xf32>
    %c0_6 = arith.constant 0 : index
    %c0_7 = arith.constant 0 : index
    %10 = vector.load %arg7[%c0_6, %c0_7] : memref<16x128xf32, #tpu.memory_space<vmem>>, vector<16x128xf32>
    tpu.vector_store %arg7[%c0_6, %c0_7], %9 {strides = array<i32>} : memref<16x128xf32, #tpu.memory_space<vmem>>, vector<16x128xf32>,
    %c0_i32_8 = arith.constant 0 : i32
    %11 = arith.cmpi eq, %arg2, %c0_i32_8 : i32
    %12 = arith.extui %11 : i1 to i32
    %c0_i32_9 = arith.constant 0 : i32
    %13 = arith.cmpi ne, %12, %c0_i32_9 : i32
    scf.if %13 {
      %c0_10 = arith.constant 0 : index
      %c0_11 = arith.constant 0 : index
      %14 = vector.load %arg7[%c0_10, %c0_11] : memref<16x128xf32, #tpu.memory_space<vmem>>, vector<16x128xf32>
      %c0_12 = arith.constant 0 : index
      %c0_13 = arith.constant 0 : index
      %15 = vector.load %arg5[%c0_12, %c0_13] : memref<1x128xf32, #tpu.memory_space<vmem>>, vector<1x128xf32>
      %16 = vector.broadcast %15 : vector<1x128xf32> to vector<16x128xf32>
      %17 = arith.addf %14, %16 : vector<16x128xf32>
      %c0_14 = arith.constant 0 : index
      %c0_15 = arith.constant 0 : index
      %18 = vector.load %arg6[%c0_14, %c0_15] : memref<16x128xf32, #tpu.memory_space<vmem>>, vector<16x128xf32>
      tpu.vector_store %arg6[%c0_14, %c0_15], %17 {strides = array<i32>} : memref<16x128xf32, #tpu.memory_space<vmem>>, vector<16x128xf32>,
    } else {
    }
    return
  }
  func.func @transform_0(%arg0: i32, %arg1: i32, %arg2: i32) -> (i32, i32) {
    %c0_i32 = arith.constant 0 : i32
    return %arg0, %arg2 : i32, i32
  }
  func.func @transform_1(%arg0: i32, %arg1: i32, %arg2: i32) -> (i32, i32) {
    %c0_i32 = arith.constant 0 : i32
    return %arg2, %arg1 : i32, i32
  }
  func.func @transform_2(%arg0: i32, %arg1: i32, %arg2: i32) -> (i32, i32) {
    %c0_i32 = arith.constant 0 : i32
    %c0_i32_0 = arith.constant 0 : i32
    return %c0_i32, %arg1 : i32, i32
  }
  func.func @transform_3(%arg0: i32, %arg1: i32, %arg2: i32) -> (i32, i32) {
    %c0_i32 = arith.constant 0 : i32
    return %arg0, %arg1 : i32, i32
  }
}

module attributes {stable_mosaic.version = 11 : i64} {
  func.func @_matmul_add_ln_kernel(%arg0: i32, %arg1: i32, %arg2: memref<16x128xf32, #tpu.memory_space<vmem>>, %arg3: memref<128x128xf32, #tpu.memory_space<vmem>>, %arg4: memref<1x128xf32, #tpu.memory_space<vmem>>, %arg5: memref<16x128xf32, #tpu.memory_space<vmem>>, %arg6: memref<1x128xf32, #tpu.memory_space<vmem>>, %arg7: memref<1x128xf32, #tpu.memory_space<vmem>>, %arg8: memref<16x128xf32, #tpu.memory_space<vmem>>, %arg9: memref<16x128xf32, #tpu.memory_space<vmem>>) attributes {dimension_semantics = [#tpu.dimension_semantics<parallel>, #tpu.dimension_semantics<arbitrary>], iteration_bounds = array<i64: 1, 1>, scalar_prefetch = 0 : i64, scratch_operands = 1 : i64, tpu.core_type = #tpu.core_type<tc>, window_params = [{transform_indices = @transform_0, window_bounds = array<i64: 16, 128>}, {transform_indices = @transform_1, window_bounds = array<i64: 128, 128>}, {pipeline_mode = #tpu.pipeline_mode<synchronous>, transform_indices = @transform_2, window_bounds = array<i64: 1, 128>}, {transform_indices = @transform_3, window_bounds = array<i64: 16, 128>}, {pipeline_mode = #tpu.pipeline_mode<synchronous>, transform_indices = @transform_4, window_bounds = array<i64: 1, 128>}, {pipeline_mode = #tpu.pipeline_mode<synchronous>, transform_indices = @transform_5, window_bounds = array<i64: 1, 128>}, {transform_indices = @transform_6, window_bounds = array<i64: 16, 128>}]} {
    %c0_i32 = arith.constant 0 : i32
    %0 = arith.cmpi eq, %arg1, %c0_i32 : i32
    %1 = arith.extui %0 : i1 to i32
    %c0_i32_0 = arith.constant 0 : i32
    %2 = arith.cmpi ne, %1, %c0_i32_0 : i32
    scf.if %2 {
      %cst_10 = arith.constant 0.000000e+00 : f32
      %14 = vector.broadcast %cst_10 : f32 to vector<16x128xf32>
      %c0_11 = arith.constant 0 : index
      %c0_12 = arith.constant 0 : index
      %15 = vector.load %arg9[%c0_11, %c0_12] : memref<16x128xf32, #tpu.memory_space<vmem>>, vector<16x128xf32>
      tpu.vector_store %arg9[%c0_11, %c0_12], %14 {strides = array<i32>} : memref<16x128xf32, #tpu.memory_space<vmem>>, vector<16x128xf32>,
    } else {
    }
    %c0 = arith.constant 0 : index
    %c0_1 = arith.constant 0 : index
    %3 = vector.load %arg9[%c0, %c0_1] : memref<16x128xf32, #tpu.memory_space<vmem>>, vector<16x128xf32>
    %c0_2 = arith.constant 0 : index
    %c0_3 = arith.constant 0 : index
    %4 = vector.load %arg2[%c0_2, %c0_3] : memref<16x128xf32, #tpu.memory_space<vmem>>, vector<16x128xf32>
    %5 = arith.truncf %4 : vector<16x128xf32> to vector<16x128xbf16>
    %c0_4 = arith.constant 0 : index
    %c0_5 = arith.constant 0 : index
    %6 = vector.load %arg3[%c0_4, %c0_5] : memref<128x128xf32, #tpu.memory_space<vmem>>, vector<128x128xf32>
    %7 = arith.truncf %6 : vector<128x128xf32> to vector<128x128xbf16>
    %cst = arith.constant dense<0.000000e+00> : vector<16x128xf32>
    %8 = tpu.matmul %5, %7, %cst {dimension_numbers = #tpu.dot_dimension_numbers<[1], [0], [0], [1], [0, 0, 1, 1], [], []>} : vector<16x128xbf16>, vector<128x128xbf16>, vector<16x128xf32> -> vector<16x128xf32>
    %9 = arith.addf %3, %8 : vector<16x128xf32>
    %c0_6 = arith.constant 0 : index
    %c0_7 = arith.constant 0 : index
    %10 = vector.load %arg9[%c0_6, %c0_7] : memref<16x128xf32, #tpu.memory_space<vmem>>, vector<16x128xf32>
    tpu.vector_store %arg9[%c0_6, %c0_7], %9 {strides = array<i32>} : memref<16x128xf32, #tpu.memory_space<vmem>>, vector<16x128xf32>,
    %c0_i32_8 = arith.constant 0 : i32
    %11 = arith.cmpi eq, %arg1, %c0_i32_8 : i32
    %12 = arith.extui %11 : i1 to i32
    %c0_i32_9 = arith.constant 0 : i32
    %13 = arith.cmpi ne, %12, %c0_i32_9 : i32
    scf.if %13 {
      %c0_10 = arith.constant 0 : index
      %c0_11 = arith.constant 0 : index
      %14 = vector.load %arg9[%c0_10, %c0_11] : memref<16x128xf32, #tpu.memory_space<vmem>>, vector<16x128xf32>
      %c0_12 = arith.constant 0 : index
      %c0_13 = arith.constant 0 : index
      %15 = vector.load %arg4[%c0_12, %c0_13] : memref<1x128xf32, #tpu.memory_space<vmem>>, vector<1x128xf32>
      %16 = vector.broadcast %15 : vector<1x128xf32> to vector<16x128xf32>
      %17 = arith.addf %14, %16 : vector<16x128xf32>
      %c0_14 = arith.constant 0 : index
      %c0_15 = arith.constant 0 : index
      %18 = vector.load %arg5[%c0_14, %c0_15] : memref<16x128xf32, #tpu.memory_space<vmem>>, vector<16x128xf32>
      %19 = arith.addf %17, %18 : vector<16x128xf32>
      %cst_16 = arith.constant dense<0.000000e+00> : vector<16xf32>
      %20 = vector.multi_reduction <add>, %19, %cst_16 [1] : vector<16x128xf32> to vector<16xf32>
      %21 = vector.shape_cast %20 : vector<16xf32> to vector<16x1xf32>
      %cst_17 = arith.constant 1.280000e+02 : f32
      %22 = vector.broadcast %cst_17 : f32 to vector<16x1xf32>
      %23 = arith.divf %21, %22 : vector<16x1xf32>
      %24 = vector.broadcast %23 : vector<16x1xf32> to vector<16x128xf32>
      %25 = arith.subf %19, %24 : vector<16x128xf32>
      %26 = arith.mulf %25, %25 : vector<16x128xf32>
      %cst_18 = arith.constant dense<0.000000e+00> : vector<16xf32>
      %27 = vector.multi_reduction <add>, %26, %cst_18 [1] : vector<16x128xf32> to vector<16xf32>
      %28 = vector.shape_cast %27 : vector<16xf32> to vector<16x1xf32>
      %cst_19 = arith.constant 1.280000e+02 : f32
      %29 = vector.broadcast %cst_19 : f32 to vector<16x1xf32>
      %30 = arith.divf %28, %29 : vector<16x1xf32>
      %31 = vector.broadcast %23 : vector<16x1xf32> to vector<16x128xf32>
      %32 = arith.subf %19, %31 : vector<16x128xf32>
      %cst_20 = arith.constant 9.99999974E-6 : f32
      %33 = vector.broadcast %cst_20 : f32 to vector<16x1xf32>
      %34 = arith.addf %30, %33 : vector<16x1xf32>
      %35 = math.rsqrt %34 : vector<16x1xf32>
      %36 = vector.broadcast %35 : vector<16x1xf32> to vector<16x128xf32>
      %37 = arith.mulf %32, %36 : vector<16x128xf32>
      %c0_21 = arith.constant 0 : index
      %c0_22 = arith.constant 0 : index
      %38 = vector.load %arg6[%c0_21, %c0_22] : memref<1x128xf32, #tpu.memory_space<vmem>>, vector<1x128xf32>
      %39 = vector.broadcast %38 : vector<1x128xf32> to vector<16x128xf32>
      %40 = arith.mulf %37, %39 : vector<16x128xf32>
      %c0_23 = arith.constant 0 : index
      %c0_24 = arith.constant 0 : index
      %41 = vector.load %arg7[%c0_23, %c0_24] : memref<1x128xf32, #tpu.memory_space<vmem>>, vector<1x128xf32>
      %42 = vector.broadcast %41 : vector<1x128xf32> to vector<16x128xf32>
      %43 = arith.addf %40, %42 : vector<16x128xf32>
      %c0_25 = arith.constant 0 : index
      %c0_26 = arith.constant 0 : index
      %44 = vector.load %arg8[%c0_25, %c0_26] : memref<16x128xf32, #tpu.memory_space<vmem>>, vector<16x128xf32>
      tpu.vector_store %arg8[%c0_25, %c0_26], %43 {strides = array<i32>} : memref<16x128xf32, #tpu.memory_space<vmem>>, vector<16x128xf32>,
    } else {
    }
    return
  }
  func.func @transform_0(%arg0: i32, %arg1: i32) -> (i32, i32) {
    %c0_i32 = arith.constant 0 : i32
    return %arg0, %arg1 : i32, i32
  }
  func.func @transform_1(%arg0: i32, %arg1: i32) -> (i32, i32) {
    %c0_i32 = arith.constant 0 : i32
    %c0_i32_0 = arith.constant 0 : i32
    return %arg1, %c0_i32 : i32, i32
  }
  func.func @transform_2(%arg0: i32, %arg1: i32) -> (i32, i32) {
    %c0_i32 = arith.constant 0 : i32
    %c0_i32_0 = arith.constant 0 : i32
    %c0_i32_1 = arith.constant 0 : i32
    return %c0_i32, %c0_i32_0 : i32, i32
  }
  func.func @transform_3(%arg0: i32, %arg1: i32) -> (i32, i32) {
    %c0_i32 = arith.constant 0 : i32
    %c0_i32_0 = arith.constant 0 : i32
    return %arg0, %c0_i32 : i32, i32
  }
  func.func @transform_4(%arg0: i32, %arg1: i32) -> (i32, i32) {
    %c0_i32 = arith.constant 0 : i32
    %c0_i32_0 = arith.constant 0 : i32
    %c0_i32_1 = arith.constant 0 : i32
    return %c0_i32, %c0_i32_0 : i32, i32
  }
  func.func @transform_5(%arg0: i32, %arg1: i32) -> (i32, i32) {
    %c0_i32 = arith.constant 0 : i32
    %c0_i32_0 = arith.constant 0 : i32
    %c0_i32_1 = arith.constant 0 : i32
    return %c0_i32, %c0_i32_0 : i32, i32
  }
  func.func @transform_6(%arg0: i32, %arg1: i32) -> (i32, i32) {
    %c0_i32 = arith.constant 0 : i32
    %c0_i32_0 = arith.constant 0 : i32
    return %arg0, %c0_i32 : i32, i32
  }
}

module attributes {stable_mosaic.version = 11 : i64} {
  func.func @_mha_kernel(%arg0: i32, %arg1: memref<1x8x128xf32, #tpu.memory_space<vmem>>, %arg2: memref<1x8x128xf32, #tpu.memory_space<vmem>>, %arg3: memref<1x8x128xf32, #tpu.memory_space<vmem>>, %arg4: memref<1x8x8xf32, #tpu.memory_space<vmem>>, %arg5: memref<1x8x128xf32, #tpu.memory_space<vmem>>) attributes {dimension_semantics = [#tpu.dimension_semantics<parallel>], iteration_bounds = array<i64: 2>, scalar_prefetch = 0 : i64, scratch_operands = 0 : i64, tpu.core_type = #tpu.core_type<tc>, window_params = [{transform_indices = @transform_0, window_bounds = array<i64: 1, 8, 128>}, {transform_indices = @transform_1, window_bounds = array<i64: 1, 8, 128>}, {transform_indices = @transform_2, window_bounds = array<i64: 1, 8, 128>}, {pipeline_mode = #tpu.pipeline_mode<synchronous>, transform_indices = @transform_3, window_bounds = array<i64: 1, 8, 8>}, {transform_indices = @transform_4, window_bounds = array<i64: 1, 8, 128>}]} {
    %c0 = arith.constant 0 : index
    %c0_0 = arith.constant 0 : index
    %c0_1 = arith.constant 0 : index
    %0 = vector.load %arg4[%c0, %c0_0, %c0_1] : memref<1x8x8xf32, #tpu.memory_space<vmem>>, vector<1x8x8xf32>
    %1 = vector.shape_cast %0 : vector<1x8x8xf32> to vector<8x8xf32>
    %c0_2 = arith.constant 0 : index
    %c0_3 = arith.constant 0 : index
    %c0_4 = arith.constant 0 : index
    %2 = vector.load %arg1[%c0_2, %c0_3, %c0_4] : memref<1x8x128xf32, #tpu.memory_space<vmem>>, vector<1x8x128xf32>
    %3 = vector.shape_cast %2 : vector<1x8x128xf32> to vector<8x128xf32>
    %c0_5 = arith.constant 0 : index
    %c0_6 = arith.constant 0 : index
    %c0_7 = arith.constant 0 : index
    %4 = vector.load %arg2[%c0_5, %c0_6, %c0_7] : memref<1x8x128xf32, #tpu.memory_space<vmem>>, vector<1x8x128xf32>
    %5 = vector.shape_cast %4 : vector<1x8x128xf32> to vector<8x128xf32>
    %c0_8 = arith.constant 0 : index
    %c0_9 = arith.constant 0 : index
    %c0_10 = arith.constant 0 : index
    %6 = vector.load %arg3[%c0_8, %c0_9, %c0_10] : memref<1x8x128xf32, #tpu.memory_space<vmem>>, vector<1x8x128xf32>
    %7 = vector.shape_cast %6 : vector<1x8x128xf32> to vector<8x128xf32>
    %8 = vector.extract_strided_slice %3 {offsets = [0, 0], sizes = [8, 32], strides = [1, 1]} : vector<8x128xf32> to vector<8x32xf32>
    %9 = arith.truncf %8 : vector<8x32xf32> to vector<8x32xbf16>
    %10 = vector.extract_strided_slice %5 {offsets = [0, 0], sizes = [8, 32], strides = [1, 1]} : vector<8x128xf32> to vector<8x32xf32>
    %11 = arith.truncf %10 : vector<8x32xf32> to vector<8x32xbf16>
    %12 = vector.extract_strided_slice %7 {offsets = [0, 0], sizes = [8, 32], strides = [1, 1]} : vector<8x128xf32> to vector<8x32xf32>
    %13 = arith.truncf %12 : vector<8x32xf32> to vector<8x32xbf16>
    %cst = arith.constant dense<0.000000e+00> : vector<8x8xf32>
    %14 = tpu.matmul %9, %11, %cst {dimension_numbers = #tpu.dot_dimension_numbers<[1], [1], [0], [0], [0, 0, 1, 0], [], []>} : vector<8x32xbf16>, vector<8x32xbf16>, vector<8x8xf32> -> vector<8x8xf32>
    %cst_11 = arith.constant 0.176776692 : f32
    %15 = vector.broadcast %cst_11 : f32 to vector<8x8xf32>
    %16 = arith.mulf %14, %15 : vector<8x8xf32>
    %17 = arith.addf %16, %1 : vector<8x8xf32>
    %cst_12 = arith.constant dense<0xFF800000> : vector<8xf32>
    %18 = vector.multi_reduction <maximumf>, %17, %cst_12 [1] : vector<8x8xf32> to vector<8xf32>
    %19 = vector.shape_cast %18 : vector<8xf32> to vector<8x1xf32>
    %20 = vector.broadcast %19 : vector<8x1xf32> to vector<8x8xf32>
    %21 = arith.subf %17, %20 : vector<8x8xf32>
    %22 = math.exp %21 : vector<8x8xf32>
    %cst_13 = arith.constant dense<0.000000e+00> : vector<8xf32>
    %23 = vector.multi_reduction <add>, %22, %cst_13 [1] : vector<8x8xf32> to vector<8xf32>
    %24 = vector.shape_cast %23 : vector<8xf32> to vector<8x1xf32>
    %25 = tpu.reciprocal %24 {approx = true} : vector<8x1xf32> -> vector<8x1xf32>
    %26 = vector.broadcast %25 : vector<8x1xf32> to vector<8x8xf32>
    %27 = arith.mulf %22, %26 : vector<8x8xf32>
    %28 = arith.truncf %27 : vector<8x8xf32> to vector<8x8xbf16>
    %cst_14 = arith.constant dense<0.000000e+00> : vector<8x32xf32>
    %29 = tpu.matmul %28, %13, %cst_14 {dimension_numbers = #tpu.dot_dimension_numbers<[1], [0], [0], [1], [0, 0, 1, 1], [], []>} : vector<8x8xbf16>, vector<8x32xbf16>, vector<8x32xf32> -> vector<8x32xf32>
    %c0_i32 = arith.constant 0 : i32
    %c0_i32_15 = arith.constant 0 : i32
    %c0_i32_16 = arith.constant 0 : i32
    %30 = tpu.memref_slice %arg5[%c0_i32, %c0_i32_15, %c0_i32_16] : memref<1x8x128xf32, #tpu.memory_space<vmem>> -> memref<1x8x128xf32, #tpu.memory_space<vmem>>
    %31 = tpu.memref_squeeze %30 : memref<1x8x128xf32, #tpu.memory_space<vmem>> -> memref<8x128xf32, #tpu.memory_space<vmem>>
    %c0_17 = arith.constant 0 : index
    %c0_18 = arith.constant 0 : index
    %32 = vector.load %31[%c0_17, %c0_18] : memref<8x128xf32, #tpu.memory_space<vmem>>, vector<8x32xf32>
    tpu.vector_store %31[%c0_17, %c0_18], %29 {strides = array<i32>} : memref<8x128xf32, #tpu.memory_space<vmem>>, vector<8x32xf32>,
    %33 = vector.extract_strided_slice %3 {offsets = [0, 32], sizes = [8, 32], strides = [1, 1]} : vector<8x128xf32> to vector<8x32xf32>
    %34 = arith.truncf %33 : vector<8x32xf32> to vector<8x32xbf16>
    %35 = vector.extract_strided_slice %5 {offsets = [0, 32], sizes = [8, 32], strides = [1, 1]} : vector<8x128xf32> to vector<8x32xf32>
    %36 = arith.truncf %35 : vector<8x32xf32> to vector<8x32xbf16>
    %37 = vector.extract_strided_slice %7 {offsets = [0, 32], sizes = [8, 32], strides = [1, 1]} : vector<8x128xf32> to vector<8x32xf32>
    %38 = arith.truncf %37 : vector<8x32xf32> to vector<8x32xbf16>
    %cst_19 = arith.constant dense<0.000000e+00> : vector<8x8xf32>
    %39 = tpu.matmul %34, %36, %cst_19 {dimension_numbers = #tpu.dot_dimension_numbers<[1], [1], [0], [0], [0, 0, 1, 0], [], []>} : vector<8x32xbf16>, vector<8x32xbf16>, vector<8x8xf32> -> vector<8x8xf32>
    %cst_20 = arith.constant 0.176776692 : f32
    %40 = vector.broadcast %cst_20 : f32 to vector<8x8xf32>
    %41 = arith.mulf %39, %40 : vector<8x8xf32>
    %42 = arith.addf %41, %1 : vector<8x8xf32>
    %cst_21 = arith.constant dense<0xFF800000> : vector<8xf32>
    %43 = vector.multi_reduction <maximumf>, %42, %cst_21 [1] : vector<8x8xf32> to vector<8xf32>
    %44 = vector.shape_cast %43 : vector<8xf32> to vector<8x1xf32>
    %45 = vector.broadcast %44 : vector<8x1xf32> to vector<8x8xf32>
    %46 = arith.subf %42, %45 : vector<8x8xf32>
    %47 = math.exp %46 : vector<8x8xf32>
    %cst_22 = arith.constant dense<0.000000e+00> : vector<8xf32>
    %48 = vector.multi_reduction <add>, %47, %cst_22 [1] : vector<8x8xf32> to vector<8xf32>
    %49 = vector.shape_cast %48 : vector<8xf32> to vector<8x1xf32>
    %50 = tpu.reciprocal %49 {approx = true} : vector<8x1xf32> -> vector<8x1xf32>
    %51 = vector.broadcast %50 : vector<8x1xf32> to vector<8x8xf32>
    %52 = arith.mulf %47, %51 : vector<8x8xf32>
    %53 = arith.truncf %52 : vector<8x8xf32> to vector<8x8xbf16>
    %cst_23 = arith.constant dense<0.000000e+00> : vector<8x32xf32>
    %54 = tpu.matmul %53, %38, %cst_23 {dimension_numbers = #tpu.dot_dimension_numbers<[1], [0], [0], [1], [0, 0, 1, 1], [], []>} : vector<8x8xbf16>, vector<8x32xbf16>, vector<8x32xf32> -> vector<8x32xf32>
    %c0_i32_24 = arith.constant 0 : i32
    %c0_i32_25 = arith.constant 0 : i32
    %c0_i32_26 = arith.constant 0 : i32
    %55 = tpu.memref_slice %arg5[%c0_i32_24, %c0_i32_25, %c0_i32_26] : memref<1x8x128xf32, #tpu.memory_space<vmem>> -> memref<1x8x128xf32, #tpu.memory_space<vmem>>
    %56 = tpu.memref_squeeze %55 : memref<1x8x128xf32, #tpu.memory_space<vmem>> -> memref<8x128xf32, #tpu.memory_space<vmem>>
    %c0_27 = arith.constant 0 : index
    %c32 = arith.constant 32 : index
    %57 = vector.load %56[%c0_27, %c32] : memref<8x128xf32, #tpu.memory_space<vmem>>, vector<8x32xf32>
    tpu.vector_store %56[%c0_27, %c32], %54 {strides = array<i32>} : memref<8x128xf32, #tpu.memory_space<vmem>>, vector<8x32xf32>,
    %58 = vector.extract_strided_slice %3 {offsets = [0, 64], sizes = [8, 32], strides = [1, 1]} : vector<8x128xf32> to vector<8x32xf32>
    %59 = arith.truncf %58 : vector<8x32xf32> to vector<8x32xbf16>
    %60 = vector.extract_strided_slice %5 {offsets = [0, 64], sizes = [8, 32], strides = [1, 1]} : vector<8x128xf32> to vector<8x32xf32>
    %61 = arith.truncf %60 : vector<8x32xf32> to vector<8x32xbf16>
    %62 = vector.extract_strided_slice %7 {offsets = [0, 64], sizes = [8, 32], strides = [1, 1]} : vector<8x128xf32> to vector<8x32xf32>
    %63 = arith.truncf %62 : vector<8x32xf32> to vector<8x32xbf16>
    %cst_28 = arith.constant dense<0.000000e+00> : vector<8x8xf32>
    %64 = tpu.matmul %59, %61, %cst_28 {dimension_numbers = #tpu.dot_dimension_numbers<[1], [1], [0], [0], [0, 0, 1, 0], [], []>} : vector<8x32xbf16>, vector<8x32xbf16>, vector<8x8xf32> -> vector<8x8xf32>
    %cst_29 = arith.constant 0.176776692 : f32
    %65 = vector.broadcast %cst_29 : f32 to vector<8x8xf32>
    %66 = arith.mulf %64, %65 : vector<8x8xf32>
    %67 = arith.addf %66, %1 : vector<8x8xf32>
    %cst_30 = arith.constant dense<0xFF800000> : vector<8xf32>
    %68 = vector.multi_reduction <maximumf>, %67, %cst_30 [1] : vector<8x8xf32> to vector<8xf32>
    %69 = vector.shape_cast %68 : vector<8xf32> to vector<8x1xf32>
    %70 = vector.broadcast %69 : vector<8x1xf32> to vector<8x8xf32>
    %71 = arith.subf %67, %70 : vector<8x8xf32>
    %72 = math.exp %71 : vector<8x8xf32>
    %cst_31 = arith.constant dense<0.000000e+00> : vector<8xf32>
    %73 = vector.multi_reduction <add>, %72, %cst_31 [1] : vector<8x8xf32> to vector<8xf32>
    %74 = vector.shape_cast %73 : vector<8xf32> to vector<8x1xf32>
    %75 = tpu.reciprocal %74 {approx = true} : vector<8x1xf32> -> vector<8x1xf32>
    %76 = vector.broadcast %75 : vector<8x1xf32> to vector<8x8xf32>
    %77 = arith.mulf %72, %76 : vector<8x8xf32>
    %78 = arith.truncf %77 : vector<8x8xf32> to vector<8x8xbf16>
    %cst_32 = arith.constant dense<0.000000e+00> : vector<8x32xf32>
    %79 = tpu.matmul %78, %63, %cst_32 {dimension_numbers = #tpu.dot_dimension_numbers<[1], [0], [0], [1], [0, 0, 1, 1], [], []>} : vector<8x8xbf16>, vector<8x32xbf16>, vector<8x32xf32> -> vector<8x32xf32>
    %c0_i32_33 = arith.constant 0 : i32
    %c0_i32_34 = arith.constant 0 : i32
    %c0_i32_35 = arith.constant 0 : i32
    %80 = tpu.memref_slice %arg5[%c0_i32_33, %c0_i32_34, %c0_i32_35] : memref<1x8x128xf32, #tpu.memory_space<vmem>> -> memref<1x8x128xf32, #tpu.memory_space<vmem>>
    %81 = tpu.memref_squeeze %80 : memref<1x8x128xf32, #tpu.memory_space<vmem>> -> memref<8x128xf32, #tpu.memory_space<vmem>>
    %c0_36 = arith.constant 0 : index
    %c64 = arith.constant 64 : index
    %82 = vector.load %81[%c0_36, %c64] : memref<8x128xf32, #tpu.memory_space<vmem>>, vector<8x32xf32>
    tpu.vector_store %81[%c0_36, %c64], %79 {strides = array<i32>} : memref<8x128xf32, #tpu.memory_space<vmem>>, vector<8x32xf32>,
    %83 = vector.extract_strided_slice %3 {offsets = [0, 96], sizes = [8, 32], strides = [1, 1]} : vector<8x128xf32> to vector<8x32xf32>
    %84 = arith.truncf %83 : vector<8x32xf32> to vector<8x32xbf16>
    %85 = vector.extract_strided_slice %5 {offsets = [0, 96], sizes = [8, 32], strides = [1, 1]} : vector<8x128xf32> to vector<8x32xf32>
    %86 = arith.truncf %85 : vector<8x32xf32> to vector<8x32xbf16>
    %87 = vector.extract_strided_slice %7 {offsets = [0, 96], sizes = [8, 32], strides = [1, 1]} : vector<8x128xf32> to vector<8x32xf32>
    %88 = arith.truncf %87 : vector<8x32xf32> to vector<8x32xbf16>
    %cst_37 = arith.constant dense<0.000000e+00> : vector<8x8xf32>
    %89 = tpu.matmul %84, %86, %cst_37 {dimension_numbers = #tpu.dot_dimension_numbers<[1], [1], [0], [0], [0, 0, 1, 0], [], []>} : vector<8x32xbf16>, vector<8x32xbf16>, vector<8x8xf32> -> vector<8x8xf32>
    %cst_38 = arith.constant 0.176776692 : f32
    %90 = vector.broadcast %cst_38 : f32 to vector<8x8xf32>
    %91 = arith.mulf %89, %90 : vector<8x8xf32>
    %92 = arith.addf %91, %1 : vector<8x8xf32>
    %cst_39 = arith.constant dense<0xFF800000> : vector<8xf32>
    %93 = vector.multi_reduction <maximumf>, %92, %cst_39 [1] : vector<8x8xf32> to vector<8xf32>
    %94 = vector.shape_cast %93 : vector<8xf32> to vector<8x1xf32>
    %95 = vector.broadcast %94 : vector<8x1xf32> to vector<8x8xf32>
    %96 = arith.subf %92, %95 : vector<8x8xf32>
    %97 = math.exp %96 : vector<8x8xf32>
    %cst_40 = arith.constant dense<0.000000e+00> : vector<8xf32>
    %98 = vector.multi_reduction <add>, %97, %cst_40 [1] : vector<8x8xf32> to vector<8xf32>
    %99 = vector.shape_cast %98 : vector<8xf32> to vector<8x1xf32>
    %100 = tpu.reciprocal %99 {approx = true} : vector<8x1xf32> -> vector<8x1xf32>
    %101 = vector.broadcast %100 : vector<8x1xf32> to vector<8x8xf32>
    %102 = arith.mulf %97, %101 : vector<8x8xf32>
    %103 = arith.truncf %102 : vector<8x8xf32> to vector<8x8xbf16>
    %cst_41 = arith.constant dense<0.000000e+00> : vector<8x32xf32>
    %104 = tpu.matmul %103, %88, %cst_41 {dimension_numbers = #tpu.dot_dimension_numbers<[1], [0], [0], [1], [0, 0, 1, 1], [], []>} : vector<8x8xbf16>, vector<8x32xbf16>, vector<8x32xf32> -> vector<8x32xf32>
    %c0_i32_42 = arith.constant 0 : i32
    %c0_i32_43 = arith.constant 0 : i32
    %c0_i32_44 = arith.constant 0 : i32
    %105 = tpu.memref_slice %arg5[%c0_i32_42, %c0_i32_43, %c0_i32_44] : memref<1x8x128xf32, #tpu.memory_space<vmem>> -> memref<1x8x128xf32, #tpu.memory_space<vmem>>
    %106 = tpu.memref_squeeze %105 : memref<1x8x128xf32, #tpu.memory_space<vmem>> -> memref<8x128xf32, #tpu.memory_space<vmem>>
    %c0_45 = arith.constant 0 : index
    %c96 = arith.constant 96 : index
    %107 = vector.load %106[%c0_45, %c96] : memref<8x128xf32, #tpu.memory_space<vmem>>, vector<8x32xf32>
    tpu.vector_store %106[%c0_45, %c96], %104 {strides = array<i32>} : memref<8x128xf32, #tpu.memory_space<vmem>>, vector<8x32xf32>,
    return
  }
  func.func @transform_0(%arg0: i32) -> (i32, i32, i32) {
    %c0_i32 = arith.constant 0 : i32
    %c0_i32_0 = arith.constant 0 : i32
    %c0_i32_1 = arith.constant 0 : i32
    return %arg0, %c0_i32, %c0_i32_0 : i32, i32, i32
  }
  func.func @transform_1(%arg0: i32) -> (i32, i32, i32) {
    %c0_i32 = arith.constant 0 : i32
    %c1_i32 = arith.constant 1 : i32
    %c0_i32_0 = arith.constant 0 : i32
    return %arg0, %c0_i32, %c1_i32 : i32, i32, i32
  }
  func.func @transform_2(%arg0: i32) -> (i32, i32, i32) {
    %c0_i32 = arith.constant 0 : i32
    %c2_i32 = arith.constant 2 : i32
    %c0_i32_0 = arith.constant 0 : i32
    return %arg0, %c0_i32, %c2_i32 : i32, i32, i32
  }
  func.func @transform_3(%arg0: i32) -> (i32, i32, i32) {
    %c0_i32 = arith.constant 0 : i32
    %c0_i32_0 = arith.constant 0 : i32
    %c0_i32_1 = arith.constant 0 : i32
    %c0_i32_2 = arith.constant 0 : i32
    return %c0_i32, %c0_i32_0, %c0_i32_1 : i32, i32, i32
  }
  func.func @transform_4(%arg0: i32) -> (i32, i32, i32) {
    %c0_i32 = arith.constant 0 : i32
    %c0_i32_0 = arith.constant 0 : i32
    %c0_i32_1 = arith.constant 0 : i32
    return %arg0, %c0_i32, %c0_i32_0 : i32, i32, i32
  }
}

module attributes {stable_mosaic.version = 11 : i64} {
  func.func @_matmul_kernel(%arg0: i32, %arg1: i32, %arg2: i32, %arg3: memref<16x128xf32, #tpu.memory_space<vmem>>, %arg4: memref<128x128xf32, #tpu.memory_space<vmem>>, %arg5: memref<1x128xf32, #tpu.memory_space<vmem>>, %arg6: memref<16x128xf32, #tpu.memory_space<vmem>>, %arg7: memref<16x128xf32, #tpu.memory_space<vmem>>) attributes {dimension_semantics = [#tpu.dimension_semantics<parallel>, #tpu.dimension_semantics<parallel>, #tpu.dimension_semantics<arbitrary>], iteration_bounds = array<i64: 1, 1, 1>, scalar_prefetch = 0 : i64, scratch_operands = 1 : i64, tpu.core_type = #tpu.core_type<tc>, window_params = [{transform_indices = @transform_0, window_bounds = array<i64: 16, 128>}, {transform_indices = @transform_1, window_bounds = array<i64: 128, 128>}, {transform_indices = @transform_2, window_bounds = array<i64: 1, 128>}, {transform_indices = @transform_3, window_bounds = array<i64: 16, 128>}]} {
    %c0_i32 = arith.constant 0 : i32
    %0 = arith.cmpi eq, %arg2, %c0_i32 : i32
    %1 = arith.extui %0 : i1 to i32
    %c0_i32_0 = arith.constant 0 : i32
    %2 = arith.cmpi ne, %1, %c0_i32_0 : i32
    scf.if %2 {
      %cst_10 = arith.constant 0.000000e+00 : f32
      %14 = vector.broadcast %cst_10 : f32 to vector<16x128xf32>
      %c0_11 = arith.constant 0 : index
      %c0_12 = arith.constant 0 : index
      %15 = vector.load %arg7[%c0_11, %c0_12] : memref<16x128xf32, #tpu.memory_space<vmem>>, vector<16x128xf32>
      tpu.vector_store %arg7[%c0_11, %c0_12], %14 {strides = array<i32>} : memref<16x128xf32, #tpu.memory_space<vmem>>, vector<16x128xf32>,
    } else {
    }
    %c0 = arith.constant 0 : index
    %c0_1 = arith.constant 0 : index
    %3 = vector.load %arg7[%c0, %c0_1] : memref<16x128xf32, #tpu.memory_space<vmem>>, vector<16x128xf32>
    %c0_2 = arith.constant 0 : index
    %c0_3 = arith.constant 0 : index
    %4 = vector.load %arg3[%c0_2, %c0_3] : memref<16x128xf32, #tpu.memory_space<vmem>>, vector<16x128xf32>
    %5 = arith.truncf %4 : vector<16x128xf32> to vector<16x128xbf16>
    %c0_4 = arith.constant 0 : index
    %c0_5 = arith.constant 0 : index
    %6 = vector.load %arg4[%c0_4, %c0_5] : memref<128x128xf32, #tpu.memory_space<vmem>>, vector<128x128xf32>
    %7 = arith.truncf %6 : vector<128x128xf32> to vector<128x128xbf16>
    %cst = arith.constant dense<0.000000e+00> : vector<16x128xf32>
    %8 = tpu.matmul %5, %7, %cst {dimension_numbers = #tpu.dot_dimension_numbers<[1], [0], [0], [1], [0, 0, 1, 1], [], []>} : vector<16x128xbf16>, vector<128x128xbf16>, vector<16x128xf32> -> vector<16x128xf32>
    %9 = arith.addf %3, %8 : vector<16x128xf32>
    %c0_6 = arith.constant 0 : index
    %c0_7 = arith.constant 0 : index
    %10 = vector.load %arg7[%c0_6, %c0_7] : memref<16x128xf32, #tpu.memory_space<vmem>>, vector<16x128xf32>
    tpu.vector_store %arg7[%c0_6, %c0_7], %9 {strides = array<i32>} : memref<16x128xf32, #tpu.memory_space<vmem>>, vector<16x128xf32>,
    %c0_i32_8 = arith.constant 0 : i32
    %11 = arith.cmpi eq, %arg2, %c0_i32_8 : i32
    %12 = arith.extui %11 : i1 to i32
    %c0_i32_9 = arith.constant 0 : i32
    %13 = arith.cmpi ne, %12, %c0_i32_9 : i32
    scf.if %13 {
      %c0_10 = arith.constant 0 : index
      %c0_11 = arith.constant 0 : index
      %14 = vector.load %arg7[%c0_10, %c0_11] : memref<16x128xf32, #tpu.memory_space<vmem>>, vector<16x128xf32>
      %c0_12 = arith.constant 0 : index
      %c0_13 = arith.constant 0 : index
      %15 = vector.load %arg5[%c0_12, %c0_13] : memref<1x128xf32, #tpu.memory_space<vmem>>, vector<1x128xf32>
      %16 = vector.broadcast %15 : vector<1x128xf32> to vector<16x128xf32>
      %17 = arith.addf %14, %16 : vector<16x128xf32>
      %c0_14 = arith.constant 0 : index
      %c0_15 = arith.constant 0 : index
      %18 = vector.load %arg6[%c0_14, %c0_15] : memref<16x128xf32, #tpu.memory_space<vmem>>, vector<16x128xf32>
      tpu.vector_store %arg6[%c0_14, %c0_15], %17 {strides = array<i32>} : memref<16x128xf32, #tpu.memory_space<vmem>>, vector<16x128xf32>,
    } else {
    }
    return
  }
  func.func @transform_0(%arg0: i32, %arg1: i32, %arg2: i32) -> (i32, i32) {
    %c0_i32 = arith.constant 0 : i32
    return %arg0, %arg2 : i32, i32
  }
  func.func @transform_1(%arg0: i32, %arg1: i32, %arg2: i32) -> (i32, i32) {
    %c0_i32 = arith.constant 0 : i32
    return %arg2, %arg1 : i32, i32
  }
  func.func @transform_2(%arg0: i32, %arg1: i32, %arg2: i32) -> (i32, i32) {
    %c0_i32 = arith.constant 0 : i32
    %c0_i32_0 = arith.constant 0 : i32
    return %c0_i32, %arg1 : i32, i32
  }
  func.func @transform_3(%arg0: i32, %arg1: i32, %arg2: i32) -> (i32, i32) {
    %c0_i32 = arith.constant 0 : i32
    return %arg0, %arg1 : i32, i32
  }
}

module attributes {stable_mosaic.version = 11 : i64} {
  func.func @_matmul_kernel(%arg0: i32, %arg1: i32, %arg2: i32, %arg3: memref<16x128xf32, #tpu.memory_space<vmem>>, %arg4: memref<128x256xf32, #tpu.memory_space<vmem>>, %arg5: memref<1x256xf32, #tpu.memory_space<vmem>>, %arg6: memref<16x256xf32, #tpu.memory_space<vmem>>, %arg7: memref<16x256xf32, #tpu.memory_space<vmem>>) attributes {dimension_semantics = [#tpu.dimension_semantics<parallel>, #tpu.dimension_semantics<parallel>, #tpu.dimension_semantics<arbitrary>], iteration_bounds = array<i64: 1, 1, 1>, scalar_prefetch = 0 : i64, scratch_operands = 1 : i64, tpu.core_type = #tpu.core_type<tc>, window_params = [{transform_indices = @transform_0, window_bounds = array<i64: 16, 128>}, {transform_indices = @transform_1, window_bounds = array<i64: 128, 256>}, {transform_indices = @transform_2, window_bounds = array<i64: 1, 256>}, {transform_indices = @transform_3, window_bounds = array<i64: 16, 256>}]} {
    %c0_i32 = arith.constant 0 : i32
    %0 = arith.cmpi eq, %arg2, %c0_i32 : i32
    %1 = arith.extui %0 : i1 to i32
    %c0_i32_0 = arith.constant 0 : i32
    %2 = arith.cmpi ne, %1, %c0_i32_0 : i32
    scf.if %2 {
      %cst_10 = arith.constant 0.000000e+00 : f32
      %14 = vector.broadcast %cst_10 : f32 to vector<16x256xf32>
      %c0_11 = arith.constant 0 : index
      %c0_12 = arith.constant 0 : index
      %15 = vector.load %arg7[%c0_11, %c0_12] : memref<16x256xf32, #tpu.memory_space<vmem>>, vector<16x256xf32>
      tpu.vector_store %arg7[%c0_11, %c0_12], %14 {strides = array<i32>} : memref<16x256xf32, #tpu.memory_space<vmem>>, vector<16x256xf32>,
    } else {
    }
    %c0 = arith.constant 0 : index
    %c0_1 = arith.constant 0 : index
    %3 = vector.load %arg7[%c0, %c0_1] : memref<16x256xf32, #tpu.memory_space<vmem>>, vector<16x256xf32>
    %c0_2 = arith.constant 0 : index
    %c0_3 = arith.constant 0 : index
    %4 = vector.load %arg3[%c0_2, %c0_3] : memref<16x128xf32, #tpu.memory_space<vmem>>, vector<16x128xf32>
    %5 = arith.truncf %4 : vector<16x128xf32> to vector<16x128xbf16>
    %c0_4 = arith.constant 0 : index
    %c0_5 = arith.constant 0 : index
    %6 = vector.load %arg4[%c0_4, %c0_5] : memref<128x256xf32, #tpu.memory_space<vmem>>, vector<128x256xf32>
    %7 = arith.truncf %6 : vector<128x256xf32> to vector<128x256xbf16>
    %cst = arith.constant dense<0.000000e+00> : vector<16x256xf32>
    %8 = tpu.matmul %5, %7, %cst {dimension_numbers = #tpu.dot_dimension_numbers<[1], [0], [0], [1], [0, 0, 1, 1], [], []>} : vector<16x128xbf16>, vector<128x256xbf16>, vector<16x256xf32> -> vector<16x256xf32>
    %9 = arith.addf %3, %8 : vector<16x256xf32>
    %c0_6 = arith.constant 0 : index
    %c0_7 = arith.constant 0 : index
    %10 = vector.load %arg7[%c0_6, %c0_7] : memref<16x256xf32, #tpu.memory_space<vmem>>, vector<16x256xf32>
    tpu.vector_store %arg7[%c0_6, %c0_7], %9 {strides = array<i32>} : memref<16x256xf32, #tpu.memory_space<vmem>>, vector<16x256xf32>,
    %c0_i32_8 = arith.constant 0 : i32
    %11 = arith.cmpi eq, %arg2, %c0_i32_8 : i32
    %12 = arith.extui %11 : i1 to i32
    %c0_i32_9 = arith.constant 0 : i32
    %13 = arith.cmpi ne, %12, %c0_i32_9 : i32
    scf.if %13 {
      %c0_10 = arith.constant 0 : index
      %c0_11 = arith.constant 0 : index
      %14 = vector.load %arg7[%c0_10, %c0_11] : memref<16x256xf32, #tpu.memory_space<vmem>>, vector<16x256xf32>
      %c0_12 = arith.constant 0 : index
      %c0_13 = arith.constant 0 : index
      %15 = vector.load %arg5[%c0_12, %c0_13] : memref<1x256xf32, #tpu.memory_space<vmem>>, vector<1x256xf32>
      %16 = vector.broadcast %15 : vector<1x256xf32> to vector<16x256xf32>
      %17 = arith.addf %14, %16 : vector<16x256xf32>
      %c0_14 = arith.constant 0 : index
      %c0_15 = arith.constant 0 : index
      %18 = vector.load %arg6[%c0_14, %c0_15] : memref<16x256xf32, #tpu.memory_space<vmem>>, vector<16x256xf32>
      tpu.vector_store %arg6[%c0_14, %c0_15], %17 {strides = array<i32>} : memref<16x256xf32, #tpu.memory_space<vmem>>, vector<16x256xf32>,
    } else {
    }
    return
  }
  func.func @transform_0(%arg0: i32, %arg1: i32, %arg2: i32) -> (i32, i32) {
    %c0_i32 = arith.constant 0 : i32
    return %arg0, %arg2 : i32, i32
  }
  func.func @transform_1(%arg0: i32, %arg1: i32, %arg2: i32) -> (i32, i32) {
    %c0_i32 = arith.constant 0 : i32
    return %arg2, %arg1 : i32, i32
  }
  func.func @transform_2(%arg0: i32, %arg1: i32, %arg2: i32) -> (i32, i32) {
    %c0_i32 = arith.constant 0 : i32
    %c0_i32_0 = arith.constant 0 : i32
    return %c0_i32, %arg1 : i32, i32
  }
  func.func @transform_3(%arg0: i32, %arg1: i32, %arg2: i32) -> (i32, i32) {
    %c0_i32 = arith.constant 0 : i32
    return %arg0, %arg1 : i32, i32
  }
}

module attributes {stable_mosaic.version = 11 : i64} {
  func.func @_mha_kernel(%arg0: i32, %arg1: memref<1x8x128xf32, #tpu.memory_space<vmem>>, %arg2: memref<1x8x128xf32, #tpu.memory_space<vmem>>, %arg3: memref<1x8x128xf32, #tpu.memory_space<vmem>>, %arg4: memref<1x8x128xf32, #tpu.memory_space<vmem>>) attributes {dimension_semantics = [#tpu.dimension_semantics<parallel>], iteration_bounds = array<i64: 2>, scalar_prefetch = 0 : i64, scratch_operands = 0 : i64, tpu.core_type = #tpu.core_type<tc>, window_params = [{transform_indices = @transform_0, window_bounds = array<i64: 1, 8, 128>}, {transform_indices = @transform_1, window_bounds = array<i64: 1, 8, 128>}, {transform_indices = @transform_2, window_bounds = array<i64: 1, 8, 128>}, {transform_indices = @transform_3, window_bounds = array<i64: 1, 8, 128>}]} {
    %c0 = arith.constant 0 : index
    %c0_0 = arith.constant 0 : index
    %c0_1 = arith.constant 0 : index
    %0 = vector.load %arg1[%c0, %c0_0, %c0_1] : memref<1x8x128xf32, #tpu.memory_space<vmem>>, vector<1x8x128xf32>
    %1 = vector.shape_cast %0 : vector<1x8x128xf32> to vector<8x128xf32>
    %c0_2 = arith.constant 0 : index
    %c0_3 = arith.constant 0 : index
    %c0_4 = arith.constant 0 : index
    %2 = vector.load %arg2[%c0_2, %c0_3, %c0_4] : memref<1x8x128xf32, #tpu.memory_space<vmem>>, vector<1x8x128xf32>
    %3 = vector.shape_cast %2 : vector<1x8x128xf32> to vector<8x128xf32>
    %c0_5 = arith.constant 0 : index
    %c0_6 = arith.constant 0 : index
    %c0_7 = arith.constant 0 : index
    %4 = vector.load %arg3[%c0_5, %c0_6, %c0_7] : memref<1x8x128xf32, #tpu.memory_space<vmem>>, vector<1x8x128xf32>
    %5 = vector.shape_cast %4 : vector<1x8x128xf32> to vector<8x128xf32>
    %6 = vector.extract_strided_slice %1 {offsets = [0, 0], sizes = [8, 32], strides = [1, 1]} : vector<8x128xf32> to vector<8x32xf32>
    %7 = arith.truncf %6 : vector<8x32xf32> to vector<8x32xbf16>
    %8 = vector.extract_strided_slice %3 {offsets = [0, 0], sizes = [8, 32], strides = [1, 1]} : vector<8x128xf32> to vector<8x32xf32>
    %9 = arith.truncf %8 : vector<8x32xf32> to vector<8x32xbf16>
    %10 = vector.extract_strided_slice %5 {offsets = [0, 0], sizes = [8, 32], strides = [1, 1]} : vector<8x128xf32> to vector<8x32xf32>
    %11 = arith.truncf %10 : vector<8x32xf32> to vector<8x32xbf16>
    %cst = arith.constant dense<0.000000e+00> : vector<8x8xf32>
    %12 = tpu.matmul %7, %9, %cst {dimension_numbers = #tpu.dot_dimension_numbers<[1], [1], [0], [0], [0, 0, 1, 0], [], []>} : vector<8x32xbf16>, vector<8x32xbf16>, vector<8x8xf32> -> vector<8x8xf32>
    %cst_8 = arith.constant 0.176776692 : f32
    %13 = vector.broadcast %cst_8 : f32 to vector<8x8xf32>
    %14 = arith.mulf %12, %13 : vector<8x8xf32>
    %cst_9 = arith.constant dense<0xFF800000> : vector<8xf32>
    %15 = vector.multi_reduction <maximumf>, %14, %cst_9 [1] : vector<8x8xf32> to vector<8xf32>
    %16 = vector.shape_cast %15 : vector<8xf32> to vector<8x1xf32>
    %17 = vector.broadcast %16 : vector<8x1xf32> to vector<8x8xf32>
    %18 = arith.subf %14, %17 : vector<8x8xf32>
    %19 = math.exp %18 : vector<8x8xf32>
    %cst_10 = arith.constant dense<0.000000e+00> : vector<8xf32>
    %20 = vector.multi_reduction <add>, %19, %cst_10 [1] : vector<8x8xf32> to vector<8xf32>
    %21 = vector.shape_cast %20 : vector<8xf32> to vector<8x1xf32>
    %22 = tpu.reciprocal %21 {approx = true} : vector<8x1xf32> -> vector<8x1xf32>
    %23 = vector.broadcast %22 : vector<8x1xf32> to vector<8x8xf32>
    %24 = arith.mulf %19, %23 : vector<8x8xf32>
    %25 = arith.truncf %24 : vector<8x8xf32> to vector<8x8xbf16>
    %cst_11 = arith.constant dense<0.000000e+00> : vector<8x32xf32>
    %26 = tpu.matmul %25, %11, %cst_11 {dimension_numbers = #tpu.dot_dimension_numbers<[1], [0], [0], [1], [0, 0, 1, 1], [], []>} : vector<8x8xbf16>, vector<8x32xbf16>, vector<8x32xf32> -> vector<8x32xf32>
    %c0_i32 = arith.constant 0 : i32
    %c0_i32_12 = arith.constant 0 : i32
    %c0_i32_13 = arith.constant 0 : i32
    %27 = tpu.memref_slice %arg4[%c0_i32, %c0_i32_12, %c0_i32_13] : memref<1x8x128xf32, #tpu.memory_space<vmem>> -> memref<1x8x128xf32, #tpu.memory_space<vmem>>
    %28 = tpu.memref_squeeze %27 : memref<1x8x128xf32, #tpu.memory_space<vmem>> -> memref<8x128xf32, #tpu.memory_space<vmem>>
    %c0_14 = arith.constant 0 : index
    %c0_15 = arith.constant 0 : index
    %29 = vector.load %28[%c0_14, %c0_15] : memref<8x128xf32, #tpu.memory_space<vmem>>, vector<8x32xf32>
    tpu.vector_store %28[%c0_14, %c0_15], %26 {strides = array<i32>} : memref<8x128xf32, #tpu.memory_space<vmem>>, vector<8x32xf32>,
    %30 = vector.extract_strided_slice %1 {offsets = [0, 32], sizes = [8, 32], strides = [1, 1]} : vector<8x128xf32> to vector<8x32xf32>
    %31 = arith.truncf %30 : vector<8x32xf32> to vector<8x32xbf16>
    %32 = vector.extract_strided_slice %3 {offsets = [0, 32], sizes = [8, 32], strides = [1, 1]} : vector<8x128xf32> to vector<8x32xf32>
    %33 = arith.truncf %32 : vector<8x32xf32> to vector<8x32xbf16>
    %34 = vector.extract_strided_slice %5 {offsets = [0, 32], sizes = [8, 32], strides = [1, 1]} : vector<8x128xf32> to vector<8x32xf32>
    %35 = arith.truncf %34 : vector<8x32xf32> to vector<8x32xbf16>
    %cst_16 = arith.constant dense<0.000000e+00> : vector<8x8xf32>
    %36 = tpu.matmul %31, %33, %cst_16 {dimension_numbers = #tpu.dot_dimension_numbers<[1], [1], [0], [0], [0, 0, 1, 0], [], []>} : vector<8x32xbf16>, vector<8x32xbf16>, vector<8x8xf32> -> vector<8x8xf32>
    %cst_17 = arith.constant 0.176776692 : f32
    %37 = vector.broadcast %cst_17 : f32 to vector<8x8xf32>
    %38 = arith.mulf %36, %37 : vector<8x8xf32>
    %cst_18 = arith.constant dense<0xFF800000> : vector<8xf32>
    %39 = vector.multi_reduction <maximumf>, %38, %cst_18 [1] : vector<8x8xf32> to vector<8xf32>
    %40 = vector.shape_cast %39 : vector<8xf32> to vector<8x1xf32>
    %41 = vector.broadcast %40 : vector<8x1xf32> to vector<8x8xf32>
    %42 = arith.subf %38, %41 : vector<8x8xf32>
    %43 = math.exp %42 : vector<8x8xf32>
    %cst_19 = arith.constant dense<0.000000e+00> : vector<8xf32>
    %44 = vector.multi_reduction <add>, %43, %cst_19 [1] : vector<8x8xf32> to vector<8xf32>
    %45 = vector.shape_cast %44 : vector<8xf32> to vector<8x1xf32>
    %46 = tpu.reciprocal %45 {approx = true} : vector<8x1xf32> -> vector<8x1xf32>
    %47 = vector.broadcast %46 : vector<8x1xf32> to vector<8x8xf32>
    %48 = arith.mulf %43, %47 : vector<8x8xf32>
    %49 = arith.truncf %48 : vector<8x8xf32> to vector<8x8xbf16>
    %cst_20 = arith.constant dense<0.000000e+00> : vector<8x32xf32>
    %50 = tpu.matmul %49, %35, %cst_20 {dimension_numbers = #tpu.dot_dimension_numbers<[1], [0], [0], [1], [0, 0, 1, 1], [], []>} : vector<8x8xbf16>, vector<8x32xbf16>, vector<8x32xf32> -> vector<8x32xf32>
    %c0_i32_21 = arith.constant 0 : i32
    %c0_i32_22 = arith.constant 0 : i32
    %c0_i32_23 = arith.constant 0 : i32
    %51 = tpu.memref_slice %arg4[%c0_i32_21, %c0_i32_22, %c0_i32_23] : memref<1x8x128xf32, #tpu.memory_space<vmem>> -> memref<1x8x128xf32, #tpu.memory_space<vmem>>
    %52 = tpu.memref_squeeze %51 : memref<1x8x128xf32, #tpu.memory_space<vmem>> -> memref<8x128xf32, #tpu.memory_space<vmem>>
    %c0_24 = arith.constant 0 : index
    %c32 = arith.constant 32 : index
    %53 = vector.load %52[%c0_24, %c32] : memref<8x128xf32, #tpu.memory_space<vmem>>, vector<8x32xf32>
    tpu.vector_store %52[%c0_24, %c32], %50 {strides = array<i32>} : memref<8x128xf32, #tpu.memory_space<vmem>>, vector<8x32xf32>,
    %54 = vector.extract_strided_slice %1 {offsets = [0, 64], sizes = [8, 32], strides = [1, 1]} : vector<8x128xf32> to vector<8x32xf32>
    %55 = arith.truncf %54 : vector<8x32xf32> to vector<8x32xbf16>
    %56 = vector.extract_strided_slice %3 {offsets = [0, 64], sizes = [8, 32], strides = [1, 1]} : vector<8x128xf32> to vector<8x32xf32>
    %57 = arith.truncf %56 : vector<8x32xf32> to vector<8x32xbf16>
    %58 = vector.extract_strided_slice %5 {offsets = [0, 64], sizes = [8, 32], strides = [1, 1]} : vector<8x128xf32> to vector<8x32xf32>
    %59 = arith.truncf %58 : vector<8x32xf32> to vector<8x32xbf16>
    %cst_25 = arith.constant dense<0.000000e+00> : vector<8x8xf32>
    %60 = tpu.matmul %55, %57, %cst_25 {dimension_numbers = #tpu.dot_dimension_numbers<[1], [1], [0], [0], [0, 0, 1, 0], [], []>} : vector<8x32xbf16>, vector<8x32xbf16>, vector<8x8xf32> -> vector<8x8xf32>
    %cst_26 = arith.constant 0.176776692 : f32
    %61 = vector.broadcast %cst_26 : f32 to vector<8x8xf32>
    %62 = arith.mulf %60, %61 : vector<8x8xf32>
    %cst_27 = arith.constant dense<0xFF800000> : vector<8xf32>
    %63 = vector.multi_reduction <maximumf>, %62, %cst_27 [1] : vector<8x8xf32> to vector<8xf32>
    %64 = vector.shape_cast %63 : vector<8xf32> to vector<8x1xf32>
    %65 = vector.broadcast %64 : vector<8x1xf32> to vector<8x8xf32>
    %66 = arith.subf %62, %65 : vector<8x8xf32>
    %67 = math.exp %66 : vector<8x8xf32>
    %cst_28 = arith.constant dense<0.000000e+00> : vector<8xf32>
    %68 = vector.multi_reduction <add>, %67, %cst_28 [1] : vector<8x8xf32> to vector<8xf32>
    %69 = vector.shape_cast %68 : vector<8xf32> to vector<8x1xf32>
    %70 = tpu.reciprocal %69 {approx = true} : vector<8x1xf32> -> vector<8x1xf32>
    %71 = vector.broadcast %70 : vector<8x1xf32> to vector<8x8xf32>
    %72 = arith.mulf %67, %71 : vector<8x8xf32>
    %73 = arith.truncf %72 : vector<8x8xf32> to vector<8x8xbf16>
    %cst_29 = arith.constant dense<0.000000e+00> : vector<8x32xf32>
    %74 = tpu.matmul %73, %59, %cst_29 {dimension_numbers = #tpu.dot_dimension_numbers<[1], [0], [0], [1], [0, 0, 1, 1], [], []>} : vector<8x8xbf16>, vector<8x32xbf16>, vector<8x32xf32> -> vector<8x32xf32>
    %c0_i32_30 = arith.constant 0 : i32
    %c0_i32_31 = arith.constant 0 : i32
    %c0_i32_32 = arith.constant 0 : i32
    %75 = tpu.memref_slice %arg4[%c0_i32_30, %c0_i32_31, %c0_i32_32] : memref<1x8x128xf32, #tpu.memory_space<vmem>> -> memref<1x8x128xf32, #tpu.memory_space<vmem>>
    %76 = tpu.memref_squeeze %75 : memref<1x8x128xf32, #tpu.memory_space<vmem>> -> memref<8x128xf32, #tpu.memory_space<vmem>>
    %c0_33 = arith.constant 0 : index
    %c64 = arith.constant 64 : index
    %77 = vector.load %76[%c0_33, %c64] : memref<8x128xf32, #tpu.memory_space<vmem>>, vector<8x32xf32>
    tpu.vector_store %76[%c0_33, %c64], %74 {strides = array<i32>} : memref<8x128xf32, #tpu.memory_space<vmem>>, vector<8x32xf32>,
    %78 = vector.extract_strided_slice %1 {offsets = [0, 96], sizes = [8, 32], strides = [1, 1]} : vector<8x128xf32> to vector<8x32xf32>
    %79 = arith.truncf %78 : vector<8x32xf32> to vector<8x32xbf16>
    %80 = vector.extract_strided_slice %3 {offsets = [0, 96], sizes = [8, 32], strides = [1, 1]} : vector<8x128xf32> to vector<8x32xf32>
    %81 = arith.truncf %80 : vector<8x32xf32> to vector<8x32xbf16>
    %82 = vector.extract_strided_slice %5 {offsets = [0, 96], sizes = [8, 32], strides = [1, 1]} : vector<8x128xf32> to vector<8x32xf32>
    %83 = arith.truncf %82 : vector<8x32xf32> to vector<8x32xbf16>
    %cst_34 = arith.constant dense<0.000000e+00> : vector<8x8xf32>
    %84 = tpu.matmul %79, %81, %cst_34 {dimension_numbers = #tpu.dot_dimension_numbers<[1], [1], [0], [0], [0, 0, 1, 0], [], []>} : vector<8x32xbf16>, vector<8x32xbf16>, vector<8x8xf32> -> vector<8x8xf32>
    %cst_35 = arith.constant 0.176776692 : f32
    %85 = vector.broadcast %cst_35 : f32 to vector<8x8xf32>
    %86 = arith.mulf %84, %85 : vector<8x8xf32>
    %cst_36 = arith.constant dense<0xFF800000> : vector<8xf32>
    %87 = vector.multi_reduction <maximumf>, %86, %cst_36 [1] : vector<8x8xf32> to vector<8xf32>
    %88 = vector.shape_cast %87 : vector<8xf32> to vector<8x1xf32>
    %89 = vector.broadcast %88 : vector<8x1xf32> to vector<8x8xf32>
    %90 = arith.subf %86, %89 : vector<8x8xf32>
    %91 = math.exp %90 : vector<8x8xf32>
    %cst_37 = arith.constant dense<0.000000e+00> : vector<8xf32>
    %92 = vector.multi_reduction <add>, %91, %cst_37 [1] : vector<8x8xf32> to vector<8xf32>
    %93 = vector.shape_cast %92 : vector<8xf32> to vector<8x1xf32>
    %94 = tpu.reciprocal %93 {approx = true} : vector<8x1xf32> -> vector<8x1xf32>
    %95 = vector.broadcast %94 : vector<8x1xf32> to vector<8x8xf32>
    %96 = arith.mulf %91, %95 : vector<8x8xf32>
    %97 = arith.truncf %96 : vector<8x8xf32> to vector<8x8xbf16>
    %cst_38 = arith.constant dense<0.000000e+00> : vector<8x32xf32>
    %98 = tpu.matmul %97, %83, %cst_38 {dimension_numbers = #tpu.dot_dimension_numbers<[1], [0], [0], [1], [0, 0, 1, 1], [], []>} : vector<8x8xbf16>, vector<8x32xbf16>, vector<8x32xf32> -> vector<8x32xf32>
    %c0_i32_39 = arith.constant 0 : i32
    %c0_i32_40 = arith.constant 0 : i32
    %c0_i32_41 = arith.constant 0 : i32
    %99 = tpu.memref_slice %arg4[%c0_i32_39, %c0_i32_40, %c0_i32_41] : memref<1x8x128xf32, #tpu.memory_space<vmem>> -> memref<1x8x128xf32, #tpu.memory_space<vmem>>
    %100 = tpu.memref_squeeze %99 : memref<1x8x128xf32, #tpu.memory_space<vmem>> -> memref<8x128xf32, #tpu.memory_space<vmem>>
    %c0_42 = arith.constant 0 : index
    %c96 = arith.constant 96 : index
    %101 = vector.load %100[%c0_42, %c96] : memref<8x128xf32, #tpu.memory_space<vmem>>, vector<8x32xf32>
    tpu.vector_store %100[%c0_42, %c96], %98 {strides = array<i32>} : memref<8x128xf32, #tpu.memory_space<vmem>>, vector<8x32xf32>,
    return
  }
  func.func @transform_0(%arg0: i32) -> (i32, i32, i32) {
    %c0_i32 = arith.constant 0 : i32
    %c0_i32_0 = arith.constant 0 : i32
    %c0_i32_1 = arith.constant 0 : i32
    return %arg0, %c0_i32, %c0_i32_0 : i32, i32, i32
  }
  func.func @transform_1(%arg0: i32) -> (i32, i32, i32) {
    %c0_i32 = arith.constant 0 : i32
    %c0_i32_0 = arith.constant 0 : i32
    %c0_i32_1 = arith.constant 0 : i32
    return %arg0, %c0_i32, %c0_i32_0 : i32, i32, i32
  }
  func.func @transform_2(%arg0: i32) -> (i32, i32, i32) {
    %c0_i32 = arith.constant 0 : i32
    %c1_i32 = arith.constant 1 : i32
    %c0_i32_0 = arith.constant 0 : i32
    return %arg0, %c0_i32, %c1_i32 : i32, i32, i32
  }
  func.func @transform_3(%arg0: i32) -> (i32, i32, i32) {
    %c0_i32 = arith.constant 0 : i32
    %c0_i32_0 = arith.constant 0 : i32
    %c0_i32_1 = arith.constant 0 : i32
    return %arg0, %c0_i32, %c0_i32_0 : i32, i32, i32
  }
}

module attributes {stable_mosaic.version = 11 : i64} {
  func.func @_matmul_kernel(%arg0: i32, %arg1: i32, %arg2: i32, %arg3: memref<16x128xf32, #tpu.memory_space<vmem>>, %arg4: memref<128x256xf32, #tpu.memory_space<vmem>>, %arg5: memref<1x256xf32, #tpu.memory_space<vmem>>, %arg6: memref<16x256xf32, #tpu.memory_space<vmem>>, %arg7: memref<16x256xf32, #tpu.memory_space<vmem>>) attributes {dimension_semantics = [#tpu.dimension_semantics<parallel>, #tpu.dimension_semantics<parallel>, #tpu.dimension_semantics<arbitrary>], iteration_bounds = array<i64: 1, 1, 1>, scalar_prefetch = 0 : i64, scratch_operands = 1 : i64, tpu.core_type = #tpu.core_type<tc>, window_params = [{transform_indices = @transform_0, window_bounds = array<i64: 16, 128>}, {transform_indices = @transform_1, window_bounds = array<i64: 128, 256>}, {transform_indices = @transform_2, window_bounds = array<i64: 1, 256>}, {transform_indices = @transform_3, window_bounds = array<i64: 16, 256>}]} {
    %c0_i32 = arith.constant 0 : i32
    %0 = arith.cmpi eq, %arg2, %c0_i32 : i32
    %1 = arith.extui %0 : i1 to i32
    %c0_i32_0 = arith.constant 0 : i32
    %2 = arith.cmpi ne, %1, %c0_i32_0 : i32
    scf.if %2 {
      %cst_10 = arith.constant 0.000000e+00 : f32
      %14 = vector.broadcast %cst_10 : f32 to vector<16x256xf32>
      %c0_11 = arith.constant 0 : index
      %c0_12 = arith.constant 0 : index
      %15 = vector.load %arg7[%c0_11, %c0_12] : memref<16x256xf32, #tpu.memory_space<vmem>>, vector<16x256xf32>
      tpu.vector_store %arg7[%c0_11, %c0_12], %14 {strides = array<i32>} : memref<16x256xf32, #tpu.memory_space<vmem>>, vector<16x256xf32>,
    } else {
    }
    %c0 = arith.constant 0 : index
    %c0_1 = arith.constant 0 : index
    %3 = vector.load %arg7[%c0, %c0_1] : memref<16x256xf32, #tpu.memory_space<vmem>>, vector<16x256xf32>
    %c0_2 = arith.constant 0 : index
    %c0_3 = arith.constant 0 : index
    %4 = vector.load %arg3[%c0_2, %c0_3] : memref<16x128xf32, #tpu.memory_space<vmem>>, vector<16x128xf32>
    %5 = arith.truncf %4 : vector<16x128xf32> to vector<16x128xbf16>
    %c0_4 = arith.constant 0 : index
    %c0_5 = arith.constant 0 : index
    %6 = vector.load %arg4[%c0_4, %c0_5] : memref<128x256xf32, #tpu.memory_space<vmem>>, vector<128x256xf32>
    %7 = arith.truncf %6 : vector<128x256xf32> to vector<128x256xbf16>
    %cst = arith.constant dense<0.000000e+00> : vector<16x256xf32>
    %8 = tpu.matmul %5, %7, %cst {dimension_numbers = #tpu.dot_dimension_numbers<[1], [0], [0], [1], [0, 0, 1, 1], [], []>} : vector<16x128xbf16>, vector<128x256xbf16>, vector<16x256xf32> -> vector<16x256xf32>
    %9 = arith.addf %3, %8 : vector<16x256xf32>
    %c0_6 = arith.constant 0 : index
    %c0_7 = arith.constant 0 : index
    %10 = vector.load %arg7[%c0_6, %c0_7] : memref<16x256xf32, #tpu.memory_space<vmem>>, vector<16x256xf32>
    tpu.vector_store %arg7[%c0_6, %c0_7], %9 {strides = array<i32>} : memref<16x256xf32, #tpu.memory_space<vmem>>, vector<16x256xf32>,
    %c0_i32_8 = arith.constant 0 : i32
    %11 = arith.cmpi eq, %arg2, %c0_i32_8 : i32
    %12 = arith.extui %11 : i1 to i32
    %c0_i32_9 = arith.constant 0 : i32
    %13 = arith.cmpi ne, %12, %c0_i32_9 : i32
    scf.if %13 {
      %c0_10 = arith.constant 0 : index
      %c0_11 = arith.constant 0 : index
      %14 = vector.load %arg7[%c0_10, %c0_11] : memref<16x256xf32, #tpu.memory_space<vmem>>, vector<16x256xf32>
      %c0_12 = arith.constant 0 : index
      %c0_13 = arith.constant 0 : index
      %15 = vector.load %arg5[%c0_12, %c0_13] : memref<1x256xf32, #tpu.memory_space<vmem>>, vector<1x256xf32>
      %16 = vector.broadcast %15 : vector<1x256xf32> to vector<16x256xf32>
      %17 = arith.addf %14, %16 : vector<16x256xf32>
      %cst_14 = arith.constant 0.000000e+00 : f32
      %18 = vector.broadcast %cst_14 : f32 to vector<16x256xf32>
      %19 = arith.maximumf %17, %18 : vector<16x256xf32>
      %c0_15 = arith.constant 0 : index
      %c0_16 = arith.constant 0 : index
      %20 = vector.load %arg6[%c0_15, %c0_16] : memref<16x256xf32, #tpu.memory_space<vmem>>, vector<16x256xf32>
      tpu.vector_store %arg6[%c0_15, %c0_16], %19 {strides = array<i32>} : memref<16x256xf32, #tpu.memory_space<vmem>>, vector<16x256xf32>,
    } else {
    }
    return
  }
  func.func @transform_0(%arg0: i32, %arg1: i32, %arg2: i32) -> (i32, i32) {
    %c0_i32 = arith.constant 0 : i32
    return %arg0, %arg2 : i32, i32
  }
  func.func @transform_1(%arg0: i32, %arg1: i32, %arg2: i32) -> (i32, i32) {
    %c0_i32 = arith.constant 0 : i32
    return %arg2, %arg1 : i32, i32
  }
  func.func @transform_2(%arg0: i32, %arg1: i32, %arg2: i32) -> (i32, i32) {
    %c0_i32 = arith.constant 0 : i32
    %c0_i32_0 = arith.constant 0 : i32
    return %c0_i32, %arg1 : i32, i32
  }
  func.func @transform_3(%arg0: i32, %arg1: i32, %arg2: i32) -> (i32, i32) {
    %c0_i32 = arith.constant 0 : i32
    return %arg0, %arg1 : i32, i32
  }
}

module attributes {stable_mosaic.version = 11 : i64} {
  func.func @_matmul_add_ln_kernel(%arg0: i32, %arg1: i32, %arg2: memref<16x256xf32, #tpu.memory_space<vmem>>, %arg3: memref<256x128xf32, #tpu.memory_space<vmem>>, %arg4: memref<1x128xf32, #tpu.memory_space<vmem>>, %arg5: memref<16x128xf32, #tpu.memory_space<vmem>>, %arg6: memref<1x128xf32, #tpu.memory_space<vmem>>, %arg7: memref<1x128xf32, #tpu.memory_space<vmem>>, %arg8: memref<16x128xf32, #tpu.memory_space<vmem>>, %arg9: memref<16x128xf32, #tpu.memory_space<vmem>>) attributes {dimension_semantics = [#tpu.dimension_semantics<parallel>, #tpu.dimension_semantics<arbitrary>], iteration_bounds = array<i64: 1, 1>, scalar_prefetch = 0 : i64, scratch_operands = 1 : i64, tpu.core_type = #tpu.core_type<tc>, window_params = [{transform_indices = @transform_0, window_bounds = array<i64: 16, 256>}, {transform_indices = @transform_1, window_bounds = array<i64: 256, 128>}, {pipeline_mode = #tpu.pipeline_mode<synchronous>, transform_indices = @transform_2, window_bounds = array<i64: 1, 128>}, {transform_indices = @transform_3, window_bounds = array<i64: 16, 128>}, {pipeline_mode = #tpu.pipeline_mode<synchronous>, transform_indices = @transform_4, window_bounds = array<i64: 1, 128>}, {pipeline_mode = #tpu.pipeline_mode<synchronous>, transform_indices = @transform_5, window_bounds = array<i64: 1, 128>}, {transform_indices = @transform_6, window_bounds = array<i64: 16, 128>}]} {
    %c0_i32 = arith.constant 0 : i32
    %0 = arith.cmpi eq, %arg1, %c0_i32 : i32
    %1 = arith.extui %0 : i1 to i32
    %c0_i32_0 = arith.constant 0 : i32
    %2 = arith.cmpi ne, %1, %c0_i32_0 : i32
    scf.if %2 {
      %cst_10 = arith.constant 0.000000e+00 : f32
      %14 = vector.broadcast %cst_10 : f32 to vector<16x128xf32>
      %c0_11 = arith.constant 0 : index
      %c0_12 = arith.constant 0 : index
      %15 = vector.load %arg9[%c0_11, %c0_12] : memref<16x128xf32, #tpu.memory_space<vmem>>, vector<16x128xf32>
      tpu.vector_store %arg9[%c0_11, %c0_12], %14 {strides = array<i32>} : memref<16x128xf32, #tpu.memory_space<vmem>>, vector<16x128xf32>,
    } else {
    }
    %c0 = arith.constant 0 : index
    %c0_1 = arith.constant 0 : index
    %3 = vector.load %arg9[%c0, %c0_1] : memref<16x128xf32, #tpu.memory_space<vmem>>, vector<16x128xf32>
    %c0_2 = arith.constant 0 : index
    %c0_3 = arith.constant 0 : index
    %4 = vector.load %arg2[%c0_2, %c0_3] : memref<16x256xf32, #tpu.memory_space<vmem>>, vector<16x256xf32>
    %5 = arith.truncf %4 : vector<16x256xf32> to vector<16x256xbf16>
    %c0_4 = arith.constant 0 : index
    %c0_5 = arith.constant 0 : index
    %6 = vector.load %arg3[%c0_4, %c0_5] : memref<256x128xf32, #tpu.memory_space<vmem>>, vector<256x128xf32>
    %7 = arith.truncf %6 : vector<256x128xf32> to vector<256x128xbf16>
    %cst = arith.constant dense<0.000000e+00> : vector<16x128xf32>
    %8 = tpu.matmul %5, %7, %cst {dimension_numbers = #tpu.dot_dimension_numbers<[1], [0], [0], [1], [0, 0, 1, 1], [], []>} : vector<16x256xbf16>, vector<256x128xbf16>, vector<16x128xf32> -> vector<16x128xf32>
    %9 = arith.addf %3, %8 : vector<16x128xf32>
    %c0_6 = arith.constant 0 : index
    %c0_7 = arith.constant 0 : index
    %10 = vector.load %arg9[%c0_6, %c0_7] : memref<16x128xf32, #tpu.memory_space<vmem>>, vector<16x128xf32>
    tpu.vector_store %arg9[%c0_6, %c0_7], %9 {strides = array<i32>} : memref<16x128xf32, #tpu.memory_space<vmem>>, vector<16x128xf32>,
    %c0_i32_8 = arith.constant 0 : i32
    %11 = arith.cmpi eq, %arg1, %c0_i32_8 : i32
    %12 = arith.extui %11 : i1 to i32
    %c0_i32_9 = arith.constant 0 : i32
    %13 = arith.cmpi ne, %12, %c0_i32_9 : i32
    scf.if %13 {
      %c0_10 = arith.constant 0 : index
      %c0_11 = arith.constant 0 : index
      %14 = vector.load %arg9[%c0_10, %c0_11] : memref<16x128xf32, #tpu.memory_space<vmem>>, vector<16x128xf32>
      %c0_12 = arith.constant 0 : index
      %c0_13 = arith.constant 0 : index
      %15 = vector.load %arg4[%c0_12, %c0_13] : memref<1x128xf32, #tpu.memory_space<vmem>>, vector<1x128xf32>
      %16 = vector.broadcast %15 : vector<1x128xf32> to vector<16x128xf32>
      %17 = arith.addf %14, %16 : vector<16x128xf32>
      %c0_14 = arith.constant 0 : index
      %c0_15 = arith.constant 0 : index
      %18 = vector.load %arg5[%c0_14, %c0_15] : memref<16x128xf32, #tpu.memory_space<vmem>>, vector<16x128xf32>
      %19 = arith.addf %17, %18 : vector<16x128xf32>
      %cst_16 = arith.constant dense<0.000000e+00> : vector<16xf32>
      %20 = vector.multi_reduction <add>, %19, %cst_16 [1] : vector<16x128xf32> to vector<16xf32>
      %21 = vector.shape_cast %20 : vector<16xf32> to vector<16x1xf32>
      %cst_17 = arith.constant 1.280000e+02 : f32
      %22 = vector.broadcast %cst_17 : f32 to vector<16x1xf32>
      %23 = arith.divf %21, %22 : vector<16x1xf32>
      %24 = vector.broadcast %23 : vector<16x1xf32> to vector<16x128xf32>
      %25 = arith.subf %19, %24 : vector<16x128xf32>
      %26 = arith.mulf %25, %25 : vector<16x128xf32>
      %cst_18 = arith.constant dense<0.000000e+00> : vector<16xf32>
      %27 = vector.multi_reduction <add>, %26, %cst_18 [1] : vector<16x128xf32> to vector<16xf32>
      %28 = vector.shape_cast %27 : vector<16xf32> to vector<16x1xf32>
      %cst_19 = arith.constant 1.280000e+02 : f32
      %29 = vector.broadcast %cst_19 : f32 to vector<16x1xf32>
      %30 = arith.divf %28, %29 : vector<16x1xf32>
      %31 = vector.broadcast %23 : vector<16x1xf32> to vector<16x128xf32>
      %32 = arith.subf %19, %31 : vector<16x128xf32>
      %cst_20 = arith.constant 9.99999974E-6 : f32
      %33 = vector.broadcast %cst_20 : f32 to vector<16x1xf32>
      %34 = arith.addf %30, %33 : vector<16x1xf32>
      %35 = math.rsqrt %34 : vector<16x1xf32>
      %36 = vector.broadcast %35 : vector<16x1xf32> to vector<16x128xf32>
      %37 = arith.mulf %32, %36 : vector<16x128xf32>
      %c0_21 = arith.constant 0 : index
      %c0_22 = arith.constant 0 : index
      %38 = vector.load %arg6[%c0_21, %c0_22] : memref<1x128xf32, #tpu.memory_space<vmem>>, vector<1x128xf32>
      %39 = vector.broadcast %38 : vector<1x128xf32> to vector<16x128xf32>
      %40 = arith.mulf %37, %39 : vector<16x128xf32>
      %c0_23 = arith.constant 0 : index
      %c0_24 = arith.constant 0 : index
      %41 = vector.load %arg7[%c0_23, %c0_24] : memref<1x128xf32, #tpu.memory_space<vmem>>, vector<1x128xf32>
      %42 = vector.broadcast %41 : vector<1x128xf32> to vector<16x128xf32>
      %43 = arith.addf %40, %42 : vector<16x128xf32>
      %c0_25 = arith.constant 0 : index
      %c0_26 = arith.constant 0 : index
      %44 = vector.load %arg8[%c0_25, %c0_26] : memref<16x128xf32, #tpu.memory_space<vmem>>, vector<16x128xf32>
      tpu.vector_store %arg8[%c0_25, %c0_26], %43 {strides = array<i32>} : memref<16x128xf32, #tpu.memory_space<vmem>>, vector<16x128xf32>,
    } else {
    }
    return
  }
  func.func @transform_0(%arg0: i32, %arg1: i32) -> (i32, i32) {
    %c0_i32 = arith.constant 0 : i32
    return %arg0, %arg1 : i32, i32
  }
  func.func @transform_1(%arg0: i32, %arg1: i32) -> (i32, i32) {
    %c0_i32 = arith.constant 0 : i32
    %c0_i32_0 = arith.constant 0 : i32
    return %arg1, %c0_i32 : i32, i32
  }
  func.func @transform_2(%arg0: i32, %arg1: i32) -> (i32, i32) {
    %c0_i32 = arith.constant 0 : i32
    %c0_i32_0 = arith.constant 0 : i32
    %c0_i32_1 = arith.constant 0 : i32
    return %c0_i32, %c0_i32_0 : i32, i32
  }
  func.func @transform_3(%arg0: i32, %arg1: i32) -> (i32, i32) {
    %c0_i32 = arith.constant 0 : i32
    %c0_i32_0 = arith.constant 0 : i32
    return %arg0, %c0_i32 : i32, i32
  }
  func.func @transform_4(%arg0: i32, %arg1: i32) -> (i32, i32) {
    %c0_i32 = arith.constant 0 : i32
    %c0_i32_0 = arith.constant 0 : i32
    %c0_i32_1 = arith.constant 0 : i32
    return %c0_i32, %c0_i32_0 : i32, i32
  }
  func.func @transform_5(%arg0: i32, %arg1: i32) -> (i32, i32) {
    %c0_i32 = arith.constant 0 : i32
    %c0_i32_0 = arith.constant 0 : i32
    %c0_i32_1 = arith.constant 0 : i32
    return %c0_i32, %c0_i32_0 : i32, i32
  }
  func.func @transform_6(%arg0: i32, %arg1: i32) -> (i32, i32) {
    %c0_i32 = arith.constant 0 : i32
    %c0_i32_0 = arith.constant 0 : i32
    return %arg0, %c0_i32 : i32, i32
  }
}

module attributes {stable_mosaic.version = 11 : i64} {
  func.func @_matmul_kernel(%arg0: i32, %arg1: i32, %arg2: i32, %arg3: memref<16x128xf32, #tpu.memory_space<vmem>>, %arg4: memref<128x128xf32, #tpu.memory_space<vmem>>, %arg5: memref<1x128xf32, #tpu.memory_space<vmem>>, %arg6: memref<16x128xf32, #tpu.memory_space<vmem>>, %arg7: memref<16x128xf32, #tpu.memory_space<vmem>>) attributes {dimension_semantics = [#tpu.dimension_semantics<parallel>, #tpu.dimension_semantics<parallel>, #tpu.dimension_semantics<arbitrary>], iteration_bounds = array<i64: 1, 3, 1>, scalar_prefetch = 0 : i64, scratch_operands = 1 : i64, tpu.core_type = #tpu.core_type<tc>, window_params = [{transform_indices = @transform_0, window_bounds = array<i64: 16, 128>}, {transform_indices = @transform_1, window_bounds = array<i64: 128, 128>}, {transform_indices = @transform_2, window_bounds = array<i64: 1, 128>}, {transform_indices = @transform_3, window_bounds = array<i64: 16, 128>}]} {
    %c0_i32 = arith.constant 0 : i32
    %0 = arith.cmpi eq, %arg2, %c0_i32 : i32
    %1 = arith.extui %0 : i1 to i32
    %c0_i32_0 = arith.constant 0 : i32
    %2 = arith.cmpi ne, %1, %c0_i32_0 : i32
    scf.if %2 {
      %cst_10 = arith.constant 0.000000e+00 : f32
      %14 = vector.broadcast %cst_10 : f32 to vector<16x128xf32>
      %c0_11 = arith.constant 0 : index
      %c0_12 = arith.constant 0 : index
      %15 = vector.load %arg7[%c0_11, %c0_12] : memref<16x128xf32, #tpu.memory_space<vmem>>, vector<16x128xf32>
      tpu.vector_store %arg7[%c0_11, %c0_12], %14 {strides = array<i32>} : memref<16x128xf32, #tpu.memory_space<vmem>>, vector<16x128xf32>,
    } else {
    }
    %c0 = arith.constant 0 : index
    %c0_1 = arith.constant 0 : index
    %3 = vector.load %arg7[%c0, %c0_1] : memref<16x128xf32, #tpu.memory_space<vmem>>, vector<16x128xf32>
    %c0_2 = arith.constant 0 : index
    %c0_3 = arith.constant 0 : index
    %4 = vector.load %arg3[%c0_2, %c0_3] : memref<16x128xf32, #tpu.memory_space<vmem>>, vector<16x128xf32>
    %5 = arith.truncf %4 : vector<16x128xf32> to vector<16x128xbf16>
    %c0_4 = arith.constant 0 : index
    %c0_5 = arith.constant 0 : index
    %6 = vector.load %arg4[%c0_4, %c0_5] : memref<128x128xf32, #tpu.memory_space<vmem>>, vector<128x128xf32>
    %7 = arith.truncf %6 : vector<128x128xf32> to vector<128x128xbf16>
    %cst = arith.constant dense<0.000000e+00> : vector<16x128xf32>
    %8 = tpu.matmul %5, %7, %cst {dimension_numbers = #tpu.dot_dimension_numbers<[1], [0], [0], [1], [0, 0, 1, 1], [], []>} : vector<16x128xbf16>, vector<128x128xbf16>, vector<16x128xf32> -> vector<16x128xf32>
    %9 = arith.addf %3, %8 : vector<16x128xf32>
    %c0_6 = arith.constant 0 : index
    %c0_7 = arith.constant 0 : index
    %10 = vector.load %arg7[%c0_6, %c0_7] : memref<16x128xf32, #tpu.memory_space<vmem>>, vector<16x128xf32>
    tpu.vector_store %arg7[%c0_6, %c0_7], %9 {strides = array<i32>} : memref<16x128xf32, #tpu.memory_space<vmem>>, vector<16x128xf32>,
    %c0_i32_8 = arith.constant 0 : i32
    %11 = arith.cmpi eq, %arg2, %c0_i32_8 : i32
    %12 = arith.extui %11 : i1 to i32
    %c0_i32_9 = arith.constant 0 : i32
    %13 = arith.cmpi ne, %12, %c0_i32_9 : i32
    scf.if %13 {
      %c0_10 = arith.constant 0 : index
      %c0_11 = arith.constant 0 : index
      %14 = vector.load %arg7[%c0_10, %c0_11] : memref<16x128xf32, #tpu.memory_space<vmem>>, vector<16x128xf32>
      %c0_12 = arith.constant 0 : index
      %c0_13 = arith.constant 0 : index
      %15 = vector.load %arg5[%c0_12, %c0_13] : memref<1x128xf32, #tpu.memory_space<vmem>>, vector<1x128xf32>
      %16 = vector.broadcast %15 : vector<1x128xf32> to vector<16x128xf32>
      %17 = arith.addf %14, %16 : vector<16x128xf32>
      %c0_14 = arith.constant 0 : index
      %c0_15 = arith.constant 0 : index
      %18 = vector.load %arg6[%c0_14, %c0_15] : memref<16x128xf32, #tpu.memory_space<vmem>>, vector<16x128xf32>
      tpu.vector_store %arg6[%c0_14, %c0_15], %17 {strides = array<i32>} : memref<16x128xf32, #tpu.memory_space<vmem>>, vector<16x128xf32>,
    } else {
    }
    return
  }
  func.func @transform_0(%arg0: i32, %arg1: i32, %arg2: i32) -> (i32, i32) {
    %c0_i32 = arith.constant 0 : i32
    return %arg0, %arg2 : i32, i32
  }
  func.func @transform_1(%arg0: i32, %arg1: i32, %arg2: i32) -> (i32, i32) {
    %c0_i32 = arith.constant 0 : i32
    return %arg2, %arg1 : i32, i32
  }
  func.func @transform_2(%arg0: i32, %arg1: i32, %arg2: i32) -> (i32, i32) {
    %c0_i32 = arith.constant 0 : i32
    %c0_i32_0 = arith.constant 0 : i32
    return %c0_i32, %arg1 : i32, i32
  }
  func.func @transform_3(%arg0: i32, %arg1: i32, %arg2: i32) -> (i32, i32) {
    %c0_i32 = arith.constant 0 : i32
    return %arg0, %arg1 : i32, i32
  }
}

module attributes {stable_mosaic.version = 11 : i64} {
  func.func @_ln_kernel(%arg0: i32, %arg1: memref<16x128xf32, #tpu.memory_space<vmem>>, %arg2: memref<1x128xf32, #tpu.memory_space<vmem>>, %arg3: memref<1x128xf32, #tpu.memory_space<vmem>>, %arg4: memref<16x128xf32, #tpu.memory_space<vmem>>) attributes {dimension_semantics = [#tpu.dimension_semantics<parallel>], iteration_bounds = array<i64: 1>, scalar_prefetch = 0 : i64, scratch_operands = 0 : i64, tpu.core_type = #tpu.core_type<tc>, window_params = [{transform_indices = @transform_0, window_bounds = array<i64: 16, 128>}, {pipeline_mode = #tpu.pipeline_mode<synchronous>, transform_indices = @transform_1, window_bounds = array<i64: 1, 128>}, {pipeline_mode = #tpu.pipeline_mode<synchronous>, transform_indices = @transform_2, window_bounds = array<i64: 1, 128>}, {transform_indices = @transform_3, window_bounds = array<i64: 16, 128>}]} {
    %c0 = arith.constant 0 : index
    %c0_0 = arith.constant 0 : index
    %0 = vector.load %arg1[%c0, %c0_0] : memref<16x128xf32, #tpu.memory_space<vmem>>, vector<16x128xf32>
    %cst = arith.constant dense<0.000000e+00> : vector<16xf32>
    %1 = vector.multi_reduction <add>, %0, %cst [1] : vector<16x128xf32> to vector<16xf32>
    %2 = vector.shape_cast %1 : vector<16xf32> to vector<16x1xf32>
    %cst_1 = arith.constant 1.280000e+02 : f32
    %3 = vector.broadcast %cst_1 : f32 to vector<16x1xf32>
    %4 = arith.divf %2, %3 : vector<16x1xf32>
    %5 = vector.broadcast %4 : vector<16x1xf32> to vector<16x128xf32>
    %6 = arith.subf %0, %5 : vector<16x128xf32>
    %7 = arith.mulf %6, %6 : vector<16x128xf32>
    %cst_2 = arith.constant dense<0.000000e+00> : vector<16xf32>
    %8 = vector.multi_reduction <add>, %7, %cst_2 [1] : vector<16x128xf32> to vector<16xf32>
    %9 = vector.shape_cast %8 : vector<16xf32> to vector<16x1xf32>
    %cst_3 = arith.constant 1.280000e+02 : f32
    %10 = vector.broadcast %cst_3 : f32 to vector<16x1xf32>
    %11 = arith.divf %9, %10 : vector<16x1xf32>
    %12 = vector.broadcast %4 : vector<16x1xf32> to vector<16x128xf32>
    %13 = arith.subf %0, %12 : vector<16x128xf32>
    %cst_4 = arith.constant 9.99999974E-6 : f32
    %14 = vector.broadcast %cst_4 : f32 to vector<16x1xf32>
    %15 = arith.addf %11, %14 : vector<16x1xf32>
    %16 = math.rsqrt %15 : vector<16x1xf32>
    %17 = vector.broadcast %16 : vector<16x1xf32> to vector<16x128xf32>
    %18 = arith.mulf %13, %17 : vector<16x128xf32>
    %c0_5 = arith.constant 0 : index
    %c0_6 = arith.constant 0 : index
    %19 = vector.load %arg2[%c0_5, %c0_6] : memref<1x128xf32, #tpu.memory_space<vmem>>, vector<1x128xf32>
    %20 = vector.broadcast %19 : vector<1x128xf32> to vector<16x128xf32>
    %21 = arith.mulf %18, %20 : vector<16x128xf32>
    %c0_7 = arith.constant 0 : index
    %c0_8 = arith.constant 0 : index
    %22 = vector.load %arg3[%c0_7, %c0_8] : memref<1x128xf32, #tpu.memory_space<vmem>>, vector<1x128xf32>
    %23 = vector.broadcast %22 : vector<1x128xf32> to vector<16x128xf32>
    %24 = arith.addf %21, %23 : vector<16x128xf32>
    %c0_9 = arith.constant 0 : index
    %c0_10 = arith.constant 0 : index
    %25 = vector.load %arg4[%c0_9, %c0_10] : memref<16x128xf32, #tpu.memory_space<vmem>>, vector<16x128xf32>
    tpu.vector_store %arg4[%c0_9, %c0_10], %24 {strides = array<i32>} : memref<16x128xf32, #tpu.memory_space<vmem>>, vector<16x128xf32>,
    return
  }
  func.func @transform_0(%arg0: i32) -> (i32, i32) {
    %c0_i32 = arith.constant 0 : i32
    %c0_i32_0 = arith.constant 0 : i32
    return %arg0, %c0_i32 : i32, i32
  }
  func.func @transform_1(%arg0: i32) -> (i32, i32) {
    %c0_i32 = arith.constant 0 : i32
    %c0_i32_0 = arith.constant 0 : i32
    %c0_i32_1 = arith.constant 0 : i32
    return %c0_i32, %c0_i32_0 : i32, i32
  }
  func.func @transform_2(%arg0: i32) -> (i32, i32) {
    %c0_i32 = arith.constant 0 : i32
    %c0_i32_0 = arith.constant 0 : i32
    %c0_i32_1 = arith.constant 0 : i32
    return %c0_i32, %c0_i32_0 : i32, i32
  }
  func.func @transform_3(%arg0: i32) -> (i32, i32) {
    %c0_i32 = arith.constant 0 : i32
    %c0_i32_0 = arith.constant 0 : i32
    return %arg0, %c0_i32 : i32, i32
  }
}

</mosaic_0001>

<bundles_post_ra>
// kernel: run.21
= control target key start
LH: loop header
LB: loop body
LE: loop exit
PB: predicated region body
PF: predicated region fallthrough
CT: control target
= control target key end

     0   :  { %v207_v0 = vmov 0.0   ;;  %vm208_vm0 = vmmov 0   ;;  %s319_s1 = inlined_call_operand.vmem [shape: f32[128,128], index: 1, kind: input, shape index: {}]   ;;  %s320_s0 = inlined_call_operand.vmem [shape: f32[16,128], index: 0, kind: input, shape index: {}]   ;;  %s321_s2 = inlined_call_operand.vmem [shape: f32[1,128], index: 2, kind: input, shape index: {}]   ;;  %s322_s3 = inlined_call_operand.vmem [shape: f32[16,128], index: 3, kind: input, shape index: {}]   ;;  %s323_s4 = inlined_call_operand.vmem [shape: f32[1,128], index: 4, kind: input, shape index: {}]   ;;  %s324_s5 = inlined_call_operand.vmem [shape: f32[1,128], index: 5, kind: input, shape index: {}]   ;;  %s325_s6 = inlined_call_operand.vmem [shape: f32[16,128], index: 6, kind: output, shape index: {}]  }
   0x1   :  { %181 = vmatprep.subr.bf16.mxu0 %v207_v0  ;;  %v49_v1 = vld [vmem:[%s319_s1 + $0x70] sm:$0xff]  ;;  %v50_v2 = vld [vmem:[%s319_s1 + $0x78] sm:$0xff]  ;;  %v47_v3 = vld [vmem:[%s319_s1 + $0x60] sm:$0xff]  ;;  %197 = vmatprep.mubr.msk.bf16.mxu0 %vm208_vm0, %v207_v0 }
   0x2   :  { %v58_v4 = vpack.c.bf16 %v50_v2, %v49_v1  ;;  %v48_v5 = vld [vmem:[%s319_s1 + $0x68] sm:$0xff]  ;;  %v45_v7 = vld [vmem:[%s319_s1 + $0x50] sm:$0xff]  ;;  %v46_v8 = vld [vmem:[%s319_s1 + $0x58] sm:$0xff] }
   0x3   :  { %v57_v6 = vpack.c.bf16 %v48_v5, %v47_v3  ;;  %v56_v9 = vpack.c.bf16 %v46_v8, %v45_v7  ;;  %v43_v10 = vld [vmem:[%s319_s1 + $0x40] sm:$0xff]  ;;  %v44_v11 = vld [vmem:[%s319_s1 + $0x48] sm:$0xff]  ;;  %v41_v13 = vld [vmem:[%s319_s1 + $0x30] sm:$0xff] }
   0x4   :  { %182 = vmatpush3.bf16.msra.mxu0 %v58_v4  ;;  %v55_v12 = vpack.c.bf16 %v44_v11, %v43_v10  ;;  %v42_v14 = vld [vmem:[%s319_s1 + $0x38] sm:$0xff]  ;;  %v39_v16 = vld [vmem:[%s319_s1 + $0x20] sm:$0xff]  ;;  %v40_v17 = vld [vmem:[%s319_s1 + $0x28] sm:$0xff] }
   0x5   :  { %183 = vmatprep.subr.bf16.mxu0 %v207_v0  ;;  %v54_v15 = vpack.c.bf16 %v42_v14, %v41_v13  ;;  %v53_v18 = vpack.c.bf16 %v40_v17, %v39_v16  ;;  %v37_v19 = vld [vmem:[%s319_s1 + $0x10] sm:$0xff]  ;;  %v38_v20 = vld [vmem:[%s319_s1 + $0x18] sm:$0xff]  ;;  %v35_v22 = vld [vmem:[%s319_s1] sm:$0xff] }
   0x6   :  { %v52_v21 = vpack.c.bf16 %v38_v20, %v37_v19  ;;  %v36_v23 = vld [vmem:[%s319_s1 + $0x8] sm:$0xff]  ;;  %v32_v25 = vld [vmem:[%s320_s0] sm:$0xff] }
   0x7   :  { %v51_v24 = vpack.c.bf16 %v36_v23, %v35_v22  ;;  %v33_v26 = vld [vmem:[%s320_s0 + $0x8] sm:$0xff]  ;;  %v169_v28 = vld [vmem:[%s321_s2] ss:$0 sm:$0xff] }
   0x8   :  { %184 = vmatpush3.bf16.msra.mxu0 %v57_v6  ;;  %v34_v27 = vpack.c.bf16 %v33_v26, %v32_v25  ;;  %v118_v30 = vld [vmem:[%s322_s3] sm:$0xff]  ;;  %v119_v35 = vld [vmem:[%s322_s3 + $0x8] sm:$0xff] }
   0x9   :  { %185 = vmatprep.subr.bf16.mxu0 %v207_v0  ;;  %v170_v54 = vld [vmem:[%s323_s4] ss:$0 sm:$0xff] }
   0xa   :  { %v171_v56 = vld [vmem:[%s324_s5] ss:$0 sm:$0xff] }
   0xc   :  { %186 = vmatpush3.bf16.msra.mxu0 %v56_v9 }
   0xd   :  { %187 = vmatprep.subr.bf16.mxu0 %v207_v0 }
  0x10   :  { %188 = vmatpush3.bf16.msra.mxu0 %v55_v12 }
  0x11   :  { %189 = vmatprep.subr.bf16.mxu0 %v207_v0 }
  0x14   :  { %190 = vmatpush3.bf16.msra.mxu0 %v54_v15 }
  0x15   :  { %191 = vmatprep.subr.bf16.mxu0 %v207_v0 }
  0x18   :  { %192 = vmatpush3.bf16.msra.mxu0 %v53_v18 }
  0x19   :  { %193 = vmatprep.subr.bf16.mxu0 %v207_v0 }
  0x1c   :  { %194 = vmatpush3.bf16.msra.mxu0 %v52_v21 }
  0x1d   :  { %195 = vmatprep.subr.bf16.mxu0 %v207_v0 }
  0x20   :  { %196 = vmatpush3.bf16.msra.mxu0 %v51_v24 }
  0x23   :  { %198 = vmatmul.mubr.bf16.vlgmr.msra.gmra.mxu0 %v34_v27 }
  0xe3   :  { %v93_v29 = vpop.f32.mrf.mxu0 }
  0xe4   :  { %v116_v31 = vadd.f32 %v169_v28, %v93_v29 }
  0xe5   :  { %v199_v32 = vpop.f32.mrf.mxu0 }
  0xe6   :  { %v120_v33 = vadd.f32 %v118_v30, %v116_v31 }
  0xe7   :  { %v96_v34 = vpop.f32.mrf.mxu0 }
  0xe8   :  { %v117_v36 = vadd.f32 %v169_v28, %v96_v34  ;;  %122 = vadd.xlane.f32.xlu0 %v120_v33 }
  0xe9   :  { %v200_v37 = vpop.f32.mrf.mxu0 }
  0xea   :  { %v121_v38 = vadd.f32 %v119_v35, %v117_v36 }
  0xec   :  { %124 = vadd.xlane.f32.xlu0 %v121_v38 }
 0x171   :  { %v123_v39 = vpop.xlane.xlu0 %122 }
 0x172   :  { %v127_v40 = vmul.f32 0.0078125, %v123_v39 }
 0x174   :  { %v129_v41 = vsub.f32 %v120_v33, %v127_v40 }
 0x175   :  { %v125_v42 = vpop.xlane.xlu0 %124 }
 0x176   :  { %v128_v43 = vmul.f32 0.0078125, %v125_v42  ;;  %v131_v44 = vmul.f32 %v129_v41, %v129_v41 }
 0x178   :  { %v130_v45 = vsub.f32 %v121_v38, %v128_v43  ;;  %133 = vadd.xlane.f32.xlu1 %v131_v44 }
 0x17a   :  { %v132_v46 = vmul.f32 %v130_v45, %v130_v45 }
 0x17c   :  { %135 = vadd.xlane.f32.xlu1 %v132_v46 }
 0x201   :  { %v134_v47 = vpop.xlane.xlu1 %133 }
 0x202   :  { %v137_v48 = vmul.f32 0.0078125, %v134_v47 }
 0x204   :  { %v139_v49 = vadd.f32 1e-05, %v137_v48 }
 0x205   :  { %v136_v50 = vpop.xlane.xlu1 %135 }
 0x206   :  { %203 = vrsqrt.f32 %v139_v49  ;;  %v138_v51 = vmul.f32 0.0078125, %v136_v50 }
 0x208   :  { %v140_v52 = vadd.f32 1e-05, %v138_v51 }
 0x20a   :  { %205 = vrsqrt.f32 %v140_v52 }
 0x213   :  { %v204_v53 = vpop.eup %203 }
 0x214   :  { %v143_v55 = vmul.f32 %v204_v53, %v129_v41 }
 0x216   :  { %v152_v57 = vmul.f32 %v170_v54, %v143_v55 }
 0x217   :  { %v206_v58 = vpop.eup %205 }
 0x218   :  { %v161_v59 = vadd.f32 %v171_v56, %v152_v57  ;;  %v144_v60 = vmul.f32 %v206_v58, %v130_v45 }
 0x21a   :  { %163 = vst [vmem:[%s325_s6] sm:$0xff] %v161_v59  ;;  %v153_v61 = vmul.f32 %v170_v54, %v144_v60 }
 0x21c   :  { %v162_v62 = vadd.f32 %v171_v56, %v153_v61 }
 0x21e   :  { %164 = vst [vmem:[%s325_s6 + $0x8] sm:$0xff] %v162_v62 }

// kernel: run.19
= control target key start
LH: loop header
LB: loop body
LE: loop exit
PB: predicated region body
PF: predicated region fallthrough
CT: control target
= control target key end

     0   :  { %8 = vsyncpa [#allocation4], 0  ;;  %s856_s0 = inlined_call_operand.vmem [shape: f32[16,128], index: 0, kind: input, shape index: {}]   ;;  %s857_s1 = inlined_call_operand.hbm [shape: f32[128,384], index: 1, kind: input, shape index: {}]   ;;  %s858_s2 = inlined_call_operand.vmem [shape: f32[1,384], index: 2, kind: input, shape index: {}]   ;;  %s859_s3 = inlined_call_operand.vmem [shape: f32[16,384], index: 3, kind: output, shape index: {}]  }
   0x1   :  { %10 = vsyncpa [#allocation4 + $0x1], 0  ;;  %s719_s12 = smov 0   ;;  %s721_s13 = smov 0  }
   0x2   :  { %s723_s14 = smov 0   ;;  %s725_s15 = smov 0  }
   0x3   :  { %s727_s16 = smov 0   ;;  %s729_s17 = smov 0  }
   0x4 LB: > { %s509_s18 = sadd.s32 4294967295, %s691_s17   ;;  %s31_s19 = sadd.s32 1, %s687_s16  ;;  %s691_s17 = sphi %s729_s17, %s16_s17   ;;  %s687_s16 = sphi %s727_s16, %s868_s16   ;;  %s683_s15 = sphi %s725_s15, %s867_s15   ;;  %s679_s14 = sphi %s723_s14, %s866_s14   ;;  %s675_s13 = sphi %s721_s13, %s865_s13   ;;  %s671_s12 = sphi %s719_s12, %s864_s12  }
   0x5   : > { %p33_p0 = scmp.ge.s32.totalorder %s31_s19, 3  ;;  %s72_s20 = sadd.s32 1, %s679_s14 }
   0x6   : > { %p79_p1 = scmp.ne.s32.totalorder %s679_s14, %s675_s13  ;;  %p80_p2 = scmp.eq.s32.totalorder %s691_s17, 0 }
   0x7   : > { %s870_s19 = smov (%p33_p0, %s31_s19), 0  ;;  %p85_p4 = scmp.ne.s32.totalorder %s675_s13, %s671_s12 }
   0x8   : > { %p755_p3 = por %p80_p2, %p79_p1  ;;  %s68_s22 = ssub.s32 %s687_s16, %s870_s19 }
   0x9   : > { %p86_p5 = scmp.eq.s32.totalorder %s509_s18, 0  ;;  %p70_p6 = scmp.eq.s32.totalorder %s68_s22, 0 }
   0xa   : > { %p137_p7 = scmp.eq.s32.totalorder %s509_s18, 2  ;;  %p559_p10 = scmp.lt.s32.totalorder %s691_s17, 3 }
   0xb   : > { %p762_p8 = por %p86_p5, %p85_p4  ;;  %s175_s26 = sand.u32 1, %s679_s14  }
   0xc   : > { %s767_s24 = scalar_select %p70_p6, %s679_s14, %s72_s20  }
   0xd   : > { %p769_p9 = por %p137_p7, %p79_p1  ;;  %s515_s27 = sshll.u32 %s687_s16, 7 }
   0xe   : > { %s514_s28 = sshll.u32 %s175_s26, 7  ;;  %s187_s4 = scalar_lea.hbm %s857_s1, %s515_s27 }
   0xf   : > { %s179_s5 = scalar_lea.vmem [#allocation3], %s514_s28  ;;  %p781_p11 = pnand %p559_p10, %p755_p3 }
  0x10   : > { %s188_s6 = sshll.u32 %s179_s5, 4  ;;  %p516_p12 = scmp.ge.s32.totalorder %s691_s17, 1  ;;  %s189_s6 = int_to_ptr.vmem [resolvable:$true] %s188_s6 }
  0x11   : > { %s176_s8 = scalar_lea.sflag [#allocation4], %s175_s26  ;;  %p615_p13 = pneg %p781_p11 }
  0x12   : > { %s626_s9 = scalar_lea.vmem %s189_s6, 2048  ;;  %s693_s10 = smov [#allocation3]  }
  0x13   : > { %p627_p0 = scmp.ne.s32.totalorder %s189_s6, %s626_s9  ;;  %s631_s11 = sshll.u32 %s693_s10, 4  ;;  %s632_s11 = int_to_ptr.vmem [resolvable:$false] %s631_s11 }
  0x14   : > { %s633_s12 = scalar_lea.vmem %s632_s11, 4096  ;;  %p634_p4 = scmp.lt.s32.totalorder %s189_s6, %s632_s11 }
  0x15   : > { %p629_p1 = pnand %p627_p0, %p615_p13  ;;  %p635_p5 = scmp.lt.s32.totalorder %s633_s12, %s626_s9 }
  0x17   : > { %p630_p2 = pneg %p629_p1  ;;  %p636_p3 = por %p635_p5, %p634_p4 }
  0x19   : > { %p637_p6 = pnand %p636_p3, %p630_p2 }
  0x1b   : > { %640 = shalt.err (!%p637_p6)
}
  0x1c   : > { %s694_s18 = smov 384   ;;  %s695_s20 = smov 128  }
  0x1d   : > { %s696_s21 = smov 8   ;;  %p202_p7 = scmp.lt.s32.totalorder %s691_s17, 4 }
  0x1e   : > { %558 = dma.hbm_to_vmem [thread:$0]  (!%p781_p11), %s187_s4, 2048, %s189_s6, %s176_s8, %s694_s18, %s695_s20, %s696_s21  }
  0x1f   : > { %p203_p10 = pnand %p516_p12, %p202_p7 }
  0x20   : > { %s794_s22 = sand.u32 (!%p203_p10), 1, %s675_s13  }
  0x21   : > { %206 = sbr.rel (%p203_p10) target bundleno = 281 (0x119), region = 32  ;;  %s517_s26 = sshll.u32 (!%p203_p10), %s794_s22, 7 }
  0x22   : > { %s209_s27 = scalar_lea.sflag (!%p203_p10), [#allocation4], %s794_s22  ;;  %s798_s28 = scalar_lea.vmem (!%p203_p10), [#allocation3], %s517_s26 }
  0x26   : > { %666 = dma.done.wait (%p762_p8), %s209_s27, 2048  }
  0x27   : > { %668 = vsyncadd (%p762_p8), %s209_s27, 4294965248  ;;  %v697_v0 = vmov 0.0   ;;  %vm698_vm0 = vmmov 0   ;;  %v285_v1 = vld [vmem:[%s798_s28 + $0x70] sm:$0xff]  ;;  %v286_v2 = vld [vmem:[%s798_s28 + $0x78] sm:$0xff]  ;;  %p255_p8 = scmp.lt.s32.totalorder %s683_s15, 2 }
  0x28   : > { %533 = vmatprep.subr.bf16.mxu0 %v697_v0  ;;  %549 = vmatprep.mubr.msk.bf16.mxu0 %vm698_vm0, %v697_v0  ;;  %v283_v3 = vld [vmem:[%s798_s28 + $0x60] sm:$0xff]  ;;  %v294_v4 = vpack.c.bf16 %v286_v2, %v285_v1  ;;  %v284_v5 = vld [vmem:[%s798_s28 + $0x68] sm:$0xff]  ;;  %v281_v7 = vld [vmem:[%s798_s28 + $0x50] sm:$0xff]  ;;  %s518_s9 = sshll.u32 %s794_s22, 4  ;;  %s521_s11 = sshll.u32 (%p769_p9), %s683_s15, 3 }
  0x29   : > { %v293_v6 = vpack.c.bf16 %v284_v5, %v283_v3  ;;  %v282_v8 = vld [vmem:[%s798_s28 + $0x58] sm:$0xff]  ;;  %v279_v10 = vld [vmem:[%s798_s28 + $0x40] sm:$0xff]  ;;  %v280_v11 = vld [vmem:[%s798_s28 + $0x48] sm:$0xff]  ;;  %s256_s5 = scalar_select %p255_p8, %s683_s15, 2 }
  0x2a   : > { %534 = vmatpush3.bf16.msra.mxu0 %v294_v4  ;;  %v292_v9 = vpack.c.bf16 %v282_v8, %v281_v7  ;;  %v291_v12 = vpack.c.bf16 %v280_v11, %v279_v10  ;;  %v277_v13 = vld [vmem:[%s798_s28 + $0x30] sm:$0xff]  ;;  %v278_v14 = vld [vmem:[%s798_s28 + $0x38] sm:$0xff]  ;;  %v275_v16 = vld [vmem:[%s798_s28 + $0x20] sm:$0xff]  ;;  %s244_s10 = scalar_lea.vmem [#allocation5], %s518_s9  ;;  %s367_s20 = scalar_lea.vmem (%p769_p9), %s859_s3, %s521_s11 }
  0x2b   : > { %535 = vmatprep.subr.bf16.mxu0 %v697_v0  ;;  %v290_v15 = vpack.c.bf16 %v278_v14, %v277_v13  ;;  %v276_v17 = vld [vmem:[%s798_s28 + $0x28] sm:$0xff]  ;;  %v273_v19 = vld [vmem:[%s798_s28 + $0x10] sm:$0xff]  ;;  %v274_v20 = vld [vmem:[%s798_s28 + $0x18] sm:$0xff]  ;;  %s257_s8 = scalar_lea.vmem %s858_s2, %s256_s5 }
  0x2c   : > { %v289_v18 = vpack.c.bf16 %v276_v17, %v275_v16  ;;  %v288_v21 = vpack.c.bf16 %v274_v20, %v273_v19  ;;  %v271_v22 = vld [vmem:[%s798_s28] sm:$0xff]  ;;  %v272_v23 = vld [vmem:[%s798_s28 + $0x8] sm:$0xff] }
  0x2d   : > { %v287_v24 = vpack.c.bf16 %v272_v23, %v271_v22  ;;  %v268_v25 = vld [vmem:[%s856_s0] sm:$0xff]  ;;  %v269_v26 = vld [vmem:[%s856_s0 + $0x8] sm:$0xff] }
  0x2e   : > { %536 = vmatpush3.bf16.msra.mxu0 %v293_v6  ;;  %v270_v27 = vpack.c.bf16 %v269_v26, %v268_v25  ;;  %v519_v28 = vld [vmem:[%s257_s8] ss:$0 sm:$0xff] }
  0x2f   : > { %537 = vmatprep.subr.bf16.mxu0 %v697_v0 }
  0x32   : > { %538 = vmatpush3.bf16.msra.mxu0 %v292_v9 }
  0x33   : > { %539 = vmatprep.subr.bf16.mxu0 %v697_v0 }
  0x36   : > { %540 = vmatpush3.bf16.msra.mxu0 %v291_v12 }
  0x37   : > { %541 = vmatprep.subr.bf16.mxu0 %v697_v0 }
  0x3a   : > { %542 = vmatpush3.bf16.msra.mxu0 %v290_v15 }
  0x3b   : > { %543 = vmatprep.subr.bf16.mxu0 %v697_v0 }
  0x3e   : > { %544 = vmatpush3.bf16.msra.mxu0 %v289_v18 }
  0x3f   : > { %545 = vmatprep.subr.bf16.mxu0 %v697_v0 }
  0x42   : > { %546 = vmatpush3.bf16.msra.mxu0 %v288_v21 }
  0x43   : > { %547 = vmatprep.subr.bf16.mxu0 %v697_v0 }
  0x46   : > { %548 = vmatpush3.bf16.msra.mxu0 %v287_v24 }
  0x49   : > { %550 = vmatmul.mubr.bf16.vlgmr.msra.gmra.mxu0 %v270_v27 }
 0x109   : > { %v329_v29 = vpop.f32.mrf.mxu0 }
 0x10a   : > { %v352_v30 = vadd.f32 %v519_v28, %v329_v29 }
 0x10b   : > { %v551_v31 = vpop.f32.mrf.mxu0 }
 0x10c   : > { %354 = vst [vmem:[%s244_s10] sm:$0xff] %v352_v30  ;;  %362 = sbr.rel (!%p769_p9) target bundleno = 281 (0x119), region = 48 }
 0x10d   : > { %v332_v32 = vpop.f32.mrf.mxu0 }
 0x10e   : > { %v353_v33 = vadd.f32 %v519_v28, %v332_v32 }
 0x10f   : > { %v552_v34 = vpop.f32.mrf.mxu0 }
 0x110   : > { %355 = vst [vmem:[%s244_s10 + $0x8] sm:$0xff] %v353_v33 }
 0x113   : > { %v398_v35 = vld [vmem:[%s244_s10] sm:$0xff] }
 0x114   : > { %399 = vst [vmem:[%s367_s20] sm:$0xff] %v398_v35 }
 0x117   : > { %v400_v36 = vld [vmem:[%s244_s10 + $0x8] sm:$0xff] }
 0x118   : > { %401 = vst [vmem:[%s367_s20 + $0x18] sm:$0xff] %v400_v36 }
 0x119 PF: > { %s16_s17 = sadd.s32 1, %s691_s17   ;;  %s864_s12 = smov %s675_s13 }
 0x11a   : > { %p13_p11 = scmp.ge.s32.totalorder %s16_s17, 5   ;;  %s865_s13 = smov %s679_s14 }
 0x11b   : > { %s866_s14 = smov %s767_s24  ;;  %s867_s15 = smov %s687_s16 }
 0x11c   : > { %s868_s16 = smov %s870_s19  ;;  %15 = sbr.rel (!%p13_p11) target bundleno = 4 (0x4), region = 124 }
 0x121   :  { %417 = vsyncpa [#allocation4], 1 }
 0x122   :  { %419 = vsyncpa [#allocation4 + $0x1], 1 }

// kernel: run.22
= control target key start
LH: loop header
LB: loop body
LE: loop exit
PB: predicated region body
PF: predicated region fallthrough
CT: control target
= control target key end

     0   :  { %v147_v0 = vmov 0.0   ;;  %vm148_vm0 = vmmov 0   ;;  %s232_s1 = inlined_call_operand.vmem [shape: f32[128,128], index: 1, kind: input, shape index: {}]   ;;  %s233_s0 = inlined_call_operand.vmem [shape: f32[16,128], index: 0, kind: input, shape index: {}]   ;;  %s234_s2 = inlined_call_operand.vmem [shape: f32[1,128], index: 2, kind: input, shape index: {}]   ;;  %s235_s3 = inlined_call_operand.vmem [shape: f32[16,128], index: 3, kind: output, shape index: {}]  }
   0x1   :  { %125 = vmatprep.subr.bf16.mxu0 %v147_v0  ;;  %v40_v1 = vld [vmem:[%s232_s1 + $0x70] sm:$0xff]  ;;  %v41_v2 = vld [vmem:[%s232_s1 + $0x78] sm:$0xff]  ;;  %v38_v3 = vld [vmem:[%s232_s1 + $0x60] sm:$0xff]  ;;  %141 = vmatprep.mubr.msk.bf16.mxu0 %vm148_vm0, %v147_v0 }
   0x2   :  { %v49_v4 = vpack.c.bf16 %v41_v2, %v40_v1  ;;  %v39_v5 = vld [vmem:[%s232_s1 + $0x68] sm:$0xff]  ;;  %v36_v7 = vld [vmem:[%s232_s1 + $0x50] sm:$0xff]  ;;  %v37_v8 = vld [vmem:[%s232_s1 + $0x58] sm:$0xff] }
   0x3   :  { %v48_v6 = vpack.c.bf16 %v39_v5, %v38_v3  ;;  %v47_v9 = vpack.c.bf16 %v37_v8, %v36_v7  ;;  %v34_v10 = vld [vmem:[%s232_s1 + $0x40] sm:$0xff]  ;;  %v35_v11 = vld [vmem:[%s232_s1 + $0x48] sm:$0xff]  ;;  %v32_v13 = vld [vmem:[%s232_s1 + $0x30] sm:$0xff] }
   0x4   :  { %126 = vmatpush3.bf16.msra.mxu0 %v49_v4  ;;  %v46_v12 = vpack.c.bf16 %v35_v11, %v34_v10  ;;  %v33_v14 = vld [vmem:[%s232_s1 + $0x38] sm:$0xff]  ;;  %v30_v16 = vld [vmem:[%s232_s1 + $0x20] sm:$0xff]  ;;  %v31_v17 = vld [vmem:[%s232_s1 + $0x28] sm:$0xff] }
   0x5   :  { %127 = vmatprep.subr.bf16.mxu0 %v147_v0  ;;  %v45_v15 = vpack.c.bf16 %v33_v14, %v32_v13  ;;  %v44_v18 = vpack.c.bf16 %v31_v17, %v30_v16  ;;  %v28_v19 = vld [vmem:[%s232_s1 + $0x10] sm:$0xff]  ;;  %v29_v20 = vld [vmem:[%s232_s1 + $0x18] sm:$0xff]  ;;  %v26_v22 = vld [vmem:[%s232_s1] sm:$0xff] }
   0x6   :  { %v43_v21 = vpack.c.bf16 %v29_v20, %v28_v19  ;;  %v27_v23 = vld [vmem:[%s232_s1 + $0x8] sm:$0xff]  ;;  %v23_v25 = vld [vmem:[%s233_s0] sm:$0xff] }
   0x7   :  { %v42_v24 = vpack.c.bf16 %v27_v23, %v26_v22  ;;  %v24_v26 = vld [vmem:[%s233_s0 + $0x8] sm:$0xff]  ;;  %v115_v28 = vld [vmem:[%s234_s2] ss:$0 sm:$0xff] }
   0x8   :  { %128 = vmatpush3.bf16.msra.mxu0 %v48_v6  ;;  %v25_v27 = vpack.c.bf16 %v24_v26, %v23_v25 }
   0x9   :  { %129 = vmatprep.subr.bf16.mxu0 %v147_v0 }
   0xc   :  { %130 = vmatpush3.bf16.msra.mxu0 %v47_v9 }
   0xd   :  { %131 = vmatprep.subr.bf16.mxu0 %v147_v0 }
  0x10   :  { %132 = vmatpush3.bf16.msra.mxu0 %v46_v12 }
  0x11   :  { %133 = vmatprep.subr.bf16.mxu0 %v147_v0 }
  0x14   :  { %134 = vmatpush3.bf16.msra.mxu0 %v45_v15 }
  0x15   :  { %135 = vmatprep.subr.bf16.mxu0 %v147_v0 }
  0x18   :  { %136 = vmatpush3.bf16.msra.mxu0 %v44_v18 }
  0x19   :  { %137 = vmatprep.subr.bf16.mxu0 %v147_v0 }
  0x1c   :  { %138 = vmatpush3.bf16.msra.mxu0 %v43_v21 }
  0x1d   :  { %139 = vmatprep.subr.bf16.mxu0 %v147_v0 }
  0x20   :  { %140 = vmatpush3.bf16.msra.mxu0 %v42_v24 }
  0x23   :  { %142 = vmatmul.mubr.bf16.vlgmr.msra.gmra.mxu0 %v25_v27 }
  0xe3   :  { %v84_v29 = vpop.f32.mrf.mxu0 }
  0xe4   :  { %v107_v30 = vadd.f32 %v115_v28, %v84_v29 }
  0xe5   :  { %v143_v31 = vpop.f32.mrf.mxu0 }
  0xe6   :  { %109 = vst [vmem:[%s235_s3] sm:$0xff] %v107_v30 }
  0xe7   :  { %v87_v32 = vpop.f32.mrf.mxu0 }
  0xe8   :  { %v108_v33 = vadd.f32 %v115_v28, %v87_v32 }
  0xe9   :  { %v144_v34 = vpop.f32.mrf.mxu0 }
  0xea   :  { %110 = vst [vmem:[%s235_s3 + $0x8] sm:$0xff] %v108_v33 }

// kernel: run.20
= control target key start
LH: loop header
LB: loop body
LE: loop exit
PB: predicated region body
PF: predicated region fallthrough
CT: control target
= control target key end

     0   :  { %s959_s15 = smov 0   ;;  %s1073_s0 = inlined_call_operand.vmem [shape: f32[2,8,384], index: 0, kind: input, shape index: {}, may-alias: {0,1,2}]   ;;  %s1074_s1 = inlined_call_operand.vmem [shape: f32[2,8,384], index: 1, kind: input, shape index: {}, may-alias: {0,1,2}]   ;;  %s1075_s2 = inlined_call_operand.vmem [shape: f32[2,8,384], index: 2, kind: input, shape index: {}, may-alias: {0,1,2}]   ;;  %s1076_s3 = inlined_call_operand.vmem [shape: f32[1,8,8], index: 3, kind: input, shape index: {}]   ;;  %s1077_s4 = inlined_call_operand.vmem [shape: f32[2,8,128], index: 4, kind: output, shape index: {}]  }
   0x1 LB: > { %s806_s16 = sadd.s32 4294967295, %s927_s15   ;;  %p810_p0 = scmp.ge.s32.totalorder %s927_s15, 1  ;;  %s927_s15 = sphi %s959_s15, %s14_s15  }
   0x2   : > { %p184_p1 = scmp.lt.s32.totalorder %s927_s15, 3 }
   0x4   : > { %p185_p2 = pnand %p810_p0, %p184_p1 }
   0x5   : > { %p221_p3 = scmp.lt.s32.totalorder (!%p185_p2), %s806_s16, 1  ;;  %s931_s26 = smov (!%p185_p2), 96  }
   0x6   : > { %188 = sbr.rel (%p185_p2) target bundleno = 1418 (0x58a), region = 36  ;;  %s932_s27 = smov (!%p185_p2), 64  }
   0x7   : > { %s933_s28 = smov (!%p185_p2), 32  }
   0xb   : > { %v929_v0 = vmov 0.0   ;;  %vm930_vm0 = vmmov 0   ;;  %s1079_s16 = smov (!%p221_p3, %s806_s16), 1  ;;  %vm250_vm1 = vcmask 261120   ;;  %v994_v7 = vld [vmem:[%s1076_s3] sm:$0xff]  ;;  %vm299_vm2 = vcmask 64512  }
   0xc   : > { %843 = vmatprep.subr.bf16.mxu0 %v929_v0  ;;  %845 = vmatprep.mubr.msk.bf16.mxu0 %vm930_vm0, %v929_v0  ;;  %s976_s17 = smul.u32 24, %s1079_s16  ;;  %vm315_vm3 = vcmask 1043456   ;;  %s814_s6 = sshll.u32 %s1079_s16, 3  ;;  %vm479_vm4 = vcmask 523520   ;;  %vm597_vm5 = vcmask 785920   ;;  %vm715_vm6 = vcmask 1048320  }
   0xd   : > { %849 = vmatprep.subr.bf16.mxu1 %v929_v0  ;;  %851 = vmatprep.mubr.msk.bf16.mxu1 %vm930_vm0, %v929_v0  ;;  %s1033_s9 = scalar_lea.vmem %s1077_s4, %s814_s6 }
   0xe   : > { %s762_s20 = scalar_lea.vmem %s1074_s1, %s976_s17  ;;  %s225_s23 = scalar_lea.vmem %s1073_s0, %s976_s17 }
   0xf   : > { %v815_v1 = vld [vmem:[%s762_s20 + $0x8] sm:$0xff]  ;;  %v244_v4 = vld [vmem:[%s225_s23] sm:$0xff]  ;;  %s766_s5 = scalar_lea.vmem %s1075_s2, %s976_s17 }
  0x10   : > { %v248_v2 = vpack.c.bf16 %v815_v1, %v815_v1  ;;  %v247_v5 = vpack.c.bf16 %v244_v4, %v244_v4  ;;  %v816_v19 = vld [vmem:[%s766_s5 + $0x10] sm:$0xff] }
  0x11   : > { %v1008_v20 = vpack.c.bf16 %v816_v19, %v816_v19 }
  0x12   : > { %v255_v3 = vsel %vm250_vm1, %v248_v2, 0  ;;  %364 = vrot.lane.b32.xlu1 %v248_v2, %s931_s26 }
  0x13   : > { %844 = vmatpush3.bf16.xpose.msra.mxu0 %v255_v3  ;;  %v317_v21 = vsel %vm315_vm3, %v1008_v20, 0 }
  0x14   : > { %861 = vmatprep.subr.bf16.mxu0 %v929_v0  ;;  %850 = vmatpush3.bf16.msra.mxu1 %v317_v21 }
  0x15   : > { %855 = vmatprep.subr.bf16.mxu1 %v929_v0 }
  0x16   : > { %361 = vrot.lane.b32.xlu1 %v247_v5, %s931_s26 }
  0x1a   : > { %846 = vmatmul.mubr.msk.bf16.vlgmr.msra.gmra.mxu0 %vm250_vm1, %v247_v5  ;;  %481 = vrot.lane.b32.xlu1 %v247_v5, %s932_s27 }
  0x1b   : > { %863 = vmatprep.mubr.msk.bf16.mxu0 %vm930_vm0, %v929_v0 }
  0x1e   : > { %601 = vrot.lane.b32.xlu1 %v248_v2, %s933_s28 }
  0x22   : > { %599 = vrot.lane.b32.xlu1 %v247_v5, %s933_s28 }
  0x84   : > { %v365_v24 = vpop.permute.xlu1 %364 }
  0x85   : > { %v370_v26 = vsel %vm250_vm1, %v365_v24, 0 }
  0x88   : > { %v362_v28 = vpop.permute.xlu1 %361 }
  0x8c   : > { %v482_v30 = vpop.permute.xlu1 %481 }
  0x90   : > { %v602_v32 = vpop.permute.xlu1 %601 }
  0x91   : > { %v607_v33 = vsel %vm250_vm1, %v602_v32, 0 }
  0x94   : > { %v600_v34 = vpop.permute.xlu1 %599 }
  0xda   : > { %v291_v6 = vpop.f32.mrf.mxu0 }
  0xdb   : > { %v297_v8 = vmul.f32 0.17677669, %v291_v6 }
  0xdc   : > { %v847_v9 = vpop.f32.mrf.mxu0 }
  0xdd   : > { %v298_v10 = vadd.f32 %v297_v8, %v994_v7 }
  0xde   : > { %v294_v11 = vpop.f32.mrf.mxu0 }
  0xdf   : > { %v300_v12 = vsel %vm299_vm2, %v298_v10, -inf }
  0xe0   : > { %301 = vmax.xlane.f32.xlu0 %v300_v12  ;;  %v848_v13 = vpop.f32.mrf.mxu0 }
 0x169   : > { %v302_v14 = vpop.xlane.xlu0 %301 }
 0x16a   : > { %v303_v15 = vsub.f32 %v298_v10, %v302_v14 }
 0x16c   : > { %v304_v16 = vmul.f32 1.442695, %v303_v15 }
 0x16e   : > { %905 = vpow2.f32 %v304_v16 }
 0x17b   : > { %v906_v17 = vpop.eup %905 }
 0x17c   : > { %v306_v18 = vsel %vm299_vm2, %v906_v17, 0.0 }
 0x17d   : > { %307 = vadd.xlane.f32.xlu0 %v306_v18 }
 0x193   : > { %483 = vrot.lane.b32.xlu0 %v248_v2, %s932_s27 }
 0x206   : > { %v308_v22 = vpop.xlane.xlu0 %307 }
 0x207   : > { %907 = vrcp.f32 %v308_v22 }
 0x20a   : > { %v484_v29 = vpop.permute.xlu0 %483 }
 0x20b   : > { %v489_v31 = vsel %vm250_vm1, %v484_v29, 0 }
 0x214   : > { %v908_v23 = vpop.eup %907 }
 0x215   : > { %v310_v25 = vmul.f32 %v908_v23, %v906_v17 }
 0x217   : > { %v311_v27 = vpack.c.bf16 %v310_v25, %v310_v25 }
 0x219   : > { %852 = vmatmul.mubr.msk.bf16.vlgmr.msra.gmra.mxu1 %vm299_vm2, %v311_v27 }
 0x21a   : > { %856 = vmatpush3.bf16.xpose.msra.mxu1 %v370_v26  ;;  %857 = vmatprep.mubr.msk.bf16.mxu1 %vm930_vm0, %v929_v0 }
 0x21b   : > { %867 = vmatprep.subr.bf16.mxu1 %v929_v0 }
 0x221   : > { %858 = vmatmul.mubr.msk.bf16.vlgmr.msra.gmra.mxu1 %vm250_vm1, %v362_v28 }
 0x222   : > { %868 = vmatpush3.bf16.xpose.msra.mxu1 %v489_v31  ;;  %869 = vmatprep.mubr.msk.bf16.mxu1 %vm930_vm0, %v929_v0 }
 0x223   : > { %879 = vmatprep.subr.bf16.mxu1 %v929_v0 }
 0x229   : > { %870 = vmatmul.mubr.msk.bf16.vlgmr.msra.gmra.mxu1 %vm250_vm1, %v482_v30 }
 0x22a   : > { %880 = vmatpush3.bf16.xpose.msra.mxu1 %v607_v33  ;;  %881 = vmatprep.mubr.msk.bf16.mxu1 %vm930_vm0, %v929_v0 }
 0x231   : > { %882 = vmatmul.mubr.msk.bf16.vlgmr.msra.gmra.mxu1 %vm250_vm1, %v600_v34 }
 0x2d9   : > { %v353_v35 = vpop.f32.mrf.mxu1 }
 0x2da   : > { %359 = vst.msk [vmem:[%s1033_s9] sm:$0xff] %vm250_vm1, %v353_v35 }
 0x2db   : > { %v853_v36 = vpop.f32.mrf.mxu1 }
 0x2dd   : > { %v356_v37 = vpop.f32.mrf.mxu1 }
 0x2df   : > { %v854_v38 = vpop.f32.mrf.mxu1 }
 0x2e1   : > { %v406_v39 = vpop.f32.mrf.mxu1 }
 0x2e2   : > { %v412_v40 = vmul.f32 0.17677669, %v406_v39 }
 0x2e3   : > { %v859_v41 = vpop.f32.mrf.mxu1 }
 0x2e4   : > { %v413_v42 = vadd.f32 %v412_v40, %v994_v7 }
 0x2e5   : > { %v409_v43 = vpop.f32.mrf.mxu1 }
 0x2e6   : > { %v414_v44 = vsel %vm299_vm2, %v413_v42, -inf }
 0x2e7   : > { %415 = vmax.xlane.f32.xlu1 %v414_v44  ;;  %v860_v45 = vpop.f32.mrf.mxu1 }
 0x2e9   : > { %v525_v46 = vpop.f32.mrf.mxu1 }
 0x2ea   : > { %v531_v47 = vmul.f32 0.17677669, %v525_v46 }
 0x2eb   : > { %v871_v48 = vpop.f32.mrf.mxu1 }
 0x2ec   : > { %v532_v49 = vadd.f32 %v531_v47, %v994_v7 }
 0x2ed   : > { %v528_v50 = vpop.f32.mrf.mxu1 }
 0x2ee   : > { %v533_v51 = vsel %vm299_vm2, %v532_v49, -inf }
 0x2ef   : > { %534 = vmax.xlane.f32.xlu0 %v533_v51  ;;  %v872_v52 = vpop.f32.mrf.mxu1 }
 0x2f1   : > { %v643_v53 = vpop.f32.mrf.mxu1 }
 0x2f2   : > { %v649_v54 = vmul.f32 0.17677669, %v643_v53 }
 0x2f3   : > { %v883_v55 = vpop.f32.mrf.mxu1 }
 0x2f4   : > { %v650_v56 = vadd.f32 %v649_v54, %v994_v7 }
 0x2f5   : > { %v646_v57 = vpop.f32.mrf.mxu1 }
 0x2f6   : > { %v651_v58 = vsel %vm299_vm2, %v650_v56, -inf }
 0x2f7   : > { %652 = vmax.xlane.f32.xlu1 %v651_v58  ;;  %v884_v59 = vpop.f32.mrf.mxu1 }
 0x370   : > { %v416_v60 = vpop.xlane.xlu1 %415 }
 0x371   : > { %v417_v61 = vsub.f32 %v413_v42, %v416_v60 }
 0x373   : > { %v418_v62 = vmul.f32 1.442695, %v417_v61 }
 0x375   : > { %909 = vpow2.f32 %v418_v62 }
 0x378   : > { %v535_v63 = vpop.xlane.xlu0 %534 }
 0x379   : > { %v536_v1 = vsub.f32 %v532_v49, %v535_v63 }
 0x37b   : > { %v537_v2 = vmul.f32 1.442695, %v536_v1 }
 0x37d   : > { %911 = vpow2.f32 %v537_v2 }
 0x380   : > { %v653_v7 = vpop.xlane.xlu1 %652 }
 0x381   : > { %v654_v8 = vsub.f32 %v650_v56, %v653_v7 }
 0x382   : > { %v910_v3 = vpop.eup %909 }
 0x383   : > { %v420_v4 = vsel %vm299_vm2, %v910_v3, 0.0  ;;  %v655_v9 = vmul.f32 1.442695, %v654_v8 }
 0x384   : > { %421 = vadd.xlane.f32.xlu1 %v420_v4 }
 0x385   : > { %913 = vpow2.f32 %v655_v9 }
 0x38a   : > { %v912_v5 = vpop.eup %911 }
 0x38b   : > { %v539_v6 = vsel %vm299_vm2, %v912_v5, 0.0 }
 0x38c   : > { %540 = vadd.xlane.f32.xlu0 %v539_v6 }
 0x392   : > { %v914_v10 = vpop.eup %913 }
 0x393   : > { %v657_v11 = vsel %vm299_vm2, %v914_v10, 0.0 }
 0x395   : > { %545 = vrot.lane.b32.xlu1 %v1008_v20, %s932_s27 }
 0x3a2   : > { %427 = vrot.lane.b32.xlu0 %v1008_v20, %s931_s26 }
 0x3b9   : > { %658 = vadd.xlane.f32.xlu1 %v657_v11 }
 0x3ca   : > { %663 = vrot.lane.b32.xlu1 %v1008_v20, %s933_s28 }
 0x40d   : > { %v422_v12 = vpop.xlane.xlu1 %421 }
 0x40e   : > { %915 = vrcp.f32 %v422_v12 }
 0x411   : > { %v546_v18 = vpop.permute.xlu1 %545 }
 0x412   : > { %v551_v21 = vsel %vm315_vm3, %v546_v18, 0 }
 0x415   : > { %v541_v13 = vpop.xlane.xlu0 %540 }
 0x416   : > { %917 = vrcp.f32 %v541_v13 }
 0x419   : > { %v428_v14 = vpop.permute.xlu0 %427 }
 0x41a   : > { %v433_v15 = vsel %vm315_vm3, %v428_v14, 0 }
 0x41b   : > { %v916_v16 = vpop.eup %915  ;;  %862 = vmatpush3.bf16.msra.mxu0 %v433_v15 }
 0x41c   : > { %873 = vmatprep.subr.bf16.mxu0 %v929_v0  ;;  %v424_v17 = vmul.f32 %v916_v16, %v910_v3 }
 0x41e   : > { %v425_v19 = vpack.c.bf16 %v424_v17, %v424_v17 }
 0x420   : > { %864 = vmatmul.mubr.msk.bf16.vlgmr.msra.gmra.mxu0 %vm299_vm2, %v425_v19 }
 0x421   : > { %874 = vmatpush3.bf16.msra.mxu0 %v551_v21  ;;  %875 = vmatprep.mubr.msk.bf16.mxu0 %vm930_vm0, %v929_v0 }
 0x422   : > { %885 = vmatprep.subr.bf16.mxu0 %v929_v0 }
 0x423   : > { %v918_v20 = vpop.eup %917 }
 0x424   : > { %v543_v22 = vmul.f32 %v918_v20, %v912_v5 }
 0x426   : > { %v544_v23 = vpack.c.bf16 %v543_v22, %v543_v22 }
 0x428   : > { %876 = vmatmul.mubr.msk.bf16.vlgmr.msra.gmra.mxu0 %vm299_vm2, %v544_v23 }
 0x429   : > { %887 = vmatprep.mubr.msk.bf16.mxu0 %vm930_vm0, %v929_v0 }
 0x442   : > { %v659_v24 = vpop.xlane.xlu1 %658 }
 0x443   : > { %919 = vrcp.f32 %v659_v24 }
 0x446   : > { %v664_v25 = vpop.permute.xlu1 %663 }
 0x447   : > { %v669_v26 = vsel %vm315_vm3, %v664_v25, 0 }
 0x448   : > { %886 = vmatpush3.bf16.msra.mxu0 %v669_v26 }
 0x450   : > { %v920_v27 = vpop.eup %919 }
 0x451   : > { %v661_v28 = vmul.f32 %v920_v27, %v914_v10 }
 0x453   : > { %v662_v29 = vpack.c.bf16 %v661_v28, %v661_v28 }
 0x455   : > { %888 = vmatmul.mubr.msk.bf16.vlgmr.msra.gmra.mxu0 %vm299_vm2, %v662_v29 }
 0x4e0   : > { %v469_v30 = vpop.f32.mrf.mxu0 }
 0x4e1   : > { %476 = vrot.lane.b32.xlu0 %v469_v30, %s933_s28 }
 0x4e2   : > { %v865_v31 = vpop.f32.mrf.mxu0 }
 0x4e4   : > { %v472_v32 = vpop.f32.mrf.mxu0 }
 0x4e6   : > { %v866_v33 = vpop.f32.mrf.mxu0 }
 0x4e8   : > { %v587_v0 = vpop.f32.mrf.mxu0 }
 0x4e9   : > { %594 = vrot.lane.b32.xlu1 %v587_v0, %s932_s27 }
 0x4ea   : > { %v877_v34 = vpop.f32.mrf.mxu0 }
 0x4ec   : > { %v590_v35 = vpop.f32.mrf.mxu0 }
 0x4ee   : > { %v878_v36 = vpop.f32.mrf.mxu0 }
 0x515   : > { %v705_v37 = vpop.f32.mrf.mxu0 }
 0x516   : > { %712 = vrot.lane.b32.xlu0 %v705_v37, %s931_s26 }
 0x517   : > { %v889_v38 = vpop.f32.mrf.mxu0 }
 0x519   : > { %v708_v39 = vpop.f32.mrf.mxu0 }
 0x51b   : > { %v890_v40 = vpop.f32.mrf.mxu0 }
 0x553   : > { %v477_v41 = vpop.permute.xlu0 %476 }
 0x554   : > { %480 = vst.msk [vmem:[%s1033_s9] sm:$0xff] %vm479_vm4, %v477_v41 }
 0x55b   : > { %v595_v42 = vpop.permute.xlu1 %594 }
 0x55c   : > { %598 = vst.msk [vmem:[%s1033_s9] sm:$0xff] %vm597_vm5, %v595_v42 }
 0x588   : > { %v713_v43 = vpop.permute.xlu0 %712 }
 0x589   : > { %716 = vst.msk [vmem:[%s1033_s9] sm:$0xff] %vm715_vm6, %v713_v43 }
 0x58a PF: > { %s14_s15 = sadd.s32 1, %s927_s15  }
 0x58b   : > { %p11_p4 = scmp.ge.s32.totalorder %s14_s15, 4  }
 0x58d   :  { %13 = sbr.rel (!%p11_p4) target bundleno = 1 (0x1), region = 72 }

// kernel: run.23
= control target key start
LH: loop header
LB: loop body
LE: loop exit
PB: predicated region body
PF: predicated region fallthrough
CT: control target
= control target key end

     0   :  { %v161_v3 = vmov 0   ;;  %v138_v52 = vlaneseq  ;;  %s299_s1 = inlined_call_operand.vmem [shape: f32[128,256], index: 1, kind: input, shape index: {}]   ;;  %s300_s0 = inlined_call_operand.vmem [shape: f32[16,128], index: 0, kind: input, shape index: {}]   ;;  %s301_s2 = inlined_call_operand.vmem [shape: f32[1,256], index: 2, kind: input, shape index: {}]   ;;  %s302_s3 = inlined_call_operand.vmem [shape: f32[16,256], index: 3, kind: output, shape index: {}]  }
   0x1   :  { %v59_v0 = vld [vmem:[%s299_s1 + $0xe8] sm:$0xff]  ;;  %v61_v1 = vld [vmem:[%s299_s1 + $0xf8] sm:$0xff]  ;;  %v58_v2 = vld [vmem:[%s299_s1 + $0xe0] sm:$0xff]  ;;  %110 = vmatprep.mubr.bf16.mxu0 %v161_v3 }
   0x2   :  { %v77_v4 = vpack.c.bf16 %v61_v1, %v59_v0  ;;  %v60_v5 = vld [vmem:[%s299_s1 + $0xf0] sm:$0xff]  ;;  %v55_v6 = vld [vmem:[%s299_s1 + $0xc8] sm:$0xff]  ;;  %v57_v7 = vld [vmem:[%s299_s1 + $0xd8] sm:$0xff]  ;;  %v139_v53 = vshrl.u32 %v138_v52, 7 }
   0x3   :  { %v76_v8 = vpack.c.bf16 %v60_v5, %v58_v2  ;;  %v75_v9 = vpack.c.bf16 %v57_v7, %v55_v6  ;;  %v54_v10 = vld [vmem:[%s299_s1 + $0xc0] sm:$0xff]  ;;  %v56_v11 = vld [vmem:[%s299_s1 + $0xd0] sm:$0xff]  ;;  %v51_v12 = vld [vmem:[%s299_s1 + $0xa8] sm:$0xff] }
   0x4   :  { %78 = vmatprep.subr.bf16.mxu0 %v77_v4  ;;  %v53_v13 = vld [vmem:[%s299_s1 + $0xb8] sm:$0xff]  ;;  %v74_v14 = vpack.c.bf16 %v56_v11, %v54_v10  ;;  %v50_v16 = vld [vmem:[%s299_s1 + $0xa0] sm:$0xff]  ;;  %v52_v17 = vld [vmem:[%s299_s1 + $0xb0] sm:$0xff]  ;;  %v140_v54 = vsub.s32 0, %v139_v53  ;;  %v144_v56 = vsub.s32 1, %v139_v53 }
   0x5   :  { %79 = vmatpush1.bf16.msra.mxu0 %v76_v8  ;;  %v73_v15 = vpack.c.bf16 %v53_v13, %v51_v12  ;;  %v47_v18 = vld [vmem:[%s299_s1 + $0x88] sm:$0xff]  ;;  %v49_v19 = vld [vmem:[%s299_s1 + $0x98] sm:$0xff]  ;;  %v72_v20 = vpack.c.bf16 %v52_v17, %v50_v16  ;;  %v46_v22 = vld [vmem:[%s299_s1 + $0x80] sm:$0xff] }
   0x6   :  { %80 = vmatprep.subr.bf16.mxu0 %v75_v9  ;;  %v71_v21 = vpack.c.bf16 %v49_v19, %v47_v18  ;;  %v48_v23 = vld [vmem:[%s299_s1 + $0x90] sm:$0xff]  ;;  %v43_v24 = vld [vmem:[%s299_s1 + $0x68] sm:$0xff]  ;;  %v45_v25 = vld [vmem:[%s299_s1 + $0x78] sm:$0xff] }
   0x7   :  { %v70_v26 = vpack.c.bf16 %v48_v23, %v46_v22  ;;  %v69_v27 = vpack.c.bf16 %v45_v25, %v43_v24  ;;  %v42_v28 = vld [vmem:[%s299_s1 + $0x60] sm:$0xff]  ;;  %v44_v29 = vld [vmem:[%s299_s1 + $0x70] sm:$0xff]  ;;  %v39_v30 = vld [vmem:[%s299_s1 + $0x48] sm:$0xff] }
   0x8   :  { %v41_v31 = vld [vmem:[%s299_s1 + $0x58] sm:$0xff]  ;;  %v68_v32 = vpack.c.bf16 %v44_v29, %v42_v28  ;;  %v38_v34 = vld [vmem:[%s299_s1 + $0x40] sm:$0xff]  ;;  %v40_v35 = vld [vmem:[%s299_s1 + $0x50] sm:$0xff] }
   0x9   :  { %81 = vmatpush1.bf16.msra.mxu0 %v74_v14  ;;  %v67_v33 = vpack.c.bf16 %v41_v31, %v39_v30  ;;  %v35_v36 = vld [vmem:[%s299_s1 + $0x28] sm:$0xff]  ;;  %v37_v37 = vld [vmem:[%s299_s1 + $0x38] sm:$0xff]  ;;  %v66_v38 = vpack.c.bf16 %v40_v35, %v38_v34  ;;  %v34_v40 = vld [vmem:[%s299_s1 + $0x20] sm:$0xff] }
   0xa   :  { %82 = vmatprep.subr.bf16.mxu0 %v73_v15  ;;  %v65_v39 = vpack.c.bf16 %v37_v37, %v35_v36  ;;  %v36_v41 = vld [vmem:[%s299_s1 + $0x30] sm:$0xff]  ;;  %v31_v42 = vld [vmem:[%s299_s1 + $0x8] sm:$0xff]  ;;  %v33_v43 = vld [vmem:[%s299_s1 + $0x18] sm:$0xff] }
   0xb   :  { %v64_v44 = vpack.c.bf16 %v36_v41, %v34_v40  ;;  %v63_v45 = vpack.c.bf16 %v33_v43, %v31_v42  ;;  %v30_v46 = vld [vmem:[%s299_s1] sm:$0xff]  ;;  %v32_v47 = vld [vmem:[%s299_s1 + $0x10] sm:$0xff]  ;;  %v28_v50 = vld [vmem:[%s300_s0 + $0x8] sm:$0xff] }
   0xc   :  { %v62_v48 = vpack.c.bf16 %v32_v47, %v30_v46  ;;  %v27_v49 = vld [vmem:[%s300_s0] sm:$0xff] }
   0xd   :  { %83 = vmatpush1.bf16.msra.mxu0 %v72_v20  ;;  %v29_v51 = vpack.c.bf16 %v28_v50, %v27_v49  ;;  %v136_v55 = vld [vmem:[%s301_s2] sm:$0x3] }
   0xe   :  { %84 = vmatprep.subr.bf16.mxu0 %v71_v21  ;;  %v141_v57 = vrot.slane %v136_v55, %v140_v54  ;;  %v145_v58 = vrot.slane %v136_v55, %v144_v56 }
  0x11   :  { %85 = vmatpush1.bf16.msra.mxu0 %v70_v26 }
  0x12   :  { %86 = vmatprep.subr.bf16.mxu0 %v69_v27 }
  0x15   :  { %87 = vmatpush1.bf16.msra.mxu0 %v68_v32 }
  0x16   :  { %88 = vmatprep.subr.bf16.mxu0 %v67_v33 }
  0x19   :  { %89 = vmatpush1.bf16.msra.mxu0 %v66_v38 }
  0x1a   :  { %90 = vmatprep.subr.bf16.mxu0 %v65_v39 }
  0x1d   :  { %91 = vmatpush1.bf16.msra.mxu0 %v64_v44 }
  0x1e   :  { %92 = vmatprep.subr.bf16.mxu0 %v63_v45 }
  0x21   :  { %93 = vmatpush1.bf16.msra.mxu0 %v62_v48 }
  0x24   :  { %111 = vmatmul.mubr.bf16.vlgmr.msra.gmra.mxu0 %v29_v51 }
  0xe4   :  { %v112_v59 = vpop.f32.mrf.mxu0 }
  0xe5   :  { %v148_v60 = vadd.f32 %v141_v57, %v112_v59 }
  0xe6   :  { %v114_v61 = vpop.f32.mrf.mxu0 }
  0xe7   :  { %152 = vst [vmem:[%s302_s3] sm:$0xff] %v148_v60  ;;  %v149_v62 = vadd.f32 %v145_v58, %v114_v61 }
  0xe8   :  { %v116_v63 = vpop.f32.mrf.mxu0 }
  0xe9   :  { %153 = vst [vmem:[%s302_s3 + $0x8] sm:$0xff] %v149_v62  ;;  %v150_v0 = vadd.f32 %v141_v57, %v116_v63 }
  0xea   :  { %v118_v1 = vpop.f32.mrf.mxu0 }
  0xeb   :  { %154 = vst [vmem:[%s302_s3 + $0x10] sm:$0xff] %v150_v0  ;;  %v151_v2 = vadd.f32 %v145_v58, %v118_v1 }
  0xed   :  { %155 = vst [vmem:[%s302_s3 + $0x18] sm:$0xff] %v151_v2 }

// kernel: run.26
= control target key start
LH: loop header
LB: loop body
LE: loop exit
PB: predicated region body
PF: predicated region fallthrough
CT: control target
= control target key end

     0   :  { %v165_v3 = vmov 0   ;;  %v138_v52 = vlaneseq  ;;  %s303_s1 = inlined_call_operand.vmem [shape: f32[128,256], index: 1, kind: input, shape index: {}]   ;;  %s304_s0 = inlined_call_operand.vmem [shape: f32[16,128], index: 0, kind: input, shape index: {}]   ;;  %s305_s2 = inlined_call_operand.vmem [shape: f32[1,256], index: 2, kind: input, shape index: {}]   ;;  %s306_s3 = inlined_call_operand.vmem [shape: f32[16,256], index: 3, kind: output, shape index: {}]  }
   0x1   :  { %v59_v0 = vld [vmem:[%s303_s1 + $0xe8] sm:$0xff]  ;;  %v61_v1 = vld [vmem:[%s303_s1 + $0xf8] sm:$0xff]  ;;  %v58_v2 = vld [vmem:[%s303_s1 + $0xe0] sm:$0xff]  ;;  %110 = vmatprep.mubr.bf16.mxu0 %v165_v3 }
   0x2   :  { %v77_v4 = vpack.c.bf16 %v61_v1, %v59_v0  ;;  %v60_v5 = vld [vmem:[%s303_s1 + $0xf0] sm:$0xff]  ;;  %v55_v6 = vld [vmem:[%s303_s1 + $0xc8] sm:$0xff]  ;;  %v57_v7 = vld [vmem:[%s303_s1 + $0xd8] sm:$0xff]  ;;  %v139_v53 = vshrl.u32 %v138_v52, 7 }
   0x3   :  { %v76_v8 = vpack.c.bf16 %v60_v5, %v58_v2  ;;  %v75_v9 = vpack.c.bf16 %v57_v7, %v55_v6  ;;  %v54_v10 = vld [vmem:[%s303_s1 + $0xc0] sm:$0xff]  ;;  %v56_v11 = vld [vmem:[%s303_s1 + $0xd0] sm:$0xff]  ;;  %v51_v12 = vld [vmem:[%s303_s1 + $0xa8] sm:$0xff] }
   0x4   :  { %78 = vmatprep.subr.bf16.mxu0 %v77_v4  ;;  %v53_v13 = vld [vmem:[%s303_s1 + $0xb8] sm:$0xff]  ;;  %v74_v14 = vpack.c.bf16 %v56_v11, %v54_v10  ;;  %v50_v16 = vld [vmem:[%s303_s1 + $0xa0] sm:$0xff]  ;;  %v52_v17 = vld [vmem:[%s303_s1 + $0xb0] sm:$0xff]  ;;  %v140_v54 = vsub.s32 0, %v139_v53  ;;  %v144_v56 = vsub.s32 1, %v139_v53 }
   0x5   :  { %79 = vmatpush1.bf16.msra.mxu0 %v76_v8  ;;  %v73_v15 = vpack.c.bf16 %v53_v13, %v51_v12  ;;  %v47_v18 = vld [vmem:[%s303_s1 + $0x88] sm:$0xff]  ;;  %v49_v19 = vld [vmem:[%s303_s1 + $0x98] sm:$0xff]  ;;  %v72_v20 = vpack.c.bf16 %v52_v17, %v50_v16  ;;  %v46_v22 = vld [vmem:[%s303_s1 + $0x80] sm:$0xff] }
   0x6   :  { %80 = vmatprep.subr.bf16.mxu0 %v75_v9  ;;  %v71_v21 = vpack.c.bf16 %v49_v19, %v47_v18  ;;  %v48_v23 = vld [vmem:[%s303_s1 + $0x90] sm:$0xff]  ;;  %v43_v24 = vld [vmem:[%s303_s1 + $0x68] sm:$0xff]  ;;  %v45_v25 = vld [vmem:[%s303_s1 + $0x78] sm:$0xff] }
   0x7   :  { %v70_v26 = vpack.c.bf16 %v48_v23, %v46_v22  ;;  %v69_v27 = vpack.c.bf16 %v45_v25, %v43_v24  ;;  %v42_v28 = vld [vmem:[%s303_s1 + $0x60] sm:$0xff]  ;;  %v44_v29 = vld [vmem:[%s303_s1 + $0x70] sm:$0xff]  ;;  %v39_v30 = vld [vmem:[%s303_s1 + $0x48] sm:$0xff] }
   0x8   :  { %v41_v31 = vld [vmem:[%s303_s1 + $0x58] sm:$0xff]  ;;  %v68_v32 = vpack.c.bf16 %v44_v29, %v42_v28  ;;  %v38_v34 = vld [vmem:[%s303_s1 + $0x40] sm:$0xff]  ;;  %v40_v35 = vld [vmem:[%s303_s1 + $0x50] sm:$0xff] }
   0x9   :  { %81 = vmatpush1.bf16.msra.mxu0 %v74_v14  ;;  %v67_v33 = vpack.c.bf16 %v41_v31, %v39_v30  ;;  %v35_v36 = vld [vmem:[%s303_s1 + $0x28] sm:$0xff]  ;;  %v37_v37 = vld [vmem:[%s303_s1 + $0x38] sm:$0xff]  ;;  %v66_v38 = vpack.c.bf16 %v40_v35, %v38_v34  ;;  %v34_v40 = vld [vmem:[%s303_s1 + $0x20] sm:$0xff] }
   0xa   :  { %82 = vmatprep.subr.bf16.mxu0 %v73_v15  ;;  %v65_v39 = vpack.c.bf16 %v37_v37, %v35_v36  ;;  %v36_v41 = vld [vmem:[%s303_s1 + $0x30] sm:$0xff]  ;;  %v31_v42 = vld [vmem:[%s303_s1 + $0x8] sm:$0xff]  ;;  %v33_v43 = vld [vmem:[%s303_s1 + $0x18] sm:$0xff] }
   0xb   :  { %v64_v44 = vpack.c.bf16 %v36_v41, %v34_v40  ;;  %v63_v45 = vpack.c.bf16 %v33_v43, %v31_v42  ;;  %v30_v46 = vld [vmem:[%s303_s1] sm:$0xff]  ;;  %v32_v47 = vld [vmem:[%s303_s1 + $0x10] sm:$0xff]  ;;  %v28_v50 = vld [vmem:[%s304_s0 + $0x8] sm:$0xff] }
   0xc   :  { %v62_v48 = vpack.c.bf16 %v32_v47, %v30_v46  ;;  %v27_v49 = vld [vmem:[%s304_s0] sm:$0xff] }
   0xd   :  { %83 = vmatpush1.bf16.msra.mxu0 %v72_v20  ;;  %v29_v51 = vpack.c.bf16 %v28_v50, %v27_v49  ;;  %v136_v55 = vld [vmem:[%s305_s2] sm:$0x3] }
   0xe   :  { %84 = vmatprep.subr.bf16.mxu0 %v71_v21  ;;  %v141_v57 = vrot.slane %v136_v55, %v140_v54  ;;  %v145_v58 = vrot.slane %v136_v55, %v144_v56 }
  0x11   :  { %85 = vmatpush1.bf16.msra.mxu0 %v70_v26 }
  0x12   :  { %86 = vmatprep.subr.bf16.mxu0 %v69_v27 }
  0x15   :  { %87 = vmatpush1.bf16.msra.mxu0 %v68_v32 }
  0x16   :  { %88 = vmatprep.subr.bf16.mxu0 %v67_v33 }
  0x19   :  { %89 = vmatpush1.bf16.msra.mxu0 %v66_v38 }
  0x1a   :  { %90 = vmatprep.subr.bf16.mxu0 %v65_v39 }
  0x1d   :  { %91 = vmatpush1.bf16.msra.mxu0 %v64_v44 }
  0x1e   :  { %92 = vmatprep.subr.bf16.mxu0 %v63_v45 }
  0x21   :  { %93 = vmatpush1.bf16.msra.mxu0 %v62_v48 }
  0x24   :  { %111 = vmatmul.mubr.bf16.vlgmr.msra.gmra.mxu0 %v29_v51 }
  0xe4   :  { %v112_v59 = vpop.f32.mrf.mxu0 }
  0xe5   :  { %v148_v60 = vadd.f32 %v141_v57, %v112_v59 }
  0xe6   :  { %v114_v61 = vpop.f32.mrf.mxu0 }
  0xe7   :  { %v152_v62 = vmax.f32 %v148_v60, 0.0  ;;  %v149_v63 = vadd.f32 %v145_v58, %v114_v61 }
  0xe8   :  { %v116_v0 = vpop.f32.mrf.mxu0 }
  0xe9   :  { %156 = vst [vmem:[%s306_s3] sm:$0xff] %v152_v62  ;;  %v153_v1 = vmax.f32 %v149_v63, 0.0  ;;  %v150_v2 = vadd.f32 %v141_v57, %v116_v0 }
  0xea   :  { %v118_v3 = vpop.f32.mrf.mxu0 }
  0xeb   :  { %157 = vst [vmem:[%s306_s3 + $0x8] sm:$0xff] %v153_v1  ;;  %v154_v4 = vmax.f32 %v150_v2, 0.0  ;;  %v151_v5 = vadd.f32 %v145_v58, %v118_v3 }
  0xed   :  { %158 = vst [vmem:[%s306_s3 + $0x10] sm:$0xff] %v154_v4  ;;  %v155_v6 = vmax.f32 %v151_v5, 0.0 }
  0xef   :  { %159 = vst [vmem:[%s306_s3 + $0x18] sm:$0xff] %v155_v6 }

// kernel: run.24
= control target key start
LH: loop header
LB: loop body
LE: loop exit
PB: predicated region body
PF: predicated region fallthrough
CT: control target
= control target key end

     0   :  { %s912_s12 = smov 0   ;;  %s1020_s0 = inlined_call_operand.vmem [shape: f32[2,8,128], index: 0, kind: input, shape index: {}]   ;;  %s1021_s1 = inlined_call_operand.vmem [shape: f32[2,8,256], index: 1, kind: input, shape index: {}, may-alias: {1,2}]   ;;  %s1022_s2 = inlined_call_operand.vmem [shape: f32[2,8,256], index: 2, kind: input, shape index: {}, may-alias: {1,2}]   ;;  %s1023_s3 = inlined_call_operand.vmem [shape: f32[2,8,128], index: 3, kind: output, shape index: {}]  }
   0x1 LB: > { %s762_s13 = sadd.s32 4294967295, %s885_s12   ;;  %p766_p0 = scmp.ge.s32.totalorder %s885_s12, 1  ;;  %s885_s12 = sphi %s912_s12, %s13_s12  }
   0x2   : > { %p157_p1 = scmp.lt.s32.totalorder %s885_s12, 3 }
   0x4   : > { %p158_p2 = pnand %p766_p0, %p157_p1 }
   0x5   : > { %p190_p3 = scmp.lt.s32.totalorder (!%p158_p2), %s762_s13, 1  ;;  %s889_s22 = smov (!%p158_p2), 96  }
   0x6   : > { %161 = sbr.rel (%p158_p2) target bundleno = 1413 (0x585), region = 32  ;;  %s890_s23 = smov (!%p158_p2), 64  }
   0x7   : > { %s891_s24 = smov (!%p158_p2), 32  }
   0xb   : > { %v887_v0 = vmov 0.0   ;;  %vm888_vm0 = vmmov 0   ;;  %s1025_s13 = smov (!%p190_p3, %s762_s13), 1  ;;  %vm216_vm1 = vcmask 261120   ;;  %vm264_vm2 = vcmask 64512  }
   0xc   : > { %802 = vmatprep.subr.bf16.mxu0 %v887_v0  ;;  %804 = vmatprep.mubr.msk.bf16.mxu0 %vm888_vm0, %v887_v0  ;;  %s784_s14 = sshll.u32 %s1025_s13, 4  ;;  %s767_s15 = sshll.u32 %s1025_s13, 3  ;;  %vm280_vm3 = vcmask 1043456   ;;  %vm443_vm4 = vcmask 523520   ;;  %vm560_vm5 = vcmask 785920   ;;  %vm677_vm6 = vcmask 1048320  }
   0xd   : > { %808 = vmatprep.subr.bf16.mxu1 %v887_v0  ;;  %810 = vmatprep.mubr.msk.bf16.mxu1 %vm888_vm0, %v887_v0  ;;  %s198_s18 = scalar_lea.vmem %s1021_s1, %s784_s14  ;;  %s193_s21 = scalar_lea.vmem %s1020_s0, %s767_s15 }
   0xe   : > { %v211_v1 = vld [vmem:[%s198_s18] sm:$0xff]  ;;  %s722_s27 = scalar_lea.vmem %s1022_s2, %s784_s14  ;;  %s983_s30 = scalar_lea.vmem %s1023_s3, %s767_s15 }
   0xf   : > { %v214_v2 = vpack.c.bf16 %v211_v1, %v211_v1  ;;  %v210_v4 = vld [vmem:[%s193_s21] sm:$0xff]  ;;  %v773_v17 = vld [vmem:[%s722_s27 + $0x8] sm:$0xff] }
  0x10   : > { %v213_v5 = vpack.c.bf16 %v210_v4, %v210_v4  ;;  %v957_v18 = vpack.c.bf16 %v773_v17, %v773_v17 }
  0x11   : > { %v221_v3 = vsel %vm216_vm1, %v214_v2, 0  ;;  %329 = vrot.lane.b32.xlu1 %v214_v2, %s889_s22 }
  0x12   : > { %803 = vmatpush3.bf16.xpose.msra.mxu0 %v221_v3  ;;  %v282_v19 = vsel %vm280_vm3, %v957_v18, 0 }
  0x13   : > { %820 = vmatprep.subr.bf16.mxu0 %v887_v0  ;;  %809 = vmatpush3.bf16.msra.mxu1 %v282_v19 }
  0x14   : > { %814 = vmatprep.subr.bf16.mxu1 %v887_v0 }
  0x15   : > { %326 = vrot.lane.b32.xlu1 %v213_v5, %s889_s22 }
  0x19   : > { %805 = vmatmul.mubr.msk.bf16.vlgmr.msra.gmra.mxu0 %vm216_vm1, %v213_v5  ;;  %445 = vrot.lane.b32.xlu1 %v213_v5, %s890_s23 }
  0x1a   : > { %822 = vmatprep.mubr.msk.bf16.mxu0 %vm888_vm0, %v887_v0 }
  0x1d   : > { %564 = vrot.lane.b32.xlu1 %v214_v2, %s891_s24 }
  0x21   : > { %562 = vrot.lane.b32.xlu1 %v213_v5, %s891_s24 }
  0x83   : > { %v330_v22 = vpop.permute.xlu1 %329 }
  0x84   : > { %v335_v24 = vsel %vm216_vm1, %v330_v22, 0 }
  0x87   : > { %v327_v26 = vpop.permute.xlu1 %326 }
  0x8b   : > { %v446_v28 = vpop.permute.xlu1 %445 }
  0x8f   : > { %v565_v30 = vpop.permute.xlu1 %564 }
  0x90   : > { %v570_v31 = vsel %vm216_vm1, %v565_v30, 0 }
  0x93   : > { %v563_v32 = vpop.permute.xlu1 %562 }
  0xd9   : > { %v257_v6 = vpop.f32.mrf.mxu0 }
  0xda   : > { %v263_v7 = vmul.f32 0.17677669, %v257_v6 }
  0xdb   : > { %v806_v8 = vpop.f32.mrf.mxu0 }
  0xdc   : > { %v265_v9 = vsel %vm264_vm2, %v263_v7, -inf }
  0xdd   : > { %266 = vmax.xlane.f32.xlu0 %v265_v9  ;;  %v260_v10 = vpop.f32.mrf.mxu0 }
  0xdf   : > { %v807_v11 = vpop.f32.mrf.mxu0 }
 0x166   : > { %v267_v12 = vpop.xlane.xlu0 %266 }
 0x167   : > { %v268_v13 = vsub.f32 %v263_v7, %v267_v12 }
 0x169   : > { %v269_v14 = vmul.f32 1.442695, %v268_v13 }
 0x16b   : > { %863 = vpow2.f32 %v269_v14 }
 0x178   : > { %v864_v15 = vpop.eup %863 }
 0x179   : > { %v271_v16 = vsel %vm264_vm2, %v864_v15, 0.0 }
 0x17a   : > { %272 = vadd.xlane.f32.xlu0 %v271_v16 }
 0x190   : > { %447 = vrot.lane.b32.xlu0 %v214_v2, %s890_s23 }
 0x203   : > { %v273_v20 = vpop.xlane.xlu0 %272 }
 0x204   : > { %865 = vrcp.f32 %v273_v20 }
 0x207   : > { %v448_v27 = vpop.permute.xlu0 %447 }
 0x208   : > { %v453_v29 = vsel %vm216_vm1, %v448_v27, 0 }
 0x211   : > { %v866_v21 = vpop.eup %865 }
 0x212   : > { %v275_v23 = vmul.f32 %v866_v21, %v864_v15 }
 0x214   : > { %v276_v25 = vpack.c.bf16 %v275_v23, %v275_v23 }
 0x216   : > { %811 = vmatmul.mubr.msk.bf16.vlgmr.msra.gmra.mxu1 %vm264_vm2, %v276_v25 }
 0x217   : > { %815 = vmatpush3.bf16.xpose.msra.mxu1 %v335_v24  ;;  %816 = vmatprep.mubr.msk.bf16.mxu1 %vm888_vm0, %v887_v0 }
 0x218   : > { %826 = vmatprep.subr.bf16.mxu1 %v887_v0 }
 0x21e   : > { %817 = vmatmul.mubr.msk.bf16.vlgmr.msra.gmra.mxu1 %vm216_vm1, %v327_v26 }
 0x21f   : > { %827 = vmatpush3.bf16.xpose.msra.mxu1 %v453_v29  ;;  %828 = vmatprep.mubr.msk.bf16.mxu1 %vm888_vm0, %v887_v0 }
 0x220   : > { %838 = vmatprep.subr.bf16.mxu1 %v887_v0 }
 0x226   : > { %829 = vmatmul.mubr.msk.bf16.vlgmr.msra.gmra.mxu1 %vm216_vm1, %v446_v28 }
 0x227   : > { %839 = vmatpush3.bf16.xpose.msra.mxu1 %v570_v31  ;;  %840 = vmatprep.mubr.msk.bf16.mxu1 %vm888_vm0, %v887_v0 }
 0x22e   : > { %841 = vmatmul.mubr.msk.bf16.vlgmr.msra.gmra.mxu1 %vm216_vm1, %v563_v32 }
 0x2d6   : > { %v318_v33 = vpop.f32.mrf.mxu1 }
 0x2d7   : > { %324 = vst.msk [vmem:[%s983_s30] sm:$0xff] %vm216_vm1, %v318_v33 }
 0x2d8   : > { %v812_v34 = vpop.f32.mrf.mxu1 }
 0x2da   : > { %v321_v35 = vpop.f32.mrf.mxu1 }
 0x2dc   : > { %v813_v36 = vpop.f32.mrf.mxu1 }
 0x2de   : > { %v371_v37 = vpop.f32.mrf.mxu1 }
 0x2df   : > { %v377_v38 = vmul.f32 0.17677669, %v371_v37 }
 0x2e0   : > { %v818_v39 = vpop.f32.mrf.mxu1 }
 0x2e1   : > { %v378_v40 = vsel %vm264_vm2, %v377_v38, -inf }
 0x2e2   : > { %379 = vmax.xlane.f32.xlu1 %v378_v40  ;;  %v374_v41 = vpop.f32.mrf.mxu1 }
 0x2e4   : > { %v819_v42 = vpop.f32.mrf.mxu1 }
 0x2e6   : > { %v489_v43 = vpop.f32.mrf.mxu1 }
 0x2e7   : > { %v495_v44 = vmul.f32 0.17677669, %v489_v43 }
 0x2e8   : > { %v830_v45 = vpop.f32.mrf.mxu1 }
 0x2e9   : > { %v496_v46 = vsel %vm264_vm2, %v495_v44, -inf }
 0x2ea   : > { %497 = vmax.xlane.f32.xlu0 %v496_v46  ;;  %v492_v47 = vpop.f32.mrf.mxu1 }
 0x2ec   : > { %v831_v48 = vpop.f32.mrf.mxu1 }
 0x2ee   : > { %v606_v49 = vpop.f32.mrf.mxu1 }
 0x2ef   : > { %v612_v50 = vmul.f32 0.17677669, %v606_v49 }
 0x2f0   : > { %v842_v51 = vpop.f32.mrf.mxu1 }
 0x2f1   : > { %v613_v52 = vsel %vm264_vm2, %v612_v50, -inf }
 0x2f2   : > { %614 = vmax.xlane.f32.xlu1 %v613_v52  ;;  %v609_v53 = vpop.f32.mrf.mxu1 }
 0x2f4   : > { %v843_v54 = vpop.f32.mrf.mxu1 }
 0x36b   : > { %v380_v55 = vpop.xlane.xlu1 %379 }
 0x36c   : > { %v381_v56 = vsub.f32 %v377_v38, %v380_v55 }
 0x36e   : > { %v382_v57 = vmul.f32 1.442695, %v381_v56 }
 0x370   : > { %867 = vpow2.f32 %v382_v57 }
 0x373   : > { %v498_v58 = vpop.xlane.xlu0 %497 }
 0x374   : > { %v499_v59 = vsub.f32 %v495_v44, %v498_v58 }
 0x376   : > { %v500_v60 = vmul.f32 1.442695, %v499_v59 }
 0x378   : > { %869 = vpow2.f32 %v500_v60 }
 0x37b   : > { %v615_v2 = vpop.xlane.xlu1 %614 }
 0x37c   : > { %v616_v3 = vsub.f32 %v612_v50, %v615_v2 }
 0x37d   : > { %v868_v61 = vpop.eup %867 }
 0x37e   : > { %v384_v62 = vsel %vm264_vm2, %v868_v61, 0.0  ;;  %v617_v4 = vmul.f32 1.442695, %v616_v3 }
 0x37f   : > { %385 = vadd.xlane.f32.xlu1 %v384_v62 }
 0x380   : > { %871 = vpow2.f32 %v617_v4 }
 0x385   : > { %v870_v63 = vpop.eup %869 }
 0x386   : > { %v502_v1 = vsel %vm264_vm2, %v870_v63, 0.0 }
 0x387   : > { %503 = vadd.xlane.f32.xlu0 %v502_v1 }
 0x38d   : > { %v872_v5 = vpop.eup %871 }
 0x38e   : > { %v619_v6 = vsel %vm264_vm2, %v872_v5, 0.0 }
 0x390   : > { %508 = vrot.lane.b32.xlu1 %v957_v18, %s890_s23 }
 0x39d   : > { %391 = vrot.lane.b32.xlu0 %v957_v18, %s889_s22 }
 0x3b4   : > { %620 = vadd.xlane.f32.xlu1 %v619_v6 }
 0x3c5   : > { %625 = vrot.lane.b32.xlu1 %v957_v18, %s891_s24 }
 0x408   : > { %v386_v7 = vpop.xlane.xlu1 %385 }
 0x409   : > { %873 = vrcp.f32 %v386_v7 }
 0x40c   : > { %v509_v13 = vpop.permute.xlu1 %508 }
 0x40d   : > { %v514_v15 = vsel %vm280_vm3, %v509_v13, 0 }
 0x410   : > { %v504_v8 = vpop.xlane.xlu0 %503 }
 0x411   : > { %875 = vrcp.f32 %v504_v8 }
 0x414   : > { %v392_v9 = vpop.permute.xlu0 %391 }
 0x415   : > { %v397_v10 = vsel %vm280_vm3, %v392_v9, 0 }
 0x416   : > { %v874_v11 = vpop.eup %873  ;;  %821 = vmatpush3.bf16.msra.mxu0 %v397_v10 }
 0x417   : > { %832 = vmatprep.subr.bf16.mxu0 %v887_v0  ;;  %v388_v12 = vmul.f32 %v874_v11, %v868_v61 }
 0x419   : > { %v389_v14 = vpack.c.bf16 %v388_v12, %v388_v12 }
 0x41b   : > { %823 = vmatmul.mubr.msk.bf16.vlgmr.msra.gmra.mxu0 %vm264_vm2, %v389_v14 }
 0x41c   : > { %833 = vmatpush3.bf16.msra.mxu0 %v514_v15  ;;  %834 = vmatprep.mubr.msk.bf16.mxu0 %vm888_vm0, %v887_v0 }
 0x41d   : > { %844 = vmatprep.subr.bf16.mxu0 %v887_v0 }
 0x41e   : > { %v876_v16 = vpop.eup %875 }
 0x41f   : > { %v506_v17 = vmul.f32 %v876_v16, %v870_v63 }
 0x421   : > { %v507_v18 = vpack.c.bf16 %v506_v17, %v506_v17 }
 0x423   : > { %835 = vmatmul.mubr.msk.bf16.vlgmr.msra.gmra.mxu0 %vm264_vm2, %v507_v18 }
 0x424   : > { %846 = vmatprep.mubr.msk.bf16.mxu0 %vm888_vm0, %v887_v0 }
 0x43d   : > { %v621_v19 = vpop.xlane.xlu1 %620 }
 0x43e   : > { %877 = vrcp.f32 %v621_v19 }
 0x441   : > { %v626_v20 = vpop.permute.xlu1 %625 }
 0x442   : > { %v631_v21 = vsel %vm280_vm3, %v626_v20, 0 }
 0x443   : > { %845 = vmatpush3.bf16.msra.mxu0 %v631_v21 }
 0x44b   : > { %v878_v22 = vpop.eup %877 }
 0x44c   : > { %v623_v23 = vmul.f32 %v878_v22, %v872_v5 }
 0x44e   : > { %v624_v24 = vpack.c.bf16 %v623_v23, %v623_v23 }
 0x450   : > { %847 = vmatmul.mubr.msk.bf16.vlgmr.msra.gmra.mxu0 %vm264_vm2, %v624_v24 }
 0x4db   : > { %v433_v25 = vpop.f32.mrf.mxu0 }
 0x4dc   : > { %440 = vrot.lane.b32.xlu0 %v433_v25, %s891_s24 }
 0x4dd   : > { %v824_v26 = vpop.f32.mrf.mxu0 }
 0x4df   : > { %v436_v27 = vpop.f32.mrf.mxu0 }
 0x4e1   : > { %v825_v28 = vpop.f32.mrf.mxu0 }
 0x4e3   : > { %v550_v0 = vpop.f32.mrf.mxu0 }
 0x4e4   : > { %557 = vrot.lane.b32.xlu1 %v550_v0, %s890_s23 }
 0x4e5   : > { %v836_v29 = vpop.f32.mrf.mxu0 }
 0x4e7   : > { %v553_v30 = vpop.f32.mrf.mxu0 }
 0x4e9   : > { %v837_v31 = vpop.f32.mrf.mxu0 }
 0x510   : > { %v667_v32 = vpop.f32.mrf.mxu0 }
 0x511   : > { %674 = vrot.lane.b32.xlu0 %v667_v32, %s889_s22 }
 0x512   : > { %v848_v33 = vpop.f32.mrf.mxu0 }
 0x514   : > { %v670_v34 = vpop.f32.mrf.mxu0 }
 0x516   : > { %v849_v35 = vpop.f32.mrf.mxu0 }
 0x54e   : > { %v441_v36 = vpop.permute.xlu0 %440 }
 0x54f   : > { %444 = vst.msk [vmem:[%s983_s30] sm:$0xff] %vm443_vm4, %v441_v36 }
 0x556   : > { %v558_v37 = vpop.permute.xlu1 %557 }
 0x557   : > { %561 = vst.msk [vmem:[%s983_s30] sm:$0xff] %vm560_vm5, %v558_v37 }
 0x583   : > { %v675_v38 = vpop.permute.xlu0 %674 }
 0x584   : > { %678 = vst.msk [vmem:[%s983_s30] sm:$0xff] %vm677_vm6, %v675_v38 }
 0x585 PF: > { %s13_s12 = sadd.s32 1, %s885_s12  }
 0x586   : > { %p10_p4 = scmp.ge.s32.totalorder %s13_s12, 4  }
 0x588   :  { %12 = sbr.rel (!%p10_p4) target bundleno = 1 (0x1), region = 68 }

// kernel: run.28
= control target key start
LH: loop header
LB: loop body
LE: loop exit
PB: predicated region body
PF: predicated region fallthrough
CT: control target
= control target key end

     0   :  { %s728_s12 = smov 0   ;;  %s730_s13 = smov 0   ;;  %s851_s0 = inlined_call_operand.vmem [shape: f32[16,128], index: 0, kind: input, shape index: {}]   ;;  %s852_s1 = inlined_call_operand.vmem [shape: f32[128,384], index: 1, kind: input, shape index: {}]   ;;  %s853_s2 = inlined_call_operand.vmem [shape: f32[1,384], index: 2, kind: input, shape index: {}]   ;;  %s854_s3 = inlined_call_operand.vmem [shape: f32[16,384], index: 3, kind: output, shape index: {}]  }
   0x1   :  { %s732_s14 = smov 0   ;;  %s734_s15 = smov 0  }
   0x2   :  { %s736_s16 = smov 0  }
   0x3 LB: > { %s28_s17 = sadd.s32 1, %s700_s15  ;;  %s580_s18 = sadd.s32 4294967295, %s704_s16   ;;  %s704_s16 = sphi %s736_s16, %s13_s16   ;;  %s700_s15 = sphi %s734_s15, %s859_s15   ;;  %s696_s14 = sphi %s732_s14, %s858_s14   ;;  %s692_s13 = sphi %s730_s13, %s857_s13   ;;  %s688_s12 = sphi %s728_s12, %s856_s12  }
   0x4   : > { %p30_p0 = scmp.ge.s32.totalorder %s28_s17, 3  ;;  %p76_p1 = scmp.ne.s32.totalorder %s692_s13, %s688_s12 }
   0x5   : > { %p77_p2 = scmp.eq.s32.totalorder %s704_s16, 0  ;;  %p134_p4 = scmp.eq.s32.totalorder %s580_s18, 2 }
   0x6   : > { %s861_s17 = smov (%p30_p0, %s28_s17), 0  ;;  %s69_s20 = sadd.s32 1, %s692_s13 }
   0x7   : > { %p78_p3 = por %p77_p2, %p76_p1  ;;  %s65_s19 = ssub.s32 %s700_s15, %s861_s17 }
   0x8   : > { %p67_p5 = scmp.eq.s32.totalorder %s65_s19, 0  ;;  %p763_p6 = por %p134_p4, %p76_p1 }
   0x9   : > { %p584_p7 = scmp.ge.s32.totalorder %s704_s16, 3 }
   0xa   : > { %s768_s22 = scalar_select %p67_p5, %s692_s13, %s69_s20  }
   0xb   : > { %168 = sbr.rel (%p584_p7) target bundleno = 28 (0x1c), region = 20 }
  0x10   : > { %171 = sbr.rel (!%p78_p3) target bundleno = 28 (0x1c), region = 24  ;;  %s173_s23 = sand.u32 (%p78_p3), 1, %s692_s13  }
  0x11   : > { %s586_s24 = sshll.u32 (%p78_p3), %s700_s15, 3  ;;  %s585_s25 = sshll.u32 (%p78_p3), %s173_s23, 7 }
  0x12   : > { %s776_s28 = scalar_lea.vmem (%p78_p3), %s852_s1, %s586_s24  ;;  %s175_s29 = scalar_lea.vmem (%p78_p3), [#allocation3], %s585_s25 }
  0x13   : > { %v239_v0 = vld [vmem:[%s776_s28] sm:$0xff] (%p78_p3)  ;;  %v241_v1 = vld [vmem:[%s776_s28 + $0x18] sm:$0xff] (%p78_p3)  ;;  %v243_v2 = vld [vmem:[%s776_s28 + $0x30] sm:$0xff] (%p78_p3) }
  0x14   : > { %240 = vst [vmem:[%s175_s29] sm:$0xff] (%p78_p3), %v239_v0  ;;  %242 = vst [vmem:[%s175_s29 + $0x8] sm:$0xff] (%p78_p3), %v241_v1  ;;  %v245_v3 = vld [vmem:[%s776_s28 + $0x48] sm:$0xff] (%p78_p3)  ;;  %v247_v4 = vld [vmem:[%s776_s28 + $0x60] sm:$0xff] (%p78_p3) }
  0x15   : > { %244 = vst [vmem:[%s175_s29 + $0x10] sm:$0xff] %v243_v2  ;;  %v249_v5 = vld [vmem:[%s776_s28 + $0x78] sm:$0xff]  ;;  %246 = vst [vmem:[%s175_s29 + $0x18] sm:$0xff] %v245_v3  ;;  %v251_v6 = vld [vmem:[%s776_s28 + $0x90] sm:$0xff] }
  0x16   : > { %248 = vst [vmem:[%s175_s29 + $0x20] sm:$0xff] %v247_v4  ;;  %250 = vst [vmem:[%s175_s29 + $0x28] sm:$0xff] %v249_v5  ;;  %v253_v7 = vld [vmem:[%s776_s28 + $0xa8] sm:$0xff]  ;;  %v255_v8 = vld [vmem:[%s776_s28 + $0xc0] sm:$0xff] }
  0x17   : > { %252 = vst [vmem:[%s175_s29 + $0x30] sm:$0xff] %v251_v6  ;;  %254 = vst [vmem:[%s175_s29 + $0x38] sm:$0xff] %v253_v7  ;;  %v257_v9 = vld [vmem:[%s776_s28 + $0xd8] sm:$0xff]  ;;  %v259_v10 = vld [vmem:[%s776_s28 + $0xf0] sm:$0xff] }
  0x18   : > { %256 = vst [vmem:[%s175_s29 + $0x40] sm:$0xff] %v255_v8  ;;  %v261_v11 = vld [vmem:[%s776_s28 + $0x108] sm:$0xff]  ;;  %258 = vst [vmem:[%s175_s29 + $0x48] sm:$0xff] %v257_v9  ;;  %v263_v12 = vld [vmem:[%s776_s28 + $0x120] sm:$0xff] }
  0x19   : > { %260 = vst [vmem:[%s175_s29 + $0x50] sm:$0xff] %v259_v10  ;;  %262 = vst [vmem:[%s175_s29 + $0x58] sm:$0xff] %v261_v11  ;;  %v265_v13 = vld [vmem:[%s776_s28 + $0x138] sm:$0xff]  ;;  %v267_v14 = vld [vmem:[%s776_s28 + $0x150] sm:$0xff] }
  0x1a   : > { %264 = vst [vmem:[%s175_s29 + $0x60] sm:$0xff] %v263_v12  ;;  %266 = vst [vmem:[%s175_s29 + $0x68] sm:$0xff] %v265_v13  ;;  %v269_v15 = vld [vmem:[%s776_s28 + $0x168] sm:$0xff] }
  0x1b   : > { %268 = vst [vmem:[%s175_s29 + $0x70] sm:$0xff] %v267_v14  ;;  %270 = vst [vmem:[%s175_s29 + $0x78] sm:$0xff] %v269_v15 }
  0x1c PF: > { %p587_p8 = scmp.ge.s32.totalorder %s704_s16, 1  ;;  %p281_p9 = scmp.lt.s32.totalorder %s704_s16, 4 }
  0x1e   : > { %p282_p10 = pnand %p587_p8, %p281_p9 }
  0x1f   : > { %s288_s30 = sand.u32 (!%p282_p10), 1, %s688_s12   ;;  %p331_p11 = scmp.lt.s32.totalorder (!%p282_p10), %s696_s14, 2 }
  0x20   : > { %285 = sbr.rel (%p282_p10) target bundleno = 279 (0x117), region = 66  ;;  %s588_s4 = sshll.u32 (!%p282_p10), %s288_s30, 7 }
  0x21   : > { %s799_s5 = scalar_lea.vmem (!%p282_p10), [#allocation3], %s588_s4  ;;  %s589_s20 = sshll.u32 (!%p282_p10), %s288_s30, 4 }
  0x22   : > { %s320_s23 = scalar_lea.vmem (!%p282_p10), [#allocation4], %s589_s20 }
  0x25   : > { %v706_v16 = vmov 0.0   ;;  %vm707_vm0 = vmmov 0   ;;  %v361_v17 = vld [vmem:[%s799_s5 + $0x70] sm:$0xff]  ;;  %v362_v18 = vld [vmem:[%s799_s5 + $0x78] sm:$0xff]  ;;  %v359_v19 = vld [vmem:[%s799_s5 + $0x60] sm:$0xff]  ;;  %s332_s10 = scalar_select %p331_p11, %s696_s14, 2 }
  0x26   : > { %604 = vmatprep.subr.bf16.mxu0 %v706_v16  ;;  %620 = vmatprep.mubr.msk.bf16.mxu0 %vm707_vm0, %v706_v16  ;;  %v370_v20 = vpack.c.bf16 %v362_v18, %v361_v17  ;;  %v360_v21 = vld [vmem:[%s799_s5 + $0x68] sm:$0xff]  ;;  %v357_v23 = vld [vmem:[%s799_s5 + $0x50] sm:$0xff]  ;;  %v358_v24 = vld [vmem:[%s799_s5 + $0x58] sm:$0xff]  ;;  %s592_s24 = sshll.u32 (%p763_p6), %s696_s14, 3 }
  0x27   : > { %v369_v22 = vpack.c.bf16 %v360_v21, %v359_v19  ;;  %v368_v25 = vpack.c.bf16 %v358_v24, %v357_v23  ;;  %v355_v26 = vld [vmem:[%s799_s5 + $0x40] sm:$0xff]  ;;  %v356_v27 = vld [vmem:[%s799_s5 + $0x48] sm:$0xff]  ;;  %v353_v29 = vld [vmem:[%s799_s5 + $0x30] sm:$0xff]  ;;  %s333_s19 = scalar_lea.vmem %s853_s2, %s332_s10  ;;  %s443_s26 = scalar_lea.vmem (%p763_p6), %s854_s3, %s592_s24 }
  0x28   : > { %605 = vmatpush3.bf16.msra.mxu0 %v370_v20  ;;  %v367_v28 = vpack.c.bf16 %v356_v27, %v355_v26  ;;  %v354_v30 = vld [vmem:[%s799_s5 + $0x38] sm:$0xff]  ;;  %v351_v32 = vld [vmem:[%s799_s5 + $0x20] sm:$0xff]  ;;  %v352_v33 = vld [vmem:[%s799_s5 + $0x28] sm:$0xff] }
  0x29   : > { %606 = vmatprep.subr.bf16.mxu0 %v706_v16  ;;  %v366_v31 = vpack.c.bf16 %v354_v30, %v353_v29  ;;  %v365_v34 = vpack.c.bf16 %v352_v33, %v351_v32  ;;  %v349_v35 = vld [vmem:[%s799_s5 + $0x10] sm:$0xff]  ;;  %v350_v36 = vld [vmem:[%s799_s5 + $0x18] sm:$0xff]  ;;  %v347_v38 = vld [vmem:[%s799_s5] sm:$0xff] }
  0x2a   : > { %v364_v37 = vpack.c.bf16 %v350_v36, %v349_v35  ;;  %v348_v39 = vld [vmem:[%s799_s5 + $0x8] sm:$0xff]  ;;  %v344_v41 = vld [vmem:[%s851_s0] sm:$0xff] }
  0x2b   : > { %v363_v40 = vpack.c.bf16 %v348_v39, %v347_v38  ;;  %v345_v42 = vld [vmem:[%s851_s0 + $0x8] sm:$0xff]  ;;  %v590_v44 = vld [vmem:[%s333_s19] ss:$0 sm:$0xff] }
  0x2c   : > { %607 = vmatpush3.bf16.msra.mxu0 %v369_v22  ;;  %v346_v43 = vpack.c.bf16 %v345_v42, %v344_v41 }
  0x2d   : > { %608 = vmatprep.subr.bf16.mxu0 %v706_v16 }
  0x30   : > { %609 = vmatpush3.bf16.msra.mxu0 %v368_v25 }
  0x31   : > { %610 = vmatprep.subr.bf16.mxu0 %v706_v16 }
  0x34   : > { %611 = vmatpush3.bf16.msra.mxu0 %v367_v28 }
  0x35   : > { %612 = vmatprep.subr.bf16.mxu0 %v706_v16 }
  0x38   : > { %613 = vmatpush3.bf16.msra.mxu0 %v366_v31 }
  0x39   : > { %614 = vmatprep.subr.bf16.mxu0 %v706_v16 }
  0x3c   : > { %615 = vmatpush3.bf16.msra.mxu0 %v365_v34 }
  0x3d   : > { %616 = vmatprep.subr.bf16.mxu0 %v706_v16 }
  0x40   : > { %617 = vmatpush3.bf16.msra.mxu0 %v364_v37 }
  0x41   : > { %618 = vmatprep.subr.bf16.mxu0 %v706_v16 }
  0x44   : > { %619 = vmatpush3.bf16.msra.mxu0 %v363_v40 }
  0x47   : > { %621 = vmatmul.mubr.bf16.vlgmr.msra.gmra.mxu0 %v346_v43 }
 0x107   : > { %v405_v45 = vpop.f32.mrf.mxu0 }
 0x108   : > { %v428_v46 = vadd.f32 %v590_v44, %v405_v45 }
 0x109   : > { %v622_v47 = vpop.f32.mrf.mxu0 }
 0x10a   : > { %430 = vst [vmem:[%s320_s23] sm:$0xff] %v428_v46  ;;  %438 = sbr.rel (!%p763_p6) target bundleno = 279 (0x117), region = 82 }
 0x10b   : > { %v408_v48 = vpop.f32.mrf.mxu0 }
 0x10c   : > { %v429_v49 = vadd.f32 %v590_v44, %v408_v48 }
 0x10d   : > { %v623_v50 = vpop.f32.mrf.mxu0 }
 0x10e   : > { %431 = vst [vmem:[%s320_s23 + $0x8] sm:$0xff] %v429_v49 }
 0x111   : > { %v474_v51 = vld [vmem:[%s320_s23] sm:$0xff] }
 0x112   : > { %475 = vst [vmem:[%s443_s26] sm:$0xff] %v474_v51 }
 0x115   : > { %v476_v52 = vld [vmem:[%s320_s23 + $0x8] sm:$0xff] }
 0x116   : > { %477 = vst [vmem:[%s443_s26 + $0x18] sm:$0xff] %v476_v52 }
 0x117 PF: > { %s13_s16 = sadd.s32 1, %s704_s16   ;;  %s856_s12 = smov %s692_s13 }
 0x118   : > { %p10_p12 = scmp.ge.s32.totalorder %s13_s16, 5   ;;  %s857_s13 = smov %s768_s22 }
 0x119   : > { %s858_s14 = smov %s700_s15  ;;  %s859_s15 = smov %s861_s17 }
 0x11a   :  { %12 = sbr.rel (!%p10_p12) target bundleno = 3 (0x3), region = 157 }

// kernel: run.27
= control target key start
LH: loop header
LB: loop body
LE: loop exit
PB: predicated region body
PF: predicated region fallthrough
CT: control target
= control target key end

     0   :  { %s389_s1 = inlined_call_operand.vmem [shape: f32[256,128], index: 1, kind: input, shape index: {}]   ;;  %s390_s0 = inlined_call_operand.vmem [shape: f32[16,256], index: 0, kind: input, shape index: {}]   ;;  %s391_s2 = inlined_call_operand.vmem [shape: f32[1,128], index: 2, kind: input, shape index: {}]   ;;  %s392_s3 = inlined_call_operand.vmem [shape: f32[16,128], index: 3, kind: input, shape index: {}]   ;;  %s393_s4 = inlined_call_operand.vmem [shape: f32[1,128], index: 4, kind: input, shape index: {}]   ;;  %s394_s5 = inlined_call_operand.vmem [shape: f32[1,128], index: 5, kind: input, shape index: {}]   ;;  %s395_s6 = inlined_call_operand.vmem [shape: f32[16,128], index: 6, kind: output, shape index: {}]  }
   0x1   :  { %v68_v0 = vld [vmem:[%s389_s1 + $0xf0] sm:$0xff]  ;;  %v69_v1 = vld [vmem:[%s389_s1 + $0xf8] sm:$0xff]  ;;  %v66_v5 = vld [vmem:[%s389_s1 + $0xe0] sm:$0xff] }
   0x2   :  { %v52_v2 = vld [vmem:[%s389_s1 + $0x70] sm:$0xff]  ;;  %v85_v3 = vpack.c.bf16 %v69_v1, %v68_v0  ;;  %v53_v4 = vld [vmem:[%s389_s1 + $0x78] sm:$0xff]  ;;  %v67_v6 = vld [vmem:[%s389_s1 + $0xe8] sm:$0xff] }
   0x3   :  { %v77_v7 = vpack.c.bf16 %v53_v4, %v52_v2  ;;  %v84_v8 = vpack.c.bf16 %v67_v6, %v66_v5  ;;  %v50_v9 = vld [vmem:[%s389_s1 + $0x60] sm:$0xff]  ;;  %v51_v10 = vld [vmem:[%s389_s1 + $0x68] sm:$0xff]  ;;  %v64_v11 = vld [vmem:[%s389_s1 + $0xd0] sm:$0xff] }
   0x4   :  { %199 = vmatprep.subr.bf16.mxu0 %v85_v3  ;;  %v65_v12 = vld [vmem:[%s389_s1 + $0xd8] sm:$0xff]  ;;  %v76_v13 = vpack.c.bf16 %v51_v10, %v50_v9  ;;  %v48_v15 = vld [vmem:[%s389_s1 + $0x50] sm:$0xff]  ;;  %v62_v17 = vld [vmem:[%s389_s1 + $0xc0] sm:$0xff] }
   0x5   :  { %200 = vmatpush3.bf16.msra.mxu0 %v77_v7  ;;  %v83_v14 = vpack.c.bf16 %v65_v12, %v64_v11  ;;  %v49_v16 = vld [vmem:[%s389_s1 + $0x58] sm:$0xff]  ;;  %v63_v18 = vld [vmem:[%s389_s1 + $0xc8] sm:$0xff]  ;;  %v46_v21 = vld [vmem:[%s389_s1 + $0x40] sm:$0xff] }
   0x6   :  { %201 = vmatprep.subr.bf16.mxu0 %v84_v8  ;;  %v75_v19 = vpack.c.bf16 %v49_v16, %v48_v15  ;;  %v82_v20 = vpack.c.bf16 %v63_v18, %v62_v17  ;;  %v47_v22 = vld [vmem:[%s389_s1 + $0x48] sm:$0xff]  ;;  %v60_v23 = vld [vmem:[%s389_s1 + $0xb0] sm:$0xff]  ;;  %v61_v24 = vld [vmem:[%s389_s1 + $0xb8] sm:$0xff] }
   0x7   :  { %v33_v25 = vld [vmem:[%s390_s0 + $0x8] sm:$0xff]  ;;  %v35_v26 = vld [vmem:[%s390_s0 + $0x18] sm:$0xff]  ;;  %v74_v27 = vpack.c.bf16 %v47_v22, %v46_v21  ;;  %v81_v29 = vpack.c.bf16 %v61_v24, %v60_v23  ;;  %v44_v30 = vld [vmem:[%s389_s1 + $0x30] sm:$0xff] }
   0x8   :  { %v37_v28 = vpack.c.bf16 %v35_v26, %v33_v25  ;;  %v45_v31 = vld [vmem:[%s389_s1 + $0x38] sm:$0xff]  ;;  %v58_v32 = vld [vmem:[%s389_s1 + $0xa0] sm:$0xff]  ;;  %v59_v33 = vld [vmem:[%s389_s1 + $0xa8] sm:$0xff] }
   0x9   :  { %202 = vmatpush3.bf16.msra.mxu0 %v76_v13  ;;  %v73_v34 = vpack.c.bf16 %v45_v31, %v44_v30  ;;  %v80_v35 = vpack.c.bf16 %v59_v33, %v58_v32  ;;  %v42_v36 = vld [vmem:[%s389_s1 + $0x20] sm:$0xff]  ;;  %v43_v37 = vld [vmem:[%s389_s1 + $0x28] sm:$0xff]  ;;  %v56_v38 = vld [vmem:[%s389_s1 + $0x90] sm:$0xff] }
   0xa   :  { %203 = vmatprep.subr.bf16.mxu0 %v83_v14  ;;  %118 = vmatprep.mubr.bf16.mxu0 %v37_v28  ;;  %v57_v39 = vld [vmem:[%s389_s1 + $0x98] sm:$0xff]  ;;  %v72_v40 = vpack.c.bf16 %v43_v37, %v42_v36  ;;  %v40_v42 = vld [vmem:[%s389_s1 + $0x10] sm:$0xff]  ;;  %v54_v44 = vld [vmem:[%s389_s1 + $0x80] sm:$0xff] }
   0xb   :  { %v79_v41 = vpack.c.bf16 %v57_v39, %v56_v38  ;;  %v41_v43 = vld [vmem:[%s389_s1 + $0x18] sm:$0xff]  ;;  %v55_v45 = vld [vmem:[%s389_s1 + $0x88] sm:$0xff]  ;;  %v38_v48 = vld [vmem:[%s389_s1] sm:$0xff] }
   0xc   :  { %v71_v46 = vpack.c.bf16 %v41_v43, %v40_v42  ;;  %v78_v47 = vpack.c.bf16 %v55_v45, %v54_v44  ;;  %v39_v49 = vld [vmem:[%s389_s1 + $0x8] sm:$0xff]  ;;  %v32_v51 = vld [vmem:[%s390_s0] sm:$0xff]  ;;  %v34_v52 = vld [vmem:[%s390_s0 + $0x10] sm:$0xff] }
   0xd   :  { %204 = vmatpush3.bf16.msra.mxu0 %v75_v19  ;;  %v70_v50 = vpack.c.bf16 %v39_v49, %v38_v48  ;;  %v36_v53 = vpack.c.bf16 %v34_v52, %v32_v51  ;;  %v196_v56 = vld [vmem:[%s391_s2] ss:$0 sm:$0xff]  ;;  %v146_v0 = vld [vmem:[%s392_s3 + $0x8] sm:$0xff] }
   0xe   :  { %205 = vmatprep.subr.bf16.mxu0 %v82_v20  ;;  %v145_v59 = vld [vmem:[%s392_s3] sm:$0xff] }
   0xf   :  { %v197_v18 = vld [vmem:[%s393_s4] ss:$0 sm:$0xff] }
  0x10   :  { %v198_v20 = vld [vmem:[%s394_s5] ss:$0 sm:$0xff] }
  0x11   :  { %206 = vmatpush3.bf16.msra.mxu0 %v74_v27 }
  0x12   :  { %207 = vmatprep.subr.bf16.mxu0 %v81_v29 }
  0x15   :  { %208 = vmatpush3.bf16.msra.mxu0 %v73_v34 }
  0x16   :  { %209 = vmatprep.subr.bf16.mxu0 %v80_v35 }
  0x19   :  { %210 = vmatpush3.bf16.msra.mxu0 %v72_v40 }
  0x1a   :  { %211 = vmatprep.subr.bf16.mxu0 %v79_v41 }
  0x1d   :  { %212 = vmatpush3.bf16.msra.mxu0 %v71_v46 }
  0x1e   :  { %213 = vmatprep.subr.bf16.mxu0 %v78_v47 }
  0x21   :  { %214 = vmatpush3.bf16.msra.mxu0 %v70_v50 }
  0x24   :  { %119 = vmatmul.mubr.bf16.vlgmr.msra.gmra.mxu0 %v36_v53 }
  0xe4   :  { %v215_v54 = vpop.f32.mrf.mxu0 }
  0xe6   :  { %v216_v55 = vpop.f32.mrf.mxu0 }
  0xe7   :  { %v217_v57 = vadd.f32 %v216_v55, %v215_v54 }
  0xe8   :  { %v218_v58 = vpop.f32.mrf.mxu0 }
  0xe9   :  { %v143_v60 = vadd.f32 %v217_v57, %v196_v56 }
  0xea   :  { %v219_v61 = vpop.f32.mrf.mxu0 }
  0xeb   :  { %v220_v62 = vadd.f32 %v219_v61, %v218_v58  ;;  %v147_v63 = vadd.f32 %v145_v59, %v143_v60 }
  0xed   :  { %v144_v1 = vadd.f32 %v220_v62, %v196_v56  ;;  %149 = vadd.xlane.f32.xlu0 %v147_v63 }
  0xef   :  { %v148_v2 = vadd.f32 %v146_v0, %v144_v1 }
  0xf1   :  { %151 = vadd.xlane.f32.xlu0 %v148_v2 }
 0x176   :  { %v150_v3 = vpop.xlane.xlu0 %149 }
 0x177   :  { %v154_v4 = vmul.f32 0.0078125, %v150_v3 }
 0x179   :  { %v156_v5 = vsub.f32 %v147_v63, %v154_v4 }
 0x17a   :  { %v152_v6 = vpop.xlane.xlu0 %151 }
 0x17b   :  { %v155_v7 = vmul.f32 0.0078125, %v152_v6  ;;  %v158_v8 = vmul.f32 %v156_v5, %v156_v5 }
 0x17d   :  { %v157_v9 = vsub.f32 %v148_v2, %v155_v7  ;;  %160 = vadd.xlane.f32.xlu1 %v158_v8 }
 0x17f   :  { %v159_v10 = vmul.f32 %v157_v9, %v157_v9 }
 0x181   :  { %162 = vadd.xlane.f32.xlu1 %v159_v10 }
 0x206   :  { %v161_v11 = vpop.xlane.xlu1 %160 }
 0x207   :  { %v164_v12 = vmul.f32 0.0078125, %v161_v11 }
 0x209   :  { %v166_v13 = vadd.f32 1e-05, %v164_v12 }
 0x20a   :  { %v163_v14 = vpop.xlane.xlu1 %162 }
 0x20b   :  { %221 = vrsqrt.f32 %v166_v13  ;;  %v165_v15 = vmul.f32 0.0078125, %v163_v14 }
 0x20d   :  { %v167_v16 = vadd.f32 1e-05, %v165_v15 }
 0x20f   :  { %223 = vrsqrt.f32 %v167_v16 }
 0x218   :  { %v222_v17 = vpop.eup %221 }
 0x219   :  { %v170_v19 = vmul.f32 %v222_v17, %v156_v5 }
 0x21b   :  { %v179_v21 = vmul.f32 %v197_v18, %v170_v19 }
 0x21c   :  { %v224_v22 = vpop.eup %223 }
 0x21d   :  { %v188_v23 = vadd.f32 %v198_v20, %v179_v21  ;;  %v171_v24 = vmul.f32 %v224_v22, %v157_v9 }
 0x21f   :  { %190 = vst [vmem:[%s395_s6] sm:$0xff] %v188_v23  ;;  %v180_v25 = vmul.f32 %v197_v18, %v171_v24 }
 0x221   :  { %v189_v26 = vadd.f32 %v198_v20, %v180_v25 }
 0x223   :  { %191 = vst [vmem:[%s395_s6 + $0x8] sm:$0xff] %v189_v26 }

// kernel: run.37
= control target key start
LH: loop header
LB: loop body
LE: loop exit
PB: predicated region body
PF: predicated region fallthrough
CT: control target
= control target key end

     0   :  { %s145_s0 = inlined_call_operand.vmem [shape: f32[16,128], index: 0, kind: input, shape index: {}]   ;;  %s146_s1 = inlined_call_operand.vmem [shape: f32[1,128], index: 1, kind: input, shape index: {}]   ;;  %s147_s2 = inlined_call_operand.vmem [shape: f32[1,128], index: 2, kind: input, shape index: {}]   ;;  %s148_s3 = inlined_call_operand.hbm [shape: f32[16,128], index: 3, kind: output, shape index: {}]  }
   0x1   :  { %v15_v0 = vld [vmem:[%s145_s0] sm:$0xff] }
   0x2   :  { %8 = vsyncpa [#allocation3], 0  ;;  %17 = vadd.xlane.f32.xlu0 %v15_v0  ;;  %v16_v1 = vld [vmem:[%s145_s0 + $0x8] sm:$0xff]  ;;  %v76_v17 = vld [vmem:[%s146_s1] ss:$0 sm:$0xff]  ;;  %s107_s19 = smov [#allocation2]  }
   0x3   :  { %v77_v19 = vld [vmem:[%s147_s2] ss:$0 sm:$0xff]  ;;  %s65_s20 = sshll.u32 %s107_s19, 4  ;;  %s66_s20 = int_to_ptr.vmem [resolvable:$true] %s65_s20 }
   0x4   :  { %s85_s21 = scalar_lea.vmem %s66_s20, 256  ;;  %p90_p1 = scmp.lt.s32.totalorder %s66_s20, %s66_s20 }
   0x5   :  { %p86_p0 = scmp.ne.s32.totalorder %s66_s20, %s85_s21  ;;  %p91_p2 = scmp.lt.s32.totalorder %s85_s21, %s85_s21 }
   0x6   :  { %19 = vadd.xlane.f32.xlu0 %v16_v1 }
   0x7   :  { %p92_p3 = por %p91_p2, %p90_p1 }
   0x9   :  { %p93_p4 = pnand %p92_p3, %p86_p0 }
  0x8b   :  { %v18_v2 = vpop.xlane.xlu0 %17 }
  0x8c   :  { %v22_v3 = vmul.f32 0.0078125, %v18_v2 }
  0x8e   :  { %v24_v4 = vsub.f32 %v15_v0, %v22_v3 }
  0x8f   :  { %v20_v5 = vpop.xlane.xlu0 %19 }
  0x90   :  { %v23_v6 = vmul.f32 0.0078125, %v20_v5  ;;  %v26_v7 = vmul.f32 %v24_v4, %v24_v4 }
  0x92   :  { %v25_v8 = vsub.f32 %v16_v1, %v23_v6  ;;  %28 = vadd.xlane.f32.xlu1 %v26_v7 }
  0x94   :  { %v27_v9 = vmul.f32 %v25_v8, %v25_v8 }
  0x96   :  { %30 = vadd.xlane.f32.xlu1 %v27_v9 }
 0x11b   :  { %v29_v10 = vpop.xlane.xlu1 %28 }
 0x11c   :  { %v32_v11 = vmul.f32 0.0078125, %v29_v10 }
 0x11e   :  { %v34_v12 = vadd.f32 1e-05, %v32_v11 }
 0x11f   :  { %v31_v13 = vpop.xlane.xlu1 %30 }
 0x120   :  { %81 = vrsqrt.f32 %v34_v12  ;;  %v33_v14 = vmul.f32 0.0078125, %v31_v13 }
 0x122   :  { %v35_v15 = vadd.f32 1e-05, %v33_v14 }
 0x124   :  { %83 = vrsqrt.f32 %v35_v15 }
 0x12d   :  { %v82_v16 = vpop.eup %81 }
 0x12e   :  { %v38_v18 = vmul.f32 %v82_v16, %v24_v4 }
 0x130   :  { %v47_v20 = vmul.f32 %v76_v17, %v38_v18 }
 0x131   :  { %v84_v21 = vpop.eup %83 }
 0x132   :  { %v39_v22 = vmul.f32 %v84_v21, %v25_v8  ;;  %v56_v23 = vadd.f32 %v77_v19, %v47_v20 }
 0x134   :  { %v48_v24 = vmul.f32 %v76_v17, %v39_v22  ;;  %58 = vst [vmem:[#allocation2] sm:$0xff] %v56_v23 }
 0x136   :  { %v57_v25 = vadd.f32 %v77_v19, %v48_v24 }
 0x138   :  { %59 = vst [vmem:[#allocation2 + $0x8] sm:$0xff] %v57_v25 }
 0x139   :  { %96 = shalt.err (!%p93_p4)
}
 0x13a   :  { %s108_s1 = smov 128   ;;  %s109_s2 = smov 8  }
 0x13b   :  { %71 = dma.vmem_to_hbm [thread:$0]  %s66_s20, 256, %s148_s3, [#allocation3], %s108_s1, %s108_s1, %s109_s2  }
 0x13c   :  { %105 = dma.done.wait [#allocation3], 256  }
 0x13d   :  { %106 = vsyncadd [#allocation3], 4294967040 }
 0x13e   :  { %75 = vsyncpa [#allocation3], 1 }

</bundles_post_ra>
